<compile_context>
chip_gen: v7x
topology: tpu7x:2x2x1
jax: 0.10.0
libtpu: 0.0.40
codegen_flags: <defaults>
</compile_context>

<pallas_src>
import jax
import jax.numpy as jnp
from jax import lax
from jax.experimental import pallas as pl
from jax.experimental.pallas import tpu as pltpu

EMBED_DIM = 128
VOCAB = 10
LN_EPS = 1e-5              # nn.LayerNorm default
CONV_ROW_TILE = 2048       # pooled-output rows per grid step for the conv kernels
FC_ROW_TILE = 256          # batch rows per grid step for the fc kernel
TEXT_ROW_TILE = 256        # batch rows per grid step for the text kernel
VMEM_LIMIT = 32 * 1024 * 1024


def _cparams(semantics):
    return pltpu.CompilerParams(dimension_semantics=semantics,
                                vmem_limit_bytes=VMEM_LIMIT)


def _row_tile(m, target):
    # target is a multiple of 8; if m <= target the block equals the full dim.
    return m if m <= target else target


# --------------------------------------------------------------------------
# Kernel 1/2: conv (as matmul over pre-extracted patches) + 2x2 pool + bias + ReLU
# --------------------------------------------------------------------------
def _conv_relu_pool_kernel(p_ref, w_ref, b_ref, o_ref):
    # p_ref: [4, tm, K]   (4 = 2x2 pooling-window positions of each pooled pixel)
    # w_ref: [K, N] bf16, b_ref: [1, N] f32, o_ref: [tm, N] bf16
    w = w_ref[...]
    y = jnp.dot(p_ref[0], w, preferred_element_type=jnp.float32)
    for idx in range(1, 4):
        y = jnp.maximum(y, jnp.dot(p_ref[idx], w, preferred_element_type=jnp.float32))
    # bias + ReLU once, *after* the pooling max (both commute with max).
    o_ref[...] = jnp.maximum(y + b_ref[...], 0.0).astype(o_ref.dtype)


def conv_relu_pool(patches, w, b, *, tile=CONV_ROW_TILE):
    """patches: [4, M, K] bf16; w: [K, N] bf16; b: [1, N] f32 -> pooled output [M, N] bf16."""
    _, M, K = patches.shape
    N = w.shape[1]
    tm = _row_tile(M, tile)
    return pl.pallas_call(
        _conv_relu_pool_kernel,
        out_shape=jax.ShapeDtypeStruct((M, N), jnp.bfloat16),
        grid=(pl.cdiv(M, tm),),
        in_specs=[
            pl.BlockSpec((4, tm, K), lambda i: (0, i, 0)),
            pl.BlockSpec((K, N), lambda i: (0, 0)),
            pl.BlockSpec((1, N), lambda i: (0, 0)),
        ],
        out_specs=pl.BlockSpec((tm, N), lambda i: (i, 0)),
        compiler_params=_cparams(("parallel",)),
    )(patches, w, b)


# --------------------------------------------------------------------------
# Kernel 3: fc matmul + bias + LayerNorm (fused epilogue, 128-lane-dense output)
# --------------------------------------------------------------------------
def _fc_layernorm_kernel(x_ref, w_ref, b_ref, g_ref, beta_ref, o_ref):
    y = jnp.dot(x_ref[...], w_ref[...], preferred_element_type=jnp.float32)
    y = y + b_ref[...]
    mean = jnp.mean(y, axis=-1, keepdims=True)
    var = jnp.mean(y * y, axis=-1, keepdims=True) - mean * mean   # single-pass variance
    o_ref[...] = (y - mean) * lax.rsqrt(var + LN_EPS) * g_ref[...] + beta_ref[...]


def fc_layernorm(x, w, b, gamma, beta, *, tile=FC_ROW_TILE):
    """x: [M, K] bf16; w: [K, N] bf16; b/gamma/beta: [1, N] f32 -> LayerNorm(x @ w + b) f32."""
    M, K = x.shape
    N = w.shape[1]
    tm = _row_tile(M, tile)
    return pl.pallas_call(
        _fc_layernorm_kernel,
        out_shape=jax.ShapeDtypeStruct((M, N), jnp.float32),
        grid=(pl.cdiv(M, tm),),
        in_specs=[
            pl.BlockSpec((tm, K), lambda i: (i, 0)),
            pl.BlockSpec((K, N), lambda i: (0, 0)),
            pl.BlockSpec((1, N), lambda i: (0, 0)),
            pl.BlockSpec((1, N), lambda i: (0, 0)),
            pl.BlockSpec((1, N), lambda i: (0, 0)),
        ],
        out_specs=pl.BlockSpec((tm, N), lambda i: (i, 0)),
        compiler_params=_cparams(("parallel",)),
    )(x, w, b, gamma, beta)


# --------------------------------------------------------------------------
# Kernel 4: text embedding as one-hot MXU matmul + LayerNorm (B-tiled, parallel)
# --------------------------------------------------------------------------
def _text_kernel(lab_ref, tab_ref, g_ref, b_ref, o_ref):
    # lab_ref: [tb, 1] int32; tab_ref: [V, D] f32; g/b: [1, D]; o_ref: [tb, D]
    tb = lab_ref.shape[0]
    V = tab_ref.shape[0]
    onehot = (lax.broadcasted_iota(jnp.int32, (tb, V), 1) == lab_ref[...]).astype(jnp.float32)
    x = jnp.dot(onehot, tab_ref[...], preferred_element_type=jnp.float32)
    mean = jnp.mean(x, axis=-1, keepdims=True)
    var = jnp.mean(x * x, axis=-1, keepdims=True) - mean * mean
    o_ref[...] = (x - mean) * lax.rsqrt(var + LN_EPS) * g_ref[...] + b_ref[...]


def text_embed_norm(labels, table, gamma, beta, *, tile=TEXT_ROW_TILE):
    """labels: [B] int; table: [V, D]; gamma/beta: [1, D] -> [B, D] f32."""
    B = labels.shape[0]
    V, D = table.shape
    tb = _row_tile(B, tile)
    labels2 = labels.astype(jnp.int32).reshape(B, 1)   # torch uses int64; int32 on TPU
    return pl.pallas_call(
        _text_kernel,
        out_shape=jax.ShapeDtypeStruct((B, D), jnp.float32),
        grid=(pl.cdiv(B, tb),),
        in_specs=[
            pl.BlockSpec((tb, 1), lambda i: (i, 0)),
            pl.BlockSpec((V, D), lambda i: (0, 0)),
            pl.BlockSpec((1, D), lambda i: (0, 0)),
            pl.BlockSpec((1, D), lambda i: (0, 0)),
        ],
        out_specs=pl.BlockSpec((tb, D), lambda i: (i, 0)),
        compiler_params=_cparams(("parallel",)),
    )(labels2, table, gamma, beta)


# --------------------------------------------------------------------------
# JAX glue: pool-grouped im2col built from stride-2 slices (no 6-D HBM transpose)
# --------------------------------------------------------------------------
def pooled_im2col_3x3(x):
    """x: [B,H,W,C] (3x3 conv, pad=1, then 2x2 pool) -> [4, B*(H//2)*(W//2), C*9].

    axis 0 : position inside the 2x2 pooling window (ph*2 + pw)
    axis 1 : pooled output pixel, ordered (b, oh, ow)
    axis 2 : patch features ordered (cin, kh, kw) == torch weight.reshape(Cout, Cin*9)
    """
    B, H, W, C = x.shape
    xp = jnp.pad(x, ((0, 0), (1, 1), (1, 1), (0, 0)))
    groups = []
    for ph in range(2):
        for pw in range(2):
            taps = [xp[:, ph + dh:ph + dh + H - 1:2, pw + dw:pw + dw + W - 1:2, :]
                    for dh in range(3) for dw in range(3)]       # each [B, H/2, W/2, C]
            p = jnp.stack(taps, axis=-1)                          # [B, H/2, W/2, C, 9]
            groups.append(p.reshape(B * (H // 2) * (W // 2), C * 9))
    return jnp.stack(groups, axis=0)                              # [4, M, C*9]


# --------------------------------------------------------------------------
# Parameters: torch-layout init + one-time kernel-layout preparation
# --------------------------------------------------------------------------
def init_params(key):
    ks = jax.random.split(key, 7)

    def rn(k, shape, scale=0.05):
        return (scale * jax.random.normal(k, shape)).astype(jnp.float32)

    return {
        "conv1_w": rn(ks[0], (32, 1, 3, 3)),           # torch: [Cout, Cin, Kh, Kw]
        "conv1_b": rn(ks[1], (32,)),
        "conv2_w": rn(ks[2], (64, 32, 3, 3)),
        "conv2_b": rn(ks[3], (64,)),
        "fc_w": rn(ks[4], (EMBED_DIM, 64 * 7 * 7)),    # torch Linear: [out, in] (in = NCHW flatten)
        "fc_b": rn(ks[5], (EMBED_DIM,)),
        "emb_table": rn(ks[6], (VOCAB, EMBED_DIM), scale=1.0),
        "img_ln_g": jnp.ones((EMBED_DIM,), jnp.float32),
        "img_ln_b": jnp.zeros((EMBED_DIM,), jnp.float32),
        "txt_ln_g": jnp.ones((EMBED_DIM,), jnp.float32),
        "txt_ln_b": jnp.zeros((EMBED_DIM,), jnp.float32),
    }


def prepare_params(p):
    """One-time re-layout of torch-style params for the kernels (off the critical path)."""
    # Fold the NCHW flatten into the fc weight: columns reordered (c,h,w) -> (h,w,c).
    fc_w = p["fc_w"].reshape(EMBED_DIM, 64, 7, 7).transpose(0, 2, 3, 1)
    fc_w = fc_w.reshape(EMBED_DIM, 7 * 7 * 64).T                          # [3136(hwc), 128]
    return {
        "conv1_w": p["conv1_w"].reshape(32, 9).T.astype(jnp.bfloat16),    # [9, 32]
        "conv1_b": p["conv1_b"].reshape(1, 32),
        "conv2_w": p["conv2_w"].reshape(64, 32 * 9).T.astype(jnp.bfloat16),  # [288, 64]
        "conv2_b": p["conv2_b"].reshape(1, 64),
        "fc_w": fc_w.astype(jnp.bfloat16),                                # [3136, 128]
        "fc_b": p["fc_b"].reshape(1, EMBED_DIM),
        "emb_table": p["emb_table"],                                      # [10, 128] f32
        "img_ln_g": p["img_ln_g"].reshape(1, EMBED_DIM),
        "img_ln_b": p["img_ln_b"].reshape(1, EMBED_DIM),
        "txt_ln_g": p["txt_ln_g"].reshape(1, EMBED_DIM),
        "txt_ln_b": p["txt_ln_b"].reshape(1, EMBED_DIM),
    }


# --------------------------------------------------------------------------
# Model forward (== JointEmbeddingModel.forward)
# --------------------------------------------------------------------------
def joint_embedding_forward(kp, images, text_labels):
    """images: [B,1,28,28] float32 (NCHW), text_labels: [B] int -> (img_emb, text_emb)."""
    B = images.shape[0]
    # NCHW with C=1 is bit-identical to NHWC; cast to bf16 BEFORE im2col.
    x = images.reshape(B, 28, 28, 1).astype(jnp.bfloat16)

    # Conv2d(1,32,3,pad=1) + ReLU + MaxPool2d(2)    -> [B,14,14,32] bf16
    p1 = pooled_im2col_3x3(x)                                     # [4, B*196, 9]   bf16
    h1 = conv_relu_pool(p1, kp["conv1_w"], kp["conv1_b"]).reshape(B, 14, 14, 32)

    # Conv2d(32,64,3,pad=1) + ReLU + MaxPool2d(2)   -> [B*49, 64] bf16 (rows = (b,oh,ow))
    p2 = pooled_im2col_3x3(h1)                                    # [4, B*49, 288]  bf16
    h2 = conv_relu_pool(p2, kp["conv2_w"], kp["conv2_b"])         # [B*49, 64]      bf16

    # Flatten (NHWC; the NCHW permutation is folded into fc_w) + Linear + LayerNorm
    flat = h2.reshape(B, 7 * 7 * 64)                              # [B, 3136] bf16 (no cast pass)
    img_emb = fc_layernorm(flat, kp["fc_w"], kp["fc_b"],
                           kp["img_ln_g"], kp["img_ln_b"])

    # Embedding (one-hot MXU matmul) + LayerNorm
    text_emb = text_embed_norm(text_labels, kp["emb_table"],
                               kp["txt_ln_g"], kp["txt_ln_b"])
    return img_emb, text_emb


if __name__ == "__main__":
    key = jax.random.PRNGKey(0)
    pkey, ikey, lkey = jax.random.split(key, 3)
    params = prepare_params(init_params(pkey))

    B = 2
    # Spatial size must be 28 (MNIST): the Linear layer expects 64*7*7 inputs.
    images = jax.random.normal(ikey, (B, 1, 28, 28), dtype=jnp.float32)
    text_labels = jax.random.randint(lkey, (B,), 0, VOCAB, dtype=jnp.int32)

    img_emb, text_emb = jax.jit(joint_embedding_forward)(params, images, text_labels)
    jax.block_until_ready((img_emb, text_emb))

    assert img_emb.shape == (B, EMBED_DIM) and img_emb.dtype == jnp.float32
    assert text_emb.shape == (B, EMBED_DIM) and text_emb.dtype == jnp.float32
    print("KERNEL_OK")
</pallas_src>

<mosaic_0001>
module attributes {stable_mosaic.version = 11 : i64} {
  func.func @_conv_relu_pool_kernel(%arg0: i32, %arg1: memref<4x392x9xbf16, #tpu.memory_space<vmem>>, %arg2: memref<9x32xbf16, #tpu.memory_space<vmem>>, %arg3: memref<1x32xf32, #tpu.memory_space<vmem>>, %arg4: memref<392x32xbf16, #tpu.memory_space<vmem>>) attributes {dimension_semantics = [#tpu.dimension_semantics<parallel>], iteration_bounds = array<i64: 1>, scalar_prefetch = 0 : i64, scratch_operands = 0 : i64, tpu.core_type = #tpu.core_type<tc>, window_params = [{transform_indices = @transform_0, window_bounds = array<i64: 4, 392, 9>}, {pipeline_mode = #tpu.pipeline_mode<synchronous>, transform_indices = @transform_1, window_bounds = array<i64: 9, 32>}, {pipeline_mode = #tpu.pipeline_mode<synchronous>, transform_indices = @transform_2, window_bounds = array<i64: 1, 32>}, {transform_indices = @transform_3, window_bounds = array<i64: 392, 32>}]} {
    %c0 = arith.constant 0 : index
    %c0_0 = arith.constant 0 : index
    %0 = vector.load %arg2[%c0, %c0_0] : memref<9x32xbf16, #tpu.memory_space<vmem>>, vector<9x32xbf16>
    %c0_1 = arith.constant 0 : index
    %c0_2 = arith.constant 0 : index
    %c0_3 = arith.constant 0 : index
    %1 = vector.load %arg1[%c0_1, %c0_2, %c0_3] : memref<4x392x9xbf16, #tpu.memory_space<vmem>>, vector<1x392x9xbf16>
    %2 = vector.shape_cast %1 : vector<1x392x9xbf16> to vector<392x9xbf16>
    %cst = arith.constant dense<0.000000e+00> : vector<392x32xf32>
    %3 = tpu.matmul %2, %0, %cst {dimension_numbers = #tpu.dot_dimension_numbers<[1], [0], [0], [1], [0, 0, 1, 1], [], []>} : vector<392x9xbf16>, vector<9x32xbf16>, vector<392x32xf32> -> vector<392x32xf32>
    %c1 = arith.constant 1 : index
    %c0_4 = arith.constant 0 : index
    %c0_5 = arith.constant 0 : index
    %4 = vector.load %arg1[%c1, %c0_4, %c0_5] : memref<4x392x9xbf16, #tpu.memory_space<vmem>>, vector<1x392x9xbf16>
    %5 = vector.shape_cast %4 : vector<1x392x9xbf16> to vector<392x9xbf16>
    %cst_6 = arith.constant dense<0.000000e+00> : vector<392x32xf32>
    %6 = tpu.matmul %5, %0, %cst_6 {dimension_numbers = #tpu.dot_dimension_numbers<[1], [0], [0], [1], [0, 0, 1, 1], [], []>} : vector<392x9xbf16>, vector<9x32xbf16>, vector<392x32xf32> -> vector<392x32xf32>
    %7 = arith.maximumf %3, %6 : vector<392x32xf32>
    %c2 = arith.constant 2 : index
    %c0_7 = arith.constant 0 : index
    %c0_8 = arith.constant 0 : index
    %8 = vector.load %arg1[%c2, %c0_7, %c0_8] : memref<4x392x9xbf16, #tpu.memory_space<vmem>>, vector<1x392x9xbf16>
    %9 = vector.shape_cast %8 : vector<1x392x9xbf16> to vector<392x9xbf16>
    %cst_9 = arith.constant dense<0.000000e+00> : vector<392x32xf32>
    %10 = tpu.matmul %9, %0, %cst_9 {dimension_numbers = #tpu.dot_dimension_numbers<[1], [0], [0], [1], [0, 0, 1, 1], [], []>} : vector<392x9xbf16>, vector<9x32xbf16>, vector<392x32xf32> -> vector<392x32xf32>
    %11 = arith.maximumf %7, %10 : vector<392x32xf32>
    %c3 = arith.constant 3 : index
    %c0_10 = arith.constant 0 : index
    %c0_11 = arith.constant 0 : index
    %12 = vector.load %arg1[%c3, %c0_10, %c0_11] : memref<4x392x9xbf16, #tpu.memory_space<vmem>>, vector<1x392x9xbf16>
    %13 = vector.shape_cast %12 : vector<1x392x9xbf16> to vector<392x9xbf16>
    %cst_12 = arith.constant dense<0.000000e+00> : vector<392x32xf32>
    %14 = tpu.matmul %13, %0, %cst_12 {dimension_numbers = #tpu.dot_dimension_numbers<[1], [0], [0], [1], [0, 0, 1, 1], [], []>} : vector<392x9xbf16>, vector<9x32xbf16>, vector<392x32xf32> -> vector<392x32xf32>
    %15 = arith.maximumf %11, %14 : vector<392x32xf32>
    %c0_13 = arith.constant 0 : index
    %c0_14 = arith.constant 0 : index
    %16 = vector.load %arg3[%c0_13, %c0_14] : memref<1x32xf32, #tpu.memory_space<vmem>>, vector<1x32xf32>
    %17 = vector.broadcast %16 : vector<1x32xf32> to vector<392x32xf32>
    %18 = arith.addf %15, %17 : vector<392x32xf32>
    %cst_15 = arith.constant 0.000000e+00 : f32
    %19 = vector.broadcast %cst_15 : f32 to vector<392x32xf32>
    %20 = arith.maximumf %18, %19 : vector<392x32xf32>
    %21 = arith.truncf %20 : vector<392x32xf32> to vector<392x32xbf16>
    %c0_16 = arith.constant 0 : index
    %c0_17 = arith.constant 0 : index
    %22 = vector.load %arg4[%c0_16, %c0_17] : memref<392x32xbf16, #tpu.memory_space<vmem>>, vector<392x32xbf16>
    tpu.vector_store %arg4[%c0_16, %c0_17], %21 {strides = array<i32>} : memref<392x32xbf16, #tpu.memory_space<vmem>>, vector<392x32xbf16>,
    return
  }
  func.func @transform_0(%arg0: i32) -> (i32, i32, i32) {
    %c0_i32 = arith.constant 0 : i32
    %c0_i32_0 = arith.constant 0 : i32
    %c0_i32_1 = arith.constant 0 : i32
    return %c0_i32, %arg0, %c0_i32_0 : i32, i32, i32
  }
  func.func @transform_1(%arg0: i32) -> (i32, i32) {
    %c0_i32 = arith.constant 0 : i32
    %c0_i32_0 = arith.constant 0 : i32
    %c0_i32_1 = arith.constant 0 : i32
    return %c0_i32, %c0_i32_0 : i32, i32
  }
  func.func @transform_2(%arg0: i32) -> (i32, i32) {
    %c0_i32 = arith.constant 0 : i32
    %c0_i32_0 = arith.constant 0 : i32
    %c0_i32_1 = arith.constant 0 : i32
    return %c0_i32, %c0_i32_0 : i32, i32
  }
  func.func @transform_3(%arg0: i32) -> (i32, i32) {
    %c0_i32 = arith.constant 0 : i32
    %c0_i32_0 = arith.constant 0 : i32
    return %arg0, %c0_i32 : i32, i32
  }
}

module attributes {stable_mosaic.version = 11 : i64} {
  func.func @_conv_relu_pool_kernel(%arg0: i32, %arg1: memref<4x98x288xbf16, #tpu.memory_space<vmem>>, %arg2: memref<288x64xbf16, #tpu.memory_space<vmem>>, %arg3: memref<1x64xf32, #tpu.memory_space<vmem>>, %arg4: memref<98x64xbf16, #tpu.memory_space<vmem>>) attributes {dimension_semantics = [#tpu.dimension_semantics<parallel>], iteration_bounds = array<i64: 1>, scalar_prefetch = 0 : i64, scratch_operands = 0 : i64, tpu.core_type = #tpu.core_type<tc>, window_params = [{transform_indices = @transform_0, window_bounds = array<i64: 4, 98, 288>}, {pipeline_mode = #tpu.pipeline_mode<synchronous>, transform_indices = @transform_1, window_bounds = array<i64: 288, 64>}, {pipeline_mode = #tpu.pipeline_mode<synchronous>, transform_indices = @transform_2, window_bounds = array<i64: 1, 64>}, {transform_indices = @transform_3, window_bounds = array<i64: 98, 64>}]} {
    %c0 = arith.constant 0 : index
    %c0_0 = arith.constant 0 : index
    %0 = vector.load %arg2[%c0, %c0_0] : memref<288x64xbf16, #tpu.memory_space<vmem>>, vector<288x64xbf16>
    %c0_1 = arith.constant 0 : index
    %c0_2 = arith.constant 0 : index
    %c0_3 = arith.constant 0 : index
    %1 = vector.load %arg1[%c0_1, %c0_2, %c0_3] : memref<4x98x288xbf16, #tpu.memory_space<vmem>>, vector<1x98x288xbf16>
    %2 = vector.shape_cast %1 : vector<1x98x288xbf16> to vector<98x288xbf16>
    %cst = arith.constant dense<0.000000e+00> : vector<98x64xf32>
    %3 = tpu.matmul %2, %0, %cst {dimension_numbers = #tpu.dot_dimension_numbers<[1], [0], [0], [1], [0, 0, 1, 1], [], []>} : vector<98x288xbf16>, vector<288x64xbf16>, vector<98x64xf32> -> vector<98x64xf32>
    %c1 = arith.constant 1 : index
    %c0_4 = arith.constant 0 : index
    %c0_5 = arith.constant 0 : index
    %4 = vector.load %arg1[%c1, %c0_4, %c0_5] : memref<4x98x288xbf16, #tpu.memory_space<vmem>>, vector<1x98x288xbf16>
    %5 = vector.shape_cast %4 : vector<1x98x288xbf16> to vector<98x288xbf16>
    %cst_6 = arith.constant dense<0.000000e+00> : vector<98x64xf32>
    %6 = tpu.matmul %5, %0, %cst_6 {dimension_numbers = #tpu.dot_dimension_numbers<[1], [0], [0], [1], [0, 0, 1, 1], [], []>} : vector<98x288xbf16>, vector<288x64xbf16>, vector<98x64xf32> -> vector<98x64xf32>
    %7 = arith.maximumf %3, %6 : vector<98x64xf32>
    %c2 = arith.constant 2 : index
    %c0_7 = arith.constant 0 : index
    %c0_8 = arith.constant 0 : index
    %8 = vector.load %arg1[%c2, %c0_7, %c0_8] : memref<4x98x288xbf16, #tpu.memory_space<vmem>>, vector<1x98x288xbf16>
    %9 = vector.shape_cast %8 : vector<1x98x288xbf16> to vector<98x288xbf16>
    %cst_9 = arith.constant dense<0.000000e+00> : vector<98x64xf32>
    %10 = tpu.matmul %9, %0, %cst_9 {dimension_numbers = #tpu.dot_dimension_numbers<[1], [0], [0], [1], [0, 0, 1, 1], [], []>} : vector<98x288xbf16>, vector<288x64xbf16>, vector<98x64xf32> -> vector<98x64xf32>
    %11 = arith.maximumf %7, %10 : vector<98x64xf32>
    %c3 = arith.constant 3 : index
    %c0_10 = arith.constant 0 : index
    %c0_11 = arith.constant 0 : index
    %12 = vector.load %arg1[%c3, %c0_10, %c0_11] : memref<4x98x288xbf16, #tpu.memory_space<vmem>>, vector<1x98x288xbf16>
    %13 = vector.shape_cast %12 : vector<1x98x288xbf16> to vector<98x288xbf16>
    %cst_12 = arith.constant dense<0.000000e+00> : vector<98x64xf32>
    %14 = tpu.matmul %13, %0, %cst_12 {dimension_numbers = #tpu.dot_dimension_numbers<[1], [0], [0], [1], [0, 0, 1, 1], [], []>} : vector<98x288xbf16>, vector<288x64xbf16>, vector<98x64xf32> -> vector<98x64xf32>
    %15 = arith.maximumf %11, %14 : vector<98x64xf32>
    %c0_13 = arith.constant 0 : index
    %c0_14 = arith.constant 0 : index
    %16 = vector.load %arg3[%c0_13, %c0_14] : memref<1x64xf32, #tpu.memory_space<vmem>>, vector<1x64xf32>
    %17 = vector.broadcast %16 : vector<1x64xf32> to vector<98x64xf32>
    %18 = arith.addf %15, %17 : vector<98x64xf32>
    %cst_15 = arith.constant 0.000000e+00 : f32
    %19 = vector.broadcast %cst_15 : f32 to vector<98x64xf32>
    %20 = arith.maximumf %18, %19 : vector<98x64xf32>
    %21 = arith.truncf %20 : vector<98x64xf32> to vector<98x64xbf16>
    %c0_16 = arith.constant 0 : index
    %c0_17 = arith.constant 0 : index
    %22 = vector.load %arg4[%c0_16, %c0_17] : memref<98x64xbf16, #tpu.memory_space<vmem>>, vector<98x64xbf16>
    tpu.vector_store %arg4[%c0_16, %c0_17], %21 {strides = array<i32>} : memref<98x64xbf16, #tpu.memory_space<vmem>>, vector<98x64xbf16>,
    return
  }
  func.func @transform_0(%arg0: i32) -> (i32, i32, i32) {
    %c0_i32 = arith.constant 0 : i32
    %c0_i32_0 = arith.constant 0 : i32
    %c0_i32_1 = arith.constant 0 : i32
    return %c0_i32, %arg0, %c0_i32_0 : i32, i32, i32
  }
  func.func @transform_1(%arg0: i32) -> (i32, i32) {
    %c0_i32 = arith.constant 0 : i32
    %c0_i32_0 = arith.constant 0 : i32
    %c0_i32_1 = arith.constant 0 : i32
    return %c0_i32, %c0_i32_0 : i32, i32
  }
  func.func @transform_2(%arg0: i32) -> (i32, i32) {
    %c0_i32 = arith.constant 0 : i32
    %c0_i32_0 = arith.constant 0 : i32
    %c0_i32_1 = arith.constant 0 : i32
    return %c0_i32, %c0_i32_0 : i32, i32
  }
  func.func @transform_3(%arg0: i32) -> (i32, i32) {
    %c0_i32 = arith.constant 0 : i32
    %c0_i32_0 = arith.constant 0 : i32
    return %arg0, %c0_i32 : i32, i32
  }
}

module attributes {stable_mosaic.version = 11 : i64} {
  func.func @_fc_layernorm_kernel(%arg0: i32, %arg1: memref<2x3136xbf16, #tpu.memory_space<vmem>>, %arg2: memref<3136x128xbf16, #tpu.memory_space<vmem>>, %arg3: memref<1x128xf32, #tpu.memory_space<vmem>>, %arg4: memref<1x128xf32, #tpu.memory_space<vmem>>, %arg5: memref<1x128xf32, #tpu.memory_space<vmem>>, %arg6: memref<2x128xf32, #tpu.memory_space<vmem>>) attributes {dimension_semantics = [#tpu.dimension_semantics<parallel>], iteration_bounds = array<i64: 1>, scalar_prefetch = 0 : i64, scratch_operands = 0 : i64, tpu.core_type = #tpu.core_type<tc>, window_params = [{transform_indices = @transform_0, window_bounds = array<i64: 2, 3136>}, {pipeline_mode = #tpu.pipeline_mode<synchronous>, transform_indices = @transform_1, window_bounds = array<i64: 3136, 128>}, {pipeline_mode = #tpu.pipeline_mode<synchronous>, transform_indices = @transform_2, window_bounds = array<i64: 1, 128>}, {pipeline_mode = #tpu.pipeline_mode<synchronous>, transform_indices = @transform_3, window_bounds = array<i64: 1, 128>}, {pipeline_mode = #tpu.pipeline_mode<synchronous>, transform_indices = @transform_4, window_bounds = array<i64: 1, 128>}, {transform_indices = @transform_5, window_bounds = array<i64: 2, 128>}]} {
    %c0 = arith.constant 0 : index
    %c0_0 = arith.constant 0 : index
    %0 = vector.load %arg1[%c0, %c0_0] : memref<2x3136xbf16, #tpu.memory_space<vmem>>, vector<2x3136xbf16>
    %c0_1 = arith.constant 0 : index
    %c0_2 = arith.constant 0 : index
    %1 = vector.load %arg2[%c0_1, %c0_2] : memref<3136x128xbf16, #tpu.memory_space<vmem>>, vector<3136x128xbf16>
    %cst = arith.constant dense<0.000000e+00> : vector<2x128xf32>
    %2 = tpu.matmul %0, %1, %cst {dimension_numbers = #tpu.dot_dimension_numbers<[1], [0], [0], [1], [0, 0, 1, 1], [], []>} : vector<2x3136xbf16>, vector<3136x128xbf16>, vector<2x128xf32> -> vector<2x128xf32>
    %c0_3 = arith.constant 0 : index
    %c0_4 = arith.constant 0 : index
    %3 = vector.load %arg3[%c0_3, %c0_4] : memref<1x128xf32, #tpu.memory_space<vmem>>, vector<1x128xf32>
    %4 = vector.broadcast %3 : vector<1x128xf32> to vector<2x128xf32>
    %5 = arith.addf %2, %4 : vector<2x128xf32>
    %cst_5 = arith.constant dense<0.000000e+00> : vector<2xf32>
    %6 = vector.multi_reduction <add>, %5, %cst_5 [1] : vector<2x128xf32> to vector<2xf32>
    %7 = vector.shape_cast %6 : vector<2xf32> to vector<2x1xf32>
    %cst_6 = arith.constant 1.280000e+02 : f32
    %8 = vector.broadcast %cst_6 : f32 to vector<2x1xf32>
    %9 = arith.divf %7, %8 : vector<2x1xf32>
    %10 = arith.mulf %5, %5 : vector<2x128xf32>
    %cst_7 = arith.constant dense<0.000000e+00> : vector<2xf32>
    %11 = vector.multi_reduction <add>, %10, %cst_7 [1] : vector<2x128xf32> to vector<2xf32>
    %12 = vector.shape_cast %11 : vector<2xf32> to vector<2x1xf32>
    %cst_8 = arith.constant 1.280000e+02 : f32
    %13 = vector.broadcast %cst_8 : f32 to vector<2x1xf32>
    %14 = arith.divf %12, %13 : vector<2x1xf32>
    %15 = arith.mulf %9, %9 : vector<2x1xf32>
    %16 = arith.subf %14, %15 : vector<2x1xf32>
    %17 = vector.broadcast %9 : vector<2x1xf32> to vector<2x128xf32>
    %18 = arith.subf %5, %17 : vector<2x128xf32>
    %cst_9 = arith.constant 9.99999974E-6 : f32
    %19 = vector.broadcast %cst_9 : f32 to vector<2x1xf32>
    %20 = arith.addf %16, %19 : vector<2x1xf32>
    %21 = math.rsqrt %20 : vector<2x1xf32>
    %22 = vector.broadcast %21 : vector<2x1xf32> to vector<2x128xf32>
    %23 = arith.mulf %18, %22 : vector<2x128xf32>
    %c0_10 = arith.constant 0 : index
    %c0_11 = arith.constant 0 : index
    %24 = vector.load %arg4[%c0_10, %c0_11] : memref<1x128xf32, #tpu.memory_space<vmem>>, vector<1x128xf32>
    %25 = vector.broadcast %24 : vector<1x128xf32> to vector<2x128xf32>
    %26 = arith.mulf %23, %25 : vector<2x128xf32>
    %c0_12 = arith.constant 0 : index
    %c0_13 = arith.constant 0 : index
    %27 = vector.load %arg5[%c0_12, %c0_13] : memref<1x128xf32, #tpu.memory_space<vmem>>, vector<1x128xf32>
    %28 = vector.broadcast %27 : vector<1x128xf32> to vector<2x128xf32>
    %29 = arith.addf %26, %28 : vector<2x128xf32>
    %c0_14 = arith.constant 0 : index
    %c0_15 = arith.constant 0 : index
    %30 = vector.load %arg6[%c0_14, %c0_15] : memref<2x128xf32, #tpu.memory_space<vmem>>, vector<2x128xf32>
    tpu.vector_store %arg6[%c0_14, %c0_15], %29 {strides = array<i32>} : memref<2x128xf32, #tpu.memory_space<vmem>>, vector<2x128xf32>,
    return
  }
  func.func @transform_0(%arg0: i32) -> (i32, i32) {
    %c0_i32 = arith.constant 0 : i32
    %c0_i32_0 = arith.constant 0 : i32
    return %arg0, %c0_i32 : i32, i32
  }
  func.func @transform_1(%arg0: i32) -> (i32, i32) {
    %c0_i32 = arith.constant 0 : i32
    %c0_i32_0 = arith.constant 0 : i32
    %c0_i32_1 = arith.constant 0 : i32
    return %c0_i32, %c0_i32_0 : i32, i32
  }
  func.func @transform_2(%arg0: i32) -> (i32, i32) {
    %c0_i32 = arith.constant 0 : i32
    %c0_i32_0 = arith.constant 0 : i32
    %c0_i32_1 = arith.constant 0 : i32
    return %c0_i32, %c0_i32_0 : i32, i32
  }
  func.func @transform_3(%arg0: i32) -> (i32, i32) {
    %c0_i32 = arith.constant 0 : i32
    %c0_i32_0 = arith.constant 0 : i32
    %c0_i32_1 = arith.constant 0 : i32
    return %c0_i32, %c0_i32_0 : i32, i32
  }
  func.func @transform_4(%arg0: i32) -> (i32, i32) {
    %c0_i32 = arith.constant 0 : i32
    %c0_i32_0 = arith.constant 0 : i32
    %c0_i32_1 = arith.constant 0 : i32
    return %c0_i32, %c0_i32_0 : i32, i32
  }
  func.func @transform_5(%arg0: i32) -> (i32, i32) {
    %c0_i32 = arith.constant 0 : i32
    %c0_i32_0 = arith.constant 0 : i32
    return %arg0, %c0_i32 : i32, i32
  }
}

module attributes {stable_mosaic.version = 11 : i64} {
  func.func @_text_kernel(%arg0: i32, %arg1: memref<2x1xi32, #tpu.memory_space<vmem>>, %arg2: memref<10x128xf32, #tpu.memory_space<vmem>>, %arg3: memref<1x128xf32, #tpu.memory_space<vmem>>, %arg4: memref<1x128xf32, #tpu.memory_space<vmem>>, %arg5: memref<2x128xf32, #tpu.memory_space<vmem>>) attributes {dimension_semantics = [#tpu.dimension_semantics<parallel>], iteration_bounds = array<i64: 1>, scalar_prefetch = 0 : i64, scratch_operands = 0 : i64, tpu.core_type = #tpu.core_type<tc>, window_params = [{transform_indices = @transform_0, window_bounds = array<i64: 2, 1>}, {pipeline_mode = #tpu.pipeline_mode<synchronous>, transform_indices = @transform_1, window_bounds = array<i64: 10, 128>}, {pipeline_mode = #tpu.pipeline_mode<synchronous>, transform_indices = @transform_2, window_bounds = array<i64: 1, 128>}, {pipeline_mode = #tpu.pipeline_mode<synchronous>, transform_indices = @transform_3, window_bounds = array<i64: 1, 128>}, {transform_indices = @transform_4, window_bounds = array<i64: 2, 128>}]} {
    %0 = tpu.iota {dimensions = array<i32: 1>} : vector<2x10xi32>
    %c0 = arith.constant 0 : index
    %c0_0 = arith.constant 0 : index
    %1 = vector.load %arg1[%c0, %c0_0] : memref<2x1xi32, #tpu.memory_space<vmem>>, vector<2x1xi32>
    %2 = vector.broadcast %1 : vector<2x1xi32> to vector<2x10xi32>
    %3 = arith.cmpi eq, %0, %2 : vector<2x10xi32>
    %4 = arith.extui %3 : vector<2x10xi1> to vector<2x10xi32>
    %5 = arith.sitofp %4 : vector<2x10xi32> to vector<2x10xf32>
    %c0_1 = arith.constant 0 : index
    %c0_2 = arith.constant 0 : index
    %6 = vector.load %arg2[%c0_1, %c0_2] : memref<10x128xf32, #tpu.memory_space<vmem>>, vector<10x128xf32>
    %cst = arith.constant dense<0.000000e+00> : vector<2x128xf32>
    %7 = tpu.matmul %5, %6, %cst {dimension_numbers = #tpu.dot_dimension_numbers<[1], [0], [0], [1], [0, 0, 1, 1], [], []>} : vector<2x10xf32>, vector<10x128xf32>, vector<2x128xf32> -> vector<2x128xf32>
    %cst_3 = arith.constant dense<0.000000e+00> : vector<2xf32>
    %8 = vector.multi_reduction <add>, %7, %cst_3 [1] : vector<2x128xf32> to vector<2xf32>
    %9 = vector.shape_cast %8 : vector<2xf32> to vector<2x1xf32>
    %cst_4 = arith.constant 1.280000e+02 : f32
    %10 = vector.broadcast %cst_4 : f32 to vector<2x1xf32>
    %11 = arith.divf %9, %10 : vector<2x1xf32>
    %12 = arith.mulf %7, %7 : vector<2x128xf32>
    %cst_5 = arith.constant dense<0.000000e+00> : vector<2xf32>
    %13 = vector.multi_reduction <add>, %12, %cst_5 [1] : vector<2x128xf32> to vector<2xf32>
    %14 = vector.shape_cast %13 : vector<2xf32> to vector<2x1xf32>
    %cst_6 = arith.constant 1.280000e+02 : f32
    %15 = vector.broadcast %cst_6 : f32 to vector<2x1xf32>
    %16 = arith.divf %14, %15 : vector<2x1xf32>
    %17 = arith.mulf %11, %11 : vector<2x1xf32>
    %18 = arith.subf %16, %17 : vector<2x1xf32>
    %19 = vector.broadcast %11 : vector<2x1xf32> to vector<2x128xf32>
    %20 = arith.subf %7, %19 : vector<2x128xf32>
    %cst_7 = arith.constant 9.99999974E-6 : f32
    %21 = vector.broadcast %cst_7 : f32 to vector<2x1xf32>
    %22 = arith.addf %18, %21 : vector<2x1xf32>
    %23 = math.rsqrt %22 : vector<2x1xf32>
    %24 = vector.broadcast %23 : vector<2x1xf32> to vector<2x128xf32>
    %25 = arith.mulf %20, %24 : vector<2x128xf32>
    %c0_8 = arith.constant 0 : index
    %c0_9 = arith.constant 0 : index
    %26 = vector.load %arg3[%c0_8, %c0_9] : memref<1x128xf32, #tpu.memory_space<vmem>>, vector<1x128xf32>
    %27 = vector.broadcast %26 : vector<1x128xf32> to vector<2x128xf32>
    %28 = arith.mulf %25, %27 : vector<2x128xf32>
    %c0_10 = arith.constant 0 : index
    %c0_11 = arith.constant 0 : index
    %29 = vector.load %arg4[%c0_10, %c0_11] : memref<1x128xf32, #tpu.memory_space<vmem>>, vector<1x128xf32>
    %30 = vector.broadcast %29 : vector<1x128xf32> to vector<2x128xf32>
    %31 = arith.addf %28, %30 : vector<2x128xf32>
    %c0_12 = arith.constant 0 : index
    %c0_13 = arith.constant 0 : index
    %32 = vector.load %arg5[%c0_12, %c0_13] : memref<2x128xf32, #tpu.memory_space<vmem>>, vector<2x128xf32>
    tpu.vector_store %arg5[%c0_12, %c0_13], %31 {strides = array<i32>} : memref<2x128xf32, #tpu.memory_space<vmem>>, vector<2x128xf32>,
    return
  }
  func.func @transform_0(%arg0: i32) -> (i32, i32) {
    %c0_i32 = arith.constant 0 : i32
    %c0_i32_0 = arith.constant 0 : i32
    return %arg0, %c0_i32 : i32, i32
  }
  func.func @transform_1(%arg0: i32) -> (i32, i32) {
    %c0_i32 = arith.constant 0 : i32
    %c0_i32_0 = arith.constant 0 : i32
    %c0_i32_1 = arith.constant 0 : i32
    return %c0_i32, %c0_i32_0 : i32, i32
  }
  func.func @transform_2(%arg0: i32) -> (i32, i32) {
    %c0_i32 = arith.constant 0 : i32
    %c0_i32_0 = arith.constant 0 : i32
    %c0_i32_1 = arith.constant 0 : i32
    return %c0_i32, %c0_i32_0 : i32, i32
  }
  func.func @transform_3(%arg0: i32) -> (i32, i32) {
    %c0_i32 = arith.constant 0 : i32
    %c0_i32_0 = arith.constant 0 : i32
    %c0_i32_1 = arith.constant 0 : i32
    return %c0_i32, %c0_i32_0 : i32, i32
  }
  func.func @transform_4(%arg0: i32) -> (i32, i32) {
    %c0_i32 = arith.constant 0 : i32
    %c0_i32_0 = arith.constant 0 : i32
    return %arg0, %c0_i32 : i32, i32
  }
}

</mosaic_0001>

<bundles_post_ra>
// kernel: joint_embedding_forward.4
= control target key start
LH: loop header
LB: loop body
LE: loop exit
PB: predicated region body
PF: predicated region fallthrough
CT: control target
= control target key end

     0   :  { %vm270_vm0 = vcmask 1043456   ;;  %vm271_vm1 = vcmask 1044480   ;;  %v4840_v0 = vmov 0.0   ;;  %v3516_v2 = vmov 65535   ;;  %s4836_s1 = inlined_call_operand.vmem [shape: bf16[9,32], index: 1, kind: input, shape index: {}]   ;;  %s4837_s0 = inlined_call_operand.vmem [shape: bf16[4,392,9], index: 0, kind: input, shape index: {}]   ;;  %s4838_s2 = inlined_call_operand.vmem [shape: f32[1,32], index: 2, kind: input, shape index: {}]   ;;  %s4839_s3 = inlined_call_operand.vmem [shape: bf16[392,32], index: 3, kind: output, shape index: {}]  }
   0x1   :  { %3003 = vmatprep.subr.bf16.mxu0 %v4840_v0  ;;  %3105 = vmatprep.subr.bf16.mxu1 %v4840_v0  ;;  %v3414_v1 = vld [vmem:[%s4836_s1] sm:$0x1f]   ;;  %v272_v3 = vsel %vm270_vm0, 4294967295, %v3516_v2  ;;  %vm3517_vm2 = vmmov 0   ;;  %vm194_vm3 = vcmask 72704   ;;  %v3417_v8 = vld [vmem:[%s4837_s0 + $0x8] sm:$0xff]  }
   0x2   :  { %v273_v4 = vsel %vm271_vm1, %v272_v3, 0  ;;  %3005 = vmatprep.mubr.msk.bf16.mxu0 %vm3517_vm2, %v4840_v0  ;;  %3107 = vmatprep.mubr.msk.bf16.mxu1 %vm3517_vm2, %v4840_v0  ;;  %v3415_v5 = vld [vmem:[%s4837_s0] sm:$0xff]   ;;  %v3418_v9 = vld [vmem:[%s4837_s0 + $0xcc] sm:$0xff]   ;;  %v3420_v11 = vld [vmem:[%s4837_s0 + $0xd4] sm:$0xff]   ;;  %vm2398_vm4 = vcmask 257024  }
   0x3   :  { %v275_v6 = vand.u32 %v3414_v1, %v273_v4  ;;  %v3416_v7 = vld [vmem:[%s4837_s0 + $0xc4] sm:$0xff]   ;;  %v3419_v10 = vld [vmem:[%s4837_s0 + $0x10] sm:$0xff]   ;;  %v3421_v12 = vld [vmem:[%s4837_s0 + $0x18] sm:$0xff]  }
   0x4   :  { %v3422_v13 = vld [vmem:[%s4837_s0 + $0xdc] sm:$0xff]   ;;  %v3424_v15 = vld [vmem:[%s4837_s0 + $0xe4] sm:$0xff]   ;;  %v3426_v17 = vld [vmem:[%s4837_s0 + $0xec] sm:$0xff]  }
   0x5   :  { %3004 = vmatpush3.bf16.msra.mxu0 %v275_v6  ;;  %3106 = vmatpush3.bf16.msra.mxu1 %v275_v6  ;;  %v3423_v14 = vld [vmem:[%s4837_s0 + $0x20] sm:$0xff]   ;;  %v3425_v16 = vld [vmem:[%s4837_s0 + $0x28] sm:$0xff]   ;;  %v3427_v18 = vld [vmem:[%s4837_s0 + $0x30] sm:$0xff]  }
   0x6   :  { %3207 = vmatprep.subr.bf16.mxu0 %v4840_v0  ;;  %3309 = vmatprep.subr.bf16.mxu1 %v4840_v0  ;;  %v3428_v19 = vld [vmem:[%s4837_s0 + $0xf4] sm:$0xff]   ;;  %v3430_v21 = vld [vmem:[%s4837_s0 + $0xfc] sm:$0xff]   ;;  %v3432_v23 = vld [vmem:[%s4837_s0 + $0x104] sm:$0xff]  }
   0x7   :  { %v3429_v20 = vld [vmem:[%s4837_s0 + $0x38] sm:$0xff]   ;;  %v3431_v22 = vld [vmem:[%s4837_s0 + $0x40] sm:$0xff]   ;;  %v3433_v24 = vld [vmem:[%s4837_s0 + $0x48] sm:$0xff]  }
   0x8   :  { %3006 = vmatmul.mubr.msk.bf16.vlgmr.msra.gmra.mrb[0].mxu0 %vm194_vm3, %v3415_v5  ;;  %3108 = vmatmul.mubr.msk.bf16.vlgmr.msra.gmra.mrb[0].mxu1 %vm194_vm3, %v3416_v7  ;;  %v3434_v25 = vld [vmem:[%s4837_s0 + $0x10c] sm:$0xff]   ;;  %v3436_v27 = vld [vmem:[%s4837_s0 + $0x114] sm:$0xff]   ;;  %v3438_v29 = vld [vmem:[%s4837_s0 + $0x11c] sm:$0xff]  }
   0x9   :  { %3208 = vmatpush3.bf16.msra.mxu0 %v275_v6  ;;  %3310 = vmatpush3.bf16.msra.mxu1 %v275_v6  ;;  %v3435_v26 = vld [vmem:[%s4837_s0 + $0x50] sm:$0xff]   ;;  %v3437_v28 = vld [vmem:[%s4837_s0 + $0x58] sm:$0xff]   ;;  %v3439_v30 = vld [vmem:[%s4837_s0 + $0x60] sm:$0xff]  }
   0xa   :  { %3009 = vmatprep.mubr.msk.bf16.mxu0 %vm3517_vm2, %v4840_v0  ;;  %3111 = vmatprep.mubr.msk.bf16.mxu1 %vm3517_vm2, %v4840_v0  ;;  %v3440_v31 = vld [vmem:[%s4837_s0 + $0x124] sm:$0xff]   ;;  %v3442_v33 = vld [vmem:[%s4837_s0 + $0x12c] sm:$0xff]   ;;  %v3444_v35 = vld [vmem:[%s4837_s0 + $0x134] sm:$0xff]  }
   0xb   :  { %v3441_v32 = vld [vmem:[%s4837_s0 + $0x68] sm:$0xff]   ;;  %v3443_v34 = vld [vmem:[%s4837_s0 + $0x70] sm:$0xff]   ;;  %v3445_v36 = vld [vmem:[%s4837_s0 + $0x78] sm:$0xff]  }
   0xc   :  { %v3446_v37 = vld [vmem:[%s4837_s0 + $0x13c] sm:$0xff]   ;;  %v3448_v39 = vld [vmem:[%s4837_s0 + $0x144] sm:$0xff]   ;;  %v3450_v41 = vld [vmem:[%s4837_s0 + $0x14c] sm:$0xff]  }
   0xd   :  { %v3447_v38 = vld [vmem:[%s4837_s0 + $0x80] sm:$0xff]   ;;  %v3449_v40 = vld [vmem:[%s4837_s0 + $0x88] sm:$0xff]   ;;  %v3451_v42 = vld [vmem:[%s4837_s0 + $0x90] sm:$0xff]  }
   0xe   :  { %v3452_v43 = vld [vmem:[%s4837_s0 + $0x154] sm:$0xff]   ;;  %v3454_v45 = vld [vmem:[%s4837_s0 + $0x15c] sm:$0xff]   ;;  %v3456_v47 = vld [vmem:[%s4837_s0 + $0x164] sm:$0xff]  }
   0xf   :  { %v3453_v44 = vld [vmem:[%s4837_s0 + $0x98] sm:$0xff]   ;;  %v3455_v46 = vld [vmem:[%s4837_s0 + $0xa0] sm:$0xff]   ;;  %v3457_v48 = vld [vmem:[%s4837_s0 + $0xa8] sm:$0xff]  }
  0x10   :  { %3010 = vmatmul.mubr.msk.bf16.gmra.mrb[4].mxu0 %vm194_vm3, %v3417_v8  ;;  %3112 = vmatmul.mubr.msk.bf16.gmra.mrb[4].mxu1 %vm194_vm3, %v3418_v9  ;;  %v3458_v49 = vld [vmem:[%s4837_s0 + $0x16c] sm:$0xff]   ;;  %v3460_v51 = vld [vmem:[%s4837_s0 + $0x174] sm:$0xff]   ;;  %v3462_v53 = vld [vmem:[%s4837_s0 + $0x17c] sm:$0xff]  }
  0x11   :  { %3013 = vmatprep.mubr.msk.bf16.mxu0 %vm3517_vm2, %v4840_v0  ;;  %3115 = vmatprep.mubr.msk.bf16.mxu1 %vm3517_vm2, %v4840_v0  ;;  %v3459_v50 = vld [vmem:[%s4837_s0 + $0xb0] sm:$0xff]   ;;  %v3461_v52 = vld [vmem:[%s4837_s0 + $0xb8] sm:$0xff]   ;;  %v3463_v54 = vld [vmem:[%s4837_s0 + $0xc0] ss:$0 sps:$4 sm:$0xff]  }
  0x12   :  { %v3464_v55 = vld [vmem:[%s4837_s0 + $0x184] ss:$0 sps:$4 sm:$0xff]   ;;  %v3465_v56 = vld [vmem:[%s4837_s0 + $0x188] sm:$0xff]   ;;  %v3467_v58 = vld [vmem:[%s4837_s0 + $0x190] sm:$0xff]  }
  0x13   :  { %v3466_v57 = vld [vmem:[%s4837_s0 + $0x24c] sm:$0xff]   ;;  %v3468_v59 = vld [vmem:[%s4837_s0 + $0x254] sm:$0xff]   ;;  %v3470_v3 = vld [vmem:[%s4837_s0 + $0x25c] sm:$0xff]  }
  0x14   :  { %v3469_v2 = vld [vmem:[%s4837_s0 + $0x198] sm:$0xff]  }
  0x18   :  { %3014 = vmatmul.mubr.msk.bf16.gmra.mrb[8].mxu0 %vm194_vm3, %v3419_v10  ;;  %3116 = vmatmul.mubr.msk.bf16.gmra.mrb[8].mxu1 %vm194_vm3, %v3420_v11 }
  0x19   :  { %3017 = vmatprep.mubr.msk.bf16.mxu0 %vm3517_vm2, %v4840_v0  ;;  %3119 = vmatprep.mubr.msk.bf16.mxu1 %vm3517_vm2, %v4840_v0 }
  0x20   :  { %3018 = vmatmul.mubr.msk.bf16.gmra.mrb[12].mxu0 %vm194_vm3, %v3421_v12  ;;  %3120 = vmatmul.mubr.msk.bf16.gmra.mrb[12].mxu1 %vm194_vm3, %v3422_v13 }
  0x21   :  { %3021 = vmatprep.mubr.msk.bf16.mxu0 %vm3517_vm2, %v4840_v0  ;;  %3123 = vmatprep.mubr.msk.bf16.mxu1 %vm3517_vm2, %v4840_v0 }
  0x28   :  { %3022 = vmatmul.mubr.msk.bf16.gmra.mrb[16].mxu0 %vm194_vm3, %v3423_v14  ;;  %3124 = vmatmul.mubr.msk.bf16.gmra.mrb[16].mxu1 %vm194_vm3, %v3424_v15  ;;  %v3471_v14 = vld [vmem:[%s4837_s0 + $0x1a0] sm:$0xff]  }
  0x29   :  { %3025 = vmatprep.mubr.msk.bf16.mxu0 %vm3517_vm2, %v4840_v0  ;;  %3127 = vmatprep.mubr.msk.bf16.mxu1 %vm3517_vm2, %v4840_v0  ;;  %v3472_v15 = vld [vmem:[%s4837_s0 + $0x264] sm:$0xff]  }
  0x30   :  { %3026 = vmatmul.mubr.msk.bf16.gmra.mrb[20].mxu0 %vm194_vm3, %v3425_v16  ;;  %3128 = vmatmul.mubr.msk.bf16.gmra.mrb[20].mxu1 %vm194_vm3, %v3426_v17 }
  0x31   :  { %3029 = vmatprep.mubr.msk.bf16.mxu0 %vm3517_vm2, %v4840_v0  ;;  %3131 = vmatprep.mubr.msk.bf16.mxu1 %vm3517_vm2, %v4840_v0 }
  0x38   :  { %3030 = vmatmul.mubr.msk.bf16.gmra.mrb[24].mxu0 %vm194_vm3, %v3427_v18  ;;  %3132 = vmatmul.mubr.msk.bf16.gmra.mrb[24].mxu1 %vm194_vm3, %v3428_v19 }
  0x39   :  { %3033 = vmatprep.mubr.msk.bf16.mxu0 %vm3517_vm2, %v4840_v0  ;;  %3135 = vmatprep.mubr.msk.bf16.mxu1 %vm3517_vm2, %v4840_v0 }
  0x40   :  { %3034 = vmatmul.mubr.msk.bf16.gmra.mrb[28].mxu0 %vm194_vm3, %v3429_v20  ;;  %3136 = vmatmul.mubr.msk.bf16.gmra.mrb[28].mxu1 %vm194_vm3, %v3430_v21 }
  0x41   :  { %3037 = vmatprep.mubr.msk.bf16.mxu0 %vm3517_vm2, %v4840_v0  ;;  %3139 = vmatprep.mubr.msk.bf16.mxu1 %vm3517_vm2, %v4840_v0 }
  0x48   :  { %3038 = vmatmul.mubr.msk.bf16.gmra.mrb[32].mxu0 %vm194_vm3, %v3431_v22  ;;  %3140 = vmatmul.mubr.msk.bf16.gmra.mrb[32].mxu1 %vm194_vm3, %v3432_v23 }
  0x49   :  { %3041 = vmatprep.mubr.msk.bf16.mxu0 %vm3517_vm2, %v4840_v0  ;;  %3143 = vmatprep.mubr.msk.bf16.mxu1 %vm3517_vm2, %v4840_v0 }
  0x50   :  { %3042 = vmatmul.mubr.msk.bf16.gmra.mrb[36].mxu0 %vm194_vm3, %v3433_v24  ;;  %3144 = vmatmul.mubr.msk.bf16.gmra.mrb[36].mxu1 %vm194_vm3, %v3434_v25 }
  0x51   :  { %3045 = vmatprep.mubr.msk.bf16.mxu0 %vm3517_vm2, %v4840_v0  ;;  %3147 = vmatprep.mubr.msk.bf16.mxu1 %vm3517_vm2, %v4840_v0 }
  0x58   :  { %3046 = vmatmul.mubr.msk.bf16.gmra.mrb[40].mxu0 %vm194_vm3, %v3435_v26  ;;  %3148 = vmatmul.mubr.msk.bf16.gmra.mrb[40].mxu1 %vm194_vm3, %v3436_v27  ;;  %v3473_v26 = vld [vmem:[%s4837_s0 + $0x1a8] sm:$0xff]  }
  0x59   :  { %3049 = vmatprep.mubr.msk.bf16.mxu0 %vm3517_vm2, %v4840_v0  ;;  %3151 = vmatprep.mubr.msk.bf16.mxu1 %vm3517_vm2, %v4840_v0  ;;  %v3474_v27 = vld [vmem:[%s4837_s0 + $0x26c] sm:$0xff]  }
  0x60   :  { %3050 = vmatmul.mubr.msk.bf16.gmra.mrb[44].mxu0 %vm194_vm3, %v3437_v28  ;;  %3152 = vmatmul.mubr.msk.bf16.gmra.mrb[44].mxu1 %vm194_vm3, %v3438_v29 }
  0x61   :  { %3053 = vmatprep.mubr.msk.bf16.mxu0 %vm3517_vm2, %v4840_v0  ;;  %3155 = vmatprep.mubr.msk.bf16.mxu1 %vm3517_vm2, %v4840_v0 }
  0x68   :  { %3054 = vmatmul.mubr.msk.bf16.gmra.mrb[48].mxu0 %vm194_vm3, %v3439_v30  ;;  %3156 = vmatmul.mubr.msk.bf16.gmra.mrb[48].mxu1 %vm194_vm3, %v3440_v31 }
  0x69   :  { %3057 = vmatprep.mubr.msk.bf16.mxu0 %vm3517_vm2, %v4840_v0  ;;  %3159 = vmatprep.mubr.msk.bf16.mxu1 %vm3517_vm2, %v4840_v0 }
  0x70   :  { %3058 = vmatmul.mubr.msk.bf16.gmra.mrb[52].mxu0 %vm194_vm3, %v3441_v32  ;;  %3160 = vmatmul.mubr.msk.bf16.gmra.mrb[52].mxu1 %vm194_vm3, %v3442_v33 }
  0x71   :  { %3061 = vmatprep.mubr.msk.bf16.mxu0 %vm3517_vm2, %v4840_v0  ;;  %3163 = vmatprep.mubr.msk.bf16.mxu1 %vm3517_vm2, %v4840_v0 }
  0x78   :  { %3062 = vmatmul.mubr.msk.bf16.gmra.mrb[56].mxu0 %vm194_vm3, %v3443_v34  ;;  %3164 = vmatmul.mubr.msk.bf16.gmra.mrb[56].mxu1 %vm194_vm3, %v3444_v35 }
  0x79   :  { %3065 = vmatprep.mubr.msk.bf16.mxu0 %vm3517_vm2, %v4840_v0  ;;  %3167 = vmatprep.mubr.msk.bf16.mxu1 %vm3517_vm2, %v4840_v0 }
  0x80   :  { %3066 = vmatmul.mubr.msk.bf16.gmra.mrb[60].mxu0 %vm194_vm3, %v3445_v36  ;;  %3168 = vmatmul.mubr.msk.bf16.gmra.mrb[60].mxu1 %vm194_vm3, %v3446_v37 }
  0x81   :  { %3069 = vmatprep.mubr.msk.bf16.mxu0 %vm3517_vm2, %v4840_v0  ;;  %3171 = vmatprep.mubr.msk.bf16.mxu1 %vm3517_vm2, %v4840_v0 }
  0x88   :  { %3070 = vmatmul.mubr.msk.bf16.gmra.mrb[64].mxu0 %vm194_vm3, %v3447_v38  ;;  %3172 = vmatmul.mubr.msk.bf16.gmra.mrb[64].mxu1 %vm194_vm3, %v3448_v39  ;;  %v3475_v38 = vld [vmem:[%s4837_s0 + $0x1b0] sm:$0xff]  }
  0x89   :  { %3073 = vmatprep.mubr.msk.bf16.mxu0 %vm3517_vm2, %v4840_v0  ;;  %3175 = vmatprep.mubr.msk.bf16.mxu1 %vm3517_vm2, %v4840_v0  ;;  %v3476_v39 = vld [vmem:[%s4837_s0 + $0x274] sm:$0xff]  }
  0x90   :  { %3074 = vmatmul.mubr.msk.bf16.gmra.mrb[68].mxu0 %vm194_vm3, %v3449_v40  ;;  %3176 = vmatmul.mubr.msk.bf16.gmra.mrb[68].mxu1 %vm194_vm3, %v3450_v41 }
  0x91   :  { %3077 = vmatprep.mubr.msk.bf16.mxu0 %vm3517_vm2, %v4840_v0  ;;  %3179 = vmatprep.mubr.msk.bf16.mxu1 %vm3517_vm2, %v4840_v0 }
  0x98   :  { %3078 = vmatmul.mubr.msk.bf16.gmra.mrb[72].mxu0 %vm194_vm3, %v3451_v42  ;;  %3180 = vmatmul.mubr.msk.bf16.gmra.mrb[72].mxu1 %vm194_vm3, %v3452_v43 }
  0x99   :  { %3081 = vmatprep.mubr.msk.bf16.mxu0 %vm3517_vm2, %v4840_v0  ;;  %3183 = vmatprep.mubr.msk.bf16.mxu1 %vm3517_vm2, %v4840_v0 }
  0xa0   :  { %3082 = vmatmul.mubr.msk.bf16.gmra.mrb[76].mxu0 %vm194_vm3, %v3453_v44  ;;  %3184 = vmatmul.mubr.msk.bf16.gmra.mrb[76].mxu1 %vm194_vm3, %v3454_v45 }
  0xa1   :  { %3085 = vmatprep.mubr.msk.bf16.mxu0 %vm3517_vm2, %v4840_v0  ;;  %3187 = vmatprep.mubr.msk.bf16.mxu1 %vm3517_vm2, %v4840_v0 }
  0xa8   :  { %3086 = vmatmul.mubr.msk.bf16.gmra.mrb[80].mxu0 %vm194_vm3, %v3455_v46  ;;  %3188 = vmatmul.mubr.msk.bf16.gmra.mrb[80].mxu1 %vm194_vm3, %v3456_v47 }
  0xa9   :  { %3089 = vmatprep.mubr.msk.bf16.mxu0 %vm3517_vm2, %v4840_v0  ;;  %3191 = vmatprep.mubr.msk.bf16.mxu1 %vm3517_vm2, %v4840_v0 }
  0xb0   :  { %3090 = vmatmul.mubr.msk.bf16.gmra.mrb[84].mxu0 %vm194_vm3, %v3457_v48  ;;  %3192 = vmatmul.mubr.msk.bf16.gmra.mrb[84].mxu1 %vm194_vm3, %v3458_v49 }
  0xb1   :  { %3093 = vmatprep.mubr.msk.bf16.mxu0 %vm3517_vm2, %v4840_v0  ;;  %3195 = vmatprep.mubr.msk.bf16.mxu1 %vm3517_vm2, %v4840_v0 }
  0xb8   :  { %3094 = vmatmul.mubr.msk.bf16.gmra.mrb[88].mxu0 %vm194_vm3, %v3459_v50  ;;  %3196 = vmatmul.mubr.msk.bf16.gmra.mrb[88].mxu1 %vm194_vm3, %v3460_v51  ;;  %v3477_v50 = vld [vmem:[%s4837_s0 + $0x1b8] sm:$0xff]  }
  0xb9   :  { %3097 = vmatprep.mubr.msk.bf16.mxu0 %vm3517_vm2, %v4840_v0  ;;  %3199 = vmatprep.mubr.msk.bf16.mxu1 %vm3517_vm2, %v4840_v0  ;;  %v3478_v51 = vld [vmem:[%s4837_s0 + $0x27c] sm:$0xff]  }
  0xc0   :  { %3098 = vmatmul.mubr.msk.bf16.gmra.mrb[92].mxu0 %vm194_vm3, %v3461_v52  ;;  %3200 = vmatmul.mubr.msk.bf16.gmra.mrb[92].mxu1 %vm194_vm3, %v3462_v53 }
  0xc1   :  { %3101 = vmatprep.mubr.msk.bf16.mxu0 %vm3517_vm2, %v4840_v0  ;;  %3203 = vmatprep.mubr.msk.bf16.mxu1 %vm3517_vm2, %v4840_v0 }
  0xc8   :  { %3102 = vmatmul.mubr.msk.bf16.gmra.mrb[96].mxu0 %vm194_vm3, %v3463_v54  ;;  %3204 = vmatmul.mubr.msk.bf16.gmra.mrb[96].mxu1 %vm194_vm3, %v3464_v55 }
  0xc9   :  { %3209 = vmatprep.mubr.msk.bf16.mxu0 %vm3517_vm2, %v4840_v0  ;;  %3311 = vmatprep.mubr.msk.bf16.mxu1 %vm3517_vm2, %v4840_v0 }
  0xd0   :  { %3210 = vmatmul.mubr.msk.bf16.vlgmr.msra.gmra.mrb[100].mxu0 %vm194_vm3, %v3465_v56  ;;  %3312 = vmatmul.mubr.msk.bf16.vlgmr.msra.gmra.mrb[100].mxu1 %vm194_vm3, %v3466_v57 }
  0xd1   :  { %3213 = vmatprep.mubr.msk.bf16.mxu0 %vm3517_vm2, %v4840_v0  ;;  %3315 = vmatprep.mubr.msk.bf16.mxu1 %vm3517_vm2, %v4840_v0 }
  0xd8   :  { %3214 = vmatmul.mubr.msk.bf16.gmra.mrb[104].mxu0 %vm194_vm3, %v3467_v58  ;;  %3316 = vmatmul.mubr.msk.bf16.gmra.mrb[104].mxu1 %vm194_vm3, %v3468_v59 }
  0xd9   :  { %3217 = vmatprep.mubr.msk.bf16.mxu0 %vm3517_vm2, %v4840_v0  ;;  %3319 = vmatprep.mubr.msk.bf16.mxu1 %vm3517_vm2, %v4840_v0 }
  0xdb   :  { %v3873_v60 = vpop.f32.mrb[0].mxu0  ;;  %v3875_v61 = vpop.f32.mrb[0].mxu1 }
  0xdc   :  { %v3007_v63 = vpop.f32.mrb[1].mxu0  ;;  %v3109_v1 = vpop.f32.mrb[1].mxu1 }
  0xdd   :  { %v3885_v4 = vpop.f32.mrb[2].mxu0  ;;  %v3887_v5 = vpop.f32.mrb[2].mxu1 }
  0xde   :  { %v3008_v7 = vpop.f32.mrb[3].mxu0  ;;  %v3110_v8 = vpop.f32.mrb[3].mxu1 }
  0xe0   :  { %3218 = vmatmul.mubr.msk.bf16.gmra.mrb[108].mxu0 %vm194_vm3, %v3469_v2  ;;  %3320 = vmatmul.mubr.msk.bf16.gmra.mrb[108].mxu1 %vm194_vm3, %v3470_v3  ;;  %v3479_v2 = vld [vmem:[%s4837_s0 + $0x1c0] sm:$0xff]  }
  0xe1   :  { %3221 = vmatprep.mubr.msk.bf16.mxu0 %vm3517_vm2, %v4840_v0  ;;  %3323 = vmatprep.mubr.msk.bf16.mxu1 %vm3517_vm2, %v4840_v0  ;;  %v3480_v3 = vld [vmem:[%s4837_s0 + $0x284] sm:$0xff]  }
  0xe3   :  { %v3897_v9 = vpop.f32.mrb[4].mxu0  ;;  %v3899_v10 = vpop.f32.mrb[4].mxu1 }
  0xe4   :  { %v3011_v12 = vpop.f32.mrb[5].mxu0  ;;  %v3113_v13 = vpop.f32.mrb[5].mxu1 }
  0xe5   :  { %v3909_v16 = vpop.f32.mrb[6].mxu0  ;;  %v3911_v17 = vpop.f32.mrb[6].mxu1 }
  0xe6   :  { %v3012_v19 = vpop.f32.mrb[7].mxu0  ;;  %v3114_v20 = vpop.f32.mrb[7].mxu1 }
  0xe8   :  { %3222 = vmatmul.mubr.msk.bf16.gmra.mrb[112].mxu0 %vm194_vm3, %v3471_v14  ;;  %3324 = vmatmul.mubr.msk.bf16.gmra.mrb[112].mxu1 %vm194_vm3, %v3472_v15 }
  0xe9   :  { %3225 = vmatprep.mubr.msk.bf16.mxu0 %vm3517_vm2, %v4840_v0  ;;  %3327 = vmatprep.mubr.msk.bf16.mxu1 %vm3517_vm2, %v4840_v0 }
  0xeb   :  { %v3921_v21 = vpop.f32.mrb[8].mxu0  ;;  %v3923_v22 = vpop.f32.mrb[8].mxu1 }
  0xec   :  { %v3015_v24 = vpop.f32.mrb[9].mxu0  ;;  %v3117_v25 = vpop.f32.mrb[9].mxu1 }
  0xed   :  { %v3933_v28 = vpop.f32.mrb[10].mxu0  ;;  %v3935_v29 = vpop.f32.mrb[10].mxu1 }
  0xee   :  { %v3016_v31 = vpop.f32.mrb[11].mxu0  ;;  %v3118_v32 = vpop.f32.mrb[11].mxu1 }
  0xf0   :  { %3226 = vmatmul.mubr.msk.bf16.gmra.mrb[116].mxu0 %vm194_vm3, %v3473_v26  ;;  %3328 = vmatmul.mubr.msk.bf16.gmra.mrb[116].mxu1 %vm194_vm3, %v3474_v27  ;;  %v3481_v26 = vld [vmem:[%s4837_s0 + $0x1c8] sm:$0xff]  }
  0xf1   :  { %3229 = vmatprep.mubr.msk.bf16.mxu0 %vm3517_vm2, %v4840_v0  ;;  %3331 = vmatprep.mubr.msk.bf16.mxu1 %vm3517_vm2, %v4840_v0  ;;  %v3482_v27 = vld [vmem:[%s4837_s0 + $0x28c] sm:$0xff]  }
  0xf3   :  { %v3945_v33 = vpop.f32.mrb[12].mxu0  ;;  %v3947_v34 = vpop.f32.mrb[12].mxu1 }
  0xf4   :  { %v3019_v36 = vpop.f32.mrb[13].mxu0  ;;  %v3121_v37 = vpop.f32.mrb[13].mxu1 }
  0xf5   :  { %v3957_v40 = vpop.f32.mrb[14].mxu0  ;;  %v3959_v41 = vpop.f32.mrb[14].mxu1 }
  0xf6   :  { %v3020_v43 = vpop.f32.mrb[15].mxu0  ;;  %v3122_v44 = vpop.f32.mrb[15].mxu1 }
  0xf8   :  { %3230 = vmatmul.mubr.msk.bf16.gmra.mrb[120].mxu0 %vm194_vm3, %v3475_v38  ;;  %3332 = vmatmul.mubr.msk.bf16.gmra.mrb[120].mxu1 %vm194_vm3, %v3476_v39 }
  0xf9   :  { %3233 = vmatprep.mubr.msk.bf16.mxu0 %vm3517_vm2, %v4840_v0  ;;  %3335 = vmatprep.mubr.msk.bf16.mxu1 %vm3517_vm2, %v4840_v0 }
  0xfb   :  { %v3969_v45 = vpop.f32.mrb[16].mxu0  ;;  %v3971_v46 = vpop.f32.mrb[16].mxu1 }
  0xfc   :  { %v3023_v48 = vpop.f32.mrb[17].mxu0  ;;  %v3125_v49 = vpop.f32.mrb[17].mxu1 }
  0xfd   :  { %v3981_v52 = vpop.f32.mrb[18].mxu0  ;;  %v3983_v53 = vpop.f32.mrb[18].mxu1 }
  0xfe   :  { %v3024_v55 = vpop.f32.mrb[19].mxu0  ;;  %v3126_v56 = vpop.f32.mrb[19].mxu1 }
 0x100   :  { %3234 = vmatmul.mubr.msk.bf16.gmra.mrb[124].mxu0 %vm194_vm3, %v3477_v50  ;;  %3336 = vmatmul.mubr.msk.bf16.gmra.mrb[124].mxu1 %vm194_vm3, %v3478_v51  ;;  %v3483_v50 = vld [vmem:[%s4837_s0 + $0x1d0] sm:$0xff]  }
 0x101   :  { %3237 = vmatprep.mubr.msk.bf16.mxu0 %vm3517_vm2, %v4840_v0  ;;  %3339 = vmatprep.mubr.msk.bf16.mxu1 %vm3517_vm2, %v4840_v0  ;;  %v3484_v51 = vld [vmem:[%s4837_s0 + $0x294] sm:$0xff]  }
 0x103   :  { %v3993_v57 = vpop.f32.mrb[20].mxu0  ;;  %v3995_v58 = vpop.f32.mrb[20].mxu1 }
 0x104   :  { %v3027_v63 = vpop.f32.mrb[21].mxu0  ;;  %v3129_v1 = vpop.f32.mrb[21].mxu1 }
 0x105   :  { %v4005_v7 = vpop.f32.mrb[22].mxu0  ;;  %v4007_v8 = vpop.f32.mrb[22].mxu1 }
 0x106   :  { %v3028_v13 = vpop.f32.mrb[23].mxu0  ;;  %v3130_v14 = vpop.f32.mrb[23].mxu1 }
 0x108   :  { %3238 = vmatmul.mubr.msk.bf16.gmra.mrb[128].mxu0 %vm194_vm3, %v3479_v2  ;;  %3340 = vmatmul.mubr.msk.bf16.gmra.mrb[128].mxu1 %vm194_vm3, %v3480_v3 }
 0x109   :  { %3241 = vmatprep.mubr.msk.bf16.mxu0 %vm3517_vm2, %v4840_v0  ;;  %3343 = vmatprep.mubr.msk.bf16.mxu1 %vm3517_vm2, %v4840_v0 }
 0x10b   :  { %v4017_v15 = vpop.f32.mrb[24].mxu0  ;;  %v4019_v19 = vpop.f32.mrb[24].mxu1 }
 0x10c   :  { %v3031_v24 = vpop.f32.mrb[25].mxu0  ;;  %v3133_v25 = vpop.f32.mrb[25].mxu1 }
 0x10d   :  { %v4029_v31 = vpop.f32.mrb[26].mxu0  ;;  %v4031_v32 = vpop.f32.mrb[26].mxu1 }
 0x10e   :  { %v3032_v37 = vpop.f32.mrb[27].mxu0  ;;  %v3134_v38 = vpop.f32.mrb[27].mxu1 }
 0x110   :  { %3242 = vmatmul.mubr.msk.bf16.gmra.mrb[132].mxu0 %vm194_vm3, %v3481_v26  ;;  %3344 = vmatmul.mubr.msk.bf16.gmra.mrb[132].mxu1 %vm194_vm3, %v3482_v27  ;;  %v3485_v26 = vld [vmem:[%s4837_s0 + $0x1d8] sm:$0xff]  }
 0x111   :  { %3245 = vmatprep.mubr.msk.bf16.mxu0 %vm3517_vm2, %v4840_v0  ;;  %3347 = vmatprep.mubr.msk.bf16.mxu1 %vm3517_vm2, %v4840_v0  ;;  %v3486_v27 = vld [vmem:[%s4837_s0 + $0x29c] sm:$0xff]  }
 0x113   :  { %v4041_v39 = vpop.f32.mrb[28].mxu0  ;;  %v4043_v43 = vpop.f32.mrb[28].mxu1 }
 0x114   :  { %v3035_v48 = vpop.f32.mrb[29].mxu0  ;;  %v3137_v49 = vpop.f32.mrb[29].mxu1 }
 0x115   :  { %v4053_v55 = vpop.f32.mrb[30].mxu0  ;;  %v4055_v56 = vpop.f32.mrb[30].mxu1 }
 0x116   :  { %v3036_v1 = vpop.f32.mrb[31].mxu0  ;;  %v3138_v2 = vpop.f32.mrb[31].mxu1 }
 0x118   :  { %3246 = vmatmul.mubr.msk.bf16.gmra.mrb[136].mxu0 %vm194_vm3, %v3483_v50  ;;  %3348 = vmatmul.mubr.msk.bf16.gmra.mrb[136].mxu1 %vm194_vm3, %v3484_v51 }
 0x119   :  { %3249 = vmatprep.mubr.msk.bf16.mxu0 %vm3517_vm2, %v4840_v0  ;;  %3351 = vmatprep.mubr.msk.bf16.mxu1 %vm3517_vm2, %v4840_v0 }
 0x11b   :  { %v4065_v3 = vpop.f32.mrb[32].mxu0  ;;  %v4067_v13 = vpop.f32.mrb[32].mxu1 }
 0x11c   :  { %v3039_v24 = vpop.f32.mrb[33].mxu0  ;;  %v3141_v25 = vpop.f32.mrb[33].mxu1 }
 0x11d   :  { %v4077_v37 = vpop.f32.mrb[34].mxu0  ;;  %v4079_v38 = vpop.f32.mrb[34].mxu1 }
 0x11e   :  { %v3040_v49 = vpop.f32.mrb[35].mxu0  ;;  %v3142_v50 = vpop.f32.mrb[35].mxu1 }
 0x120   :  { %3250 = vmatmul.mubr.msk.bf16.gmra.mrb[140].mxu0 %vm194_vm3, %v3485_v26  ;;  %3352 = vmatmul.mubr.msk.bf16.gmra.mrb[140].mxu1 %vm194_vm3, %v3486_v27  ;;  %v3487_v26 = vld [vmem:[%s4837_s0 + $0x1e0] sm:$0xff]  }
 0x121   :  { %3253 = vmatprep.mubr.msk.bf16.mxu0 %vm3517_vm2, %v4840_v0  ;;  %3355 = vmatprep.mubr.msk.bf16.mxu1 %vm3517_vm2, %v4840_v0  ;;  %v3488_v27 = vld [vmem:[%s4837_s0 + $0x2a4] sm:$0xff]  }
 0x123   :  { %v4089_v51 = vpop.f32.mrb[36].mxu0  ;;  %v4091_v1 = vpop.f32.mrb[36].mxu1 }
 0x124   :  { %v3043_v24 = vpop.f32.mrb[37].mxu0  ;;  %v3145_v25 = vpop.f32.mrb[37].mxu1 }
 0x125   :  { %v4101_v49 = vpop.f32.mrb[38].mxu0  ;;  %v4103_v50 = vpop.f32.mrb[38].mxu1 }
 0x126   :  { %v3044_v14 = vpop.f32.mrb[39].mxu0  ;;  %v3146_v63 = vpop.f32.mrb[39].mxu1 }
 0x127   :  { %v3489_v63 = vld [vmem:[%s4837_s0 + $0x1e8] sm:$0xff]  }
 0x128   :  { %3254 = vmatmul.mubr.msk.bf16.gmra.mrb[144].mxu0 %vm194_vm3, %v3487_v26  ;;  %3356 = vmatmul.mubr.msk.bf16.gmra.mrb[144].mxu1 %vm194_vm3, %v3488_v27  ;;  %v3490_v26 = vld [vmem:[%s4837_s0 + $0x2ac] sm:$0xff]  }
 0x129   :  { %3257 = vmatprep.mubr.msk.bf16.mxu0 %vm3517_vm2, %v4840_v0  ;;  %3359 = vmatprep.mubr.msk.bf16.mxu1 %vm3517_vm2, %v4840_v0 }
 0x12b   :  { %v4113_v24 = vpop.f32.mrb[40].mxu0  ;;  %v4115_v25 = vpop.f32.mrb[40].mxu1 }
 0x12c   :  { %v3047_v48 = vpop.f32.mrb[41].mxu0  ;;  %v3149_v14 = vpop.f32.mrb[41].mxu1 }
 0x12d   :  { %v4125_v27 = vpop.f32.mrb[42].mxu0  ;;  %v4127_v44 = vpop.f32.mrb[42].mxu1 }
 0x12e   :  { %v3048_v20 = vpop.f32.mrb[43].mxu0  ;;  %v3150_v12 = vpop.f32.mrb[43].mxu1 }
 0x12f   :  { %v3491_v12 = vld [vmem:[%s4837_s0 + $0x1f0] sm:$0xff]  }
 0x130   :  { %3258 = vmatmul.mubr.msk.bf16.gmra.mrb[148].mxu0 %vm194_vm3, %v3489_v63  ;;  %3360 = vmatmul.mubr.msk.bf16.gmra.mrb[148].mxu1 %vm194_vm3, %v3490_v26  ;;  %v3492_v63 = vld [vmem:[%s4837_s0 + $0x2b4] sm:$0xff]  }
 0x131   :  { %3261 = vmatprep.mubr.msk.bf16.mxu0 %vm3517_vm2, %v4840_v0  ;;  %3363 = vmatprep.mubr.msk.bf16.mxu1 %vm3517_vm2, %v4840_v0 }
 0x133   :  { %v4137_v48 = vpop.f32.mrb[44].mxu0  ;;  %v4139_v14 = vpop.f32.mrb[44].mxu1 }
 0x134   :  { %v3051_v36 = vpop.f32.mrb[45].mxu0  ;;  %v3153_v20 = vpop.f32.mrb[45].mxu1 }
 0x135   :  { %v4149_v26 = vpop.f32.mrb[46].mxu0  ;;  %v4151_v59 = vpop.f32.mrb[46].mxu1 }
 0x136   :  { %4893 = vst [vmem:[#allocation2_spill] sm:$0xff] %v4151_v59  ;;  %v3052_v47 = vpop.f32.mrb[47].mxu0  ;;  %v3154_v42 = vpop.f32.mrb[47].mxu1 }
 0x137   :  { %v3493_v42 = vld [vmem:[%s4837_s0 + $0x1f8] sm:$0xff]  }
 0x138   :  { %3262 = vmatmul.mubr.msk.bf16.gmra.mrb[152].mxu0 %vm194_vm3, %v3491_v12  ;;  %3364 = vmatmul.mubr.msk.bf16.gmra.mrb[152].mxu1 %vm194_vm3, %v3492_v63  ;;  %v3494_v12 = vld [vmem:[%s4837_s0 + $0x2bc] sm:$0xff]  }
 0x139   :  { %3265 = vmatprep.mubr.msk.bf16.mxu0 %vm3517_vm2, %v4840_v0  ;;  %3367 = vmatprep.mubr.msk.bf16.mxu1 %vm3517_vm2, %v4840_v0 }
 0x13b   :  { %v4161_v36 = vpop.f32.mrb[48].mxu0  ;;  %v4163_v20 = vpop.f32.mrb[48].mxu1 }
 0x13c   :  { %4894 = vst [vmem:[#allocation3_spill] sm:$0xff] %v4161_v36  ;;  %4895 = vst [vmem:[#allocation4_spill] sm:$0xff] %v4163_v20  ;;  %v3055_v54 = vpop.f32.mrb[49].mxu0  ;;  %v3157_v47 = vpop.f32.mrb[49].mxu1 }
 0x13d   :  { %v4173_v63 = vpop.f32.mrb[50].mxu0  ;;  %v4175_v35 = vpop.f32.mrb[50].mxu1 }
 0x13e   :  { %4896 = vst [vmem:[#allocation5_spill] sm:$0xff] %v4173_v63  ;;  %4897 = vst [vmem:[#allocation6_spill] sm:$0xff] %v4175_v35  ;;  %v3056_v23 = vpop.f32.mrb[51].mxu0  ;;  %v3158_v18 = vpop.f32.mrb[51].mxu1 }
 0x13f   :  { %v3495_v18 = vld [vmem:[%s4837_s0 + $0x200] sm:$0xff]  }
 0x140   :  { %3266 = vmatmul.mubr.msk.bf16.gmra.mrb[156].mxu0 %vm194_vm3, %v3493_v42  ;;  %3368 = vmatmul.mubr.msk.bf16.gmra.mrb[156].mxu1 %vm194_vm3, %v3494_v12  ;;  %v3496_v42 = vld [vmem:[%s4837_s0 + $0x2c4] sm:$0xff]  }
 0x141   :  { %3269 = vmatprep.mubr.msk.bf16.mxu0 %vm3517_vm2, %v4840_v0  ;;  %3371 = vmatprep.mubr.msk.bf16.mxu1 %vm3517_vm2, %v4840_v0 }
 0x143   :  { %v4185_v54 = vpop.f32.mrb[52].mxu0  ;;  %v4187_v47 = vpop.f32.mrb[52].mxu1 }
 0x144   :  { %4898 = vst [vmem:[#allocation7_spill] sm:$0xff] %v4185_v54  ;;  %4899 = vst [vmem:[#allocation8_spill] sm:$0xff] %v4187_v47  ;;  %v3059_v30 = vpop.f32.mrb[53].mxu0  ;;  %v3161_v23 = vpop.f32.mrb[53].mxu1 }
 0x145   :  { %v4197_v12 = vpop.f32.mrb[54].mxu0  ;;  %v4199_v11 = vpop.f32.mrb[54].mxu1  ;;  %v4902_v30 = vmov 0.0  }
 0x146   :  { %4900 = vst [vmem:[#allocation9_spill] sm:$0xff] %v4197_v12  ;;  %4901 = vst [vmem:[#allocation10_spill] sm:$0xff] %v4199_v11  ;;  %v3060_v62 = vpop.f32.mrb[55].mxu0  ;;  %v3162_v0 = vpop.f32.mrb[55].mxu1 }
 0x147   :  { %v3497_v0 = vld [vmem:[%s4837_s0 + $0x208] sm:$0xff]  }
 0x148   :  { %3270 = vmatmul.mubr.msk.bf16.gmra.mrb[160].mxu0 %vm194_vm3, %v3495_v18  ;;  %3372 = vmatmul.mubr.msk.bf16.gmra.mrb[160].mxu1 %vm194_vm3, %v3496_v42  ;;  %v3498_v18 = vld [vmem:[%s4837_s0 + $0x2cc] sm:$0xff]  }
 0x149   :  { %3273 = vmatprep.mubr.msk.bf16.mxu0 %vm3517_vm2, %v4902_v30  ;;  %3375 = vmatprep.mubr.msk.bf16.mxu1 %vm3517_vm2, %v4902_v30 }
 0x14b   :  { %v4209_v23 = vpop.f32.mrb[56].mxu0  ;;  %v4211_v2 = vpop.f32.mrb[56].mxu1 }
 0x14c   :  { %4903 = vst [vmem:[#allocation11_spill] sm:$0xff] %v4209_v23  ;;  %4904 = vst [vmem:[#allocation12_spill] sm:$0xff] %v4211_v2  ;;  %v3063_v6 = vpop.f32.mrb[57].mxu0  ;;  %v3165_v62 = vpop.f32.mrb[57].mxu1 }
 0x14d   :  { %v4221_v42 = vpop.f32.mrb[58].mxu0  ;;  %v4223_v11 = vpop.f32.mrb[58].mxu1 }
 0x14e   :  { %4905 = vst [vmem:[#allocation13_spill] sm:$0xff] %v4221_v42  ;;  %4906 = vst [vmem:[#allocation14_spill] sm:$0xff] %v4223_v11  ;;  %v3064_v54 = vpop.f32.mrb[59].mxu0  ;;  %v3166_v35 = vpop.f32.mrb[59].mxu1 }
 0x14f   :  { %v3499_v35 = vld [vmem:[%s4837_s0 + $0x210] sm:$0xff]  }
 0x150   :  { %3274 = vmatmul.mubr.msk.bf16.gmra.mrb[164].mxu0 %vm194_vm3, %v3497_v0  ;;  %3376 = vmatmul.mubr.msk.bf16.gmra.mrb[164].mxu1 %vm194_vm3, %v3498_v18  ;;  %v3500_v0 = vld [vmem:[%s4837_s0 + $0x2d4] sm:$0xff]  }
 0x151   :  { %3277 = vmatprep.mubr.msk.bf16.mxu0 %vm3517_vm2, %v4902_v30  ;;  %3379 = vmatprep.mubr.msk.bf16.mxu1 %vm3517_vm2, %v4902_v30 }
 0x153   :  { %v4233_v6 = vpop.f32.mrb[60].mxu0  ;;  %v4235_v62 = vpop.f32.mrb[60].mxu1 }
 0x154   :  { %4907 = vst [vmem:[#allocation15_spill] sm:$0xff] %v4233_v6  ;;  %4908 = vst [vmem:[#allocation16_spill] sm:$0xff] %v4235_v62  ;;  %v3067_v12 = vpop.f32.mrb[61].mxu0  ;;  %v3169_v54 = vpop.f32.mrb[61].mxu1 }
 0x155   :  { %v4245_v18 = vpop.f32.mrb[62].mxu0  ;;  %v4247_v11 = vpop.f32.mrb[62].mxu1 }
 0x156   :  { %4909 = vst [vmem:[#allocation17_spill] sm:$0xff] %v4245_v18  ;;  %4910 = vst [vmem:[#allocation18_spill] sm:$0xff] %v4247_v11  ;;  %v3068_v2 = vpop.f32.mrb[63].mxu0  ;;  %v3170_v23 = vpop.f32.mrb[63].mxu1 }
 0x157   :  { %v3501_v23 = vld [vmem:[%s4837_s0 + $0x218] sm:$0xff]  }
 0x158   :  { %3278 = vmatmul.mubr.msk.bf16.gmra.mrb[168].mxu0 %vm194_vm3, %v3499_v35  ;;  %3380 = vmatmul.mubr.msk.bf16.gmra.mrb[168].mxu1 %vm194_vm3, %v3500_v0  ;;  %v3502_v35 = vld [vmem:[%s4837_s0 + $0x2dc] sm:$0xff]  }
 0x159   :  { %3281 = vmatprep.mubr.msk.bf16.mxu0 %vm3517_vm2, %v4902_v30  ;;  %3383 = vmatprep.mubr.msk.bf16.mxu1 %vm3517_vm2, %v4902_v30 }
 0x15b   :  { %v4257_v12 = vpop.f32.mrb[64].mxu0  ;;  %v4259_v54 = vpop.f32.mrb[64].mxu1 }
 0x15c   :  { %4911 = vst [vmem:[#allocation19_spill] sm:$0xff] %v4257_v12  ;;  %4912 = vst [vmem:[#allocation20_spill] sm:$0xff] %v4259_v54  ;;  %v3071_v42 = vpop.f32.mrb[65].mxu0  ;;  %v3173_v2 = vpop.f32.mrb[65].mxu1 }
 0x15d   :  { %v4269_v0 = vpop.f32.mrb[66].mxu0  ;;  %v4271_v11 = vpop.f32.mrb[66].mxu1 }
 0x15e   :  { %4913 = vst [vmem:[#allocation21_spill] sm:$0xff] %v4269_v0  ;;  %4914 = vst [vmem:[#allocation22_spill] sm:$0xff] %v4271_v11  ;;  %v3072_v62 = vpop.f32.mrb[67].mxu0  ;;  %v3174_v6 = vpop.f32.mrb[67].mxu1 }
 0x15f   :  { %v3503_v6 = vld [vmem:[%s4837_s0 + $0x220] sm:$0xff]  }
 0x160   :  { %3282 = vmatmul.mubr.msk.bf16.gmra.mrb[172].mxu0 %vm194_vm3, %v3501_v23  ;;  %3384 = vmatmul.mubr.msk.bf16.gmra.mrb[172].mxu1 %vm194_vm3, %v3502_v35  ;;  %v3504_v23 = vld [vmem:[%s4837_s0 + $0x2e4] sm:$0xff]  }
 0x161   :  { %3285 = vmatprep.mubr.msk.bf16.mxu0 %vm3517_vm2, %v4902_v30  ;;  %3387 = vmatprep.mubr.msk.bf16.mxu1 %vm3517_vm2, %v4902_v30 }
 0x163   :  { %v4281_v42 = vpop.f32.mrb[68].mxu0  ;;  %v4283_v2 = vpop.f32.mrb[68].mxu1 }
 0x164   :  { %4915 = vst [vmem:[#allocation23_spill] sm:$0xff] %v4281_v42  ;;  %4916 = vst [vmem:[#allocation24_spill] sm:$0xff] %v4283_v2  ;;  %v3075_v18 = vpop.f32.mrb[69].mxu0  ;;  %v3177_v62 = vpop.f32.mrb[69].mxu1 }
 0x165   :  { %v4293_v35 = vpop.f32.mrb[70].mxu0  ;;  %v4295_v11 = vpop.f32.mrb[70].mxu1 }
 0x166   :  { %4917 = vst [vmem:[#allocation25_spill] sm:$0xff] %v4293_v35  ;;  %4918 = vst [vmem:[#allocation26_spill] sm:$0xff] %v4295_v11  ;;  %v3076_v54 = vpop.f32.mrb[71].mxu0  ;;  %v3178_v12 = vpop.f32.mrb[71].mxu1 }
 0x167   :  { %v3505_v12 = vld [vmem:[%s4837_s0 + $0x228] sm:$0xff]  }
 0x168   :  { %3286 = vmatmul.mubr.msk.bf16.gmra.mrb[176].mxu0 %vm194_vm3, %v3503_v6  ;;  %3388 = vmatmul.mubr.msk.bf16.gmra.mrb[176].mxu1 %vm194_vm3, %v3504_v23  ;;  %v3506_v6 = vld [vmem:[%s4837_s0 + $0x2ec] sm:$0xff]  }
 0x169   :  { %3289 = vmatprep.mubr.msk.bf16.mxu0 %vm3517_vm2, %v4902_v30  ;;  %3391 = vmatprep.mubr.msk.bf16.mxu1 %vm3517_vm2, %v4902_v30 }
 0x16b   :  { %v4305_v18 = vpop.f32.mrb[72].mxu0  ;;  %v4307_v62 = vpop.f32.mrb[72].mxu1 }
 0x16c   :  { %4919 = vst [vmem:[#allocation27_spill] sm:$0xff] %v4305_v18  ;;  %4920 = vst [vmem:[#allocation28_spill] sm:$0xff] %v4307_v62  ;;  %v3079_v0 = vpop.f32.mrb[73].mxu0  ;;  %v3181_v54 = vpop.f32.mrb[73].mxu1 }
 0x16d   :  { %v4317_v23 = vpop.f32.mrb[74].mxu0  ;;  %v4319_v11 = vpop.f32.mrb[74].mxu1 }
 0x16e   :  { %4921 = vst [vmem:[#allocation29_spill] sm:$0xff] %v4317_v23  ;;  %4922 = vst [vmem:[#allocation30_spill] sm:$0xff] %v4319_v11  ;;  %v3080_v2 = vpop.f32.mrb[75].mxu0  ;;  %v3182_v42 = vpop.f32.mrb[75].mxu1 }
 0x16f   :  { %v3507_v42 = vld [vmem:[%s4837_s0 + $0x230] sm:$0xff]  }
 0x170   :  { %3290 = vmatmul.mubr.msk.bf16.gmra.mrb[180].mxu0 %vm194_vm3, %v3505_v12  ;;  %3392 = vmatmul.mubr.msk.bf16.gmra.mrb[180].mxu1 %vm194_vm3, %v3506_v6  ;;  %v3508_v12 = vld [vmem:[%s4837_s0 + $0x2f4] sm:$0xff]  }
 0x171   :  { %3293 = vmatprep.mubr.msk.bf16.mxu0 %vm3517_vm2, %v4902_v30  ;;  %3395 = vmatprep.mubr.msk.bf16.mxu1 %vm3517_vm2, %v4902_v30 }
 0x173   :  { %v4329_v0 = vpop.f32.mrb[76].mxu0  ;;  %v4331_v54 = vpop.f32.mrb[76].mxu1 }
 0x174   :  { %4923 = vst [vmem:[#allocation31_spill] sm:$0xff] %v4329_v0  ;;  %4924 = vst [vmem:[#allocation32_spill] sm:$0xff] %v4331_v54  ;;  %v3083_v35 = vpop.f32.mrb[77].mxu0  ;;  %v3185_v2 = vpop.f32.mrb[77].mxu1 }
 0x175   :  { %v4341_v6 = vpop.f32.mrb[78].mxu0  ;;  %v4343_v11 = vpop.f32.mrb[78].mxu1 }
 0x176   :  { %4925 = vst [vmem:[#allocation33_spill] sm:$0xff] %v4341_v6  ;;  %4926 = vst [vmem:[#allocation34_spill] sm:$0xff] %v4343_v11  ;;  %v3084_v62 = vpop.f32.mrb[79].mxu0  ;;  %v3186_v18 = vpop.f32.mrb[79].mxu1 }
 0x177   :  { %v3509_v18 = vld [vmem:[%s4837_s0 + $0x238] sm:$0xff]  }
 0x178   :  { %3294 = vmatmul.mubr.msk.bf16.gmra.mrb[184].mxu0 %vm194_vm3, %v3507_v42  ;;  %3396 = vmatmul.mubr.msk.bf16.gmra.mrb[184].mxu1 %vm194_vm3, %v3508_v12  ;;  %v3510_v42 = vld [vmem:[%s4837_s0 + $0x2fc] sm:$0xff]  }
 0x179   :  { %3297 = vmatprep.mubr.msk.bf16.mxu0 %vm3517_vm2, %v4902_v30  ;;  %3399 = vmatprep.mubr.msk.bf16.mxu1 %vm3517_vm2, %v4902_v30 }
 0x17b   :  { %v4353_v35 = vpop.f32.mrb[80].mxu0  ;;  %v4355_v2 = vpop.f32.mrb[80].mxu1 }
 0x17c   :  { %4927 = vst [vmem:[#allocation35_spill] sm:$0xff] %v4353_v35  ;;  %4928 = vst [vmem:[#allocation36_spill] sm:$0xff] %v4355_v2  ;;  %v3087_v23 = vpop.f32.mrb[81].mxu0  ;;  %v3189_v62 = vpop.f32.mrb[81].mxu1 }
 0x17d   :  { %v4365_v12 = vpop.f32.mrb[82].mxu0  ;;  %v4367_v11 = vpop.f32.mrb[82].mxu1 }
 0x17e   :  { %4929 = vst [vmem:[#allocation37_spill] sm:$0xff] %v4365_v12  ;;  %4930 = vst [vmem:[#allocation38_spill] sm:$0xff] %v4367_v11  ;;  %v3088_v54 = vpop.f32.mrb[83].mxu0  ;;  %v3190_v0 = vpop.f32.mrb[83].mxu1 }
 0x17f   :  { %v3511_v0 = vld [vmem:[%s4837_s0 + $0x240] sm:$0xff]  }
 0x180   :  { %3298 = vmatmul.mubr.msk.bf16.gmra.mrb[188].mxu0 %vm194_vm3, %v3509_v18  ;;  %3400 = vmatmul.mubr.msk.bf16.gmra.mrb[188].mxu1 %vm194_vm3, %v3510_v42  ;;  %v3512_v18 = vld [vmem:[%s4837_s0 + $0x304] sm:$0xff]  }
 0x181   :  { %3301 = vmatprep.mubr.msk.bf16.mxu0 %vm3517_vm2, %v4902_v30  ;;  %3403 = vmatprep.mubr.msk.bf16.mxu1 %vm3517_vm2, %v4902_v30 }
 0x183   :  { %v4377_v23 = vpop.f32.mrb[84].mxu0  ;;  %v4379_v62 = vpop.f32.mrb[84].mxu1 }
 0x184   :  { %4931 = vst [vmem:[#allocation39_spill] sm:$0xff] %v4377_v23  ;;  %4932 = vst [vmem:[#allocation40_spill] sm:$0xff] %v4379_v62  ;;  %v3091_v6 = vpop.f32.mrb[85].mxu0  ;;  %v3193_v54 = vpop.f32.mrb[85].mxu1 }
 0x185   :  { %v4389_v42 = vpop.f32.mrb[86].mxu0  ;;  %v4391_v11 = vpop.f32.mrb[86].mxu1 }
 0x186   :  { %4933 = vst [vmem:[#allocation41_spill] sm:$0xff] %v4389_v42  ;;  %4934 = vst [vmem:[#allocation42_spill] sm:$0xff] %v4391_v11  ;;  %v3092_v2 = vpop.f32.mrb[87].mxu0  ;;  %v3194_v35 = vpop.f32.mrb[87].mxu1 }
 0x187   :  { %v3513_v35 = vld [vmem:[%s4837_s0 + $0x248] ss:$0 sps:$4 sm:$0xff]  }
 0x188   :  { %3302 = vmatmul.mubr.msk.bf16.gmra.mrb[192].mxu0 %vm194_vm3, %v3511_v0  ;;  %3404 = vmatmul.mubr.msk.bf16.gmra.mrb[192].mxu1 %vm194_vm3, %v3512_v18  ;;  %v3514_v0 = vld [vmem:[%s4837_s0 + $0x30c] ss:$0 sps:$4 sm:$0xff]  }
 0x189   :  { %3305 = vmatprep.mubr.msk.bf16.mxu0 %vm3517_vm2, %v4902_v30  ;;  %3407 = vmatprep.mubr.msk.bf16.mxu1 %vm3517_vm2, %v4902_v30 }
 0x18b   :  { %v4401_v6 = vpop.f32.mrb[88].mxu0  ;;  %v4403_v54 = vpop.f32.mrb[88].mxu1 }
 0x18c   :  { %4935 = vst [vmem:[#allocation43_spill] sm:$0xff] %v4401_v6  ;;  %4936 = vst [vmem:[#allocation44_spill] sm:$0xff] %v4403_v54  ;;  %v3095_v12 = vpop.f32.mrb[89].mxu0  ;;  %v3197_v2 = vpop.f32.mrb[89].mxu1 }
 0x18d   :  { %v4413_v18 = vpop.f32.mrb[90].mxu0  ;;  %v4415_v30 = vpop.f32.mrb[90].mxu1 }
 0x18e   :  { %4937 = vst [vmem:[#allocation45_spill] sm:$0xff] %v4413_v18  ;;  %4938 = vst [vmem:[#allocation46_spill] sm:$0xff] %v4415_v30  ;;  %v3096_v42 = vpop.f32.mrb[91].mxu0  ;;  %v3198_v62 = vpop.f32.mrb[91].mxu1 }
 0x18f   :  { %v4945_v62 = vmax.f32 %v3873_v60, %v3875_v61 }
 0x190   :  { %3306 = vmatmul.mubr.msk.bf16.gmra.mrb[196].mxu0 %vm194_vm3, %v3513_v35  ;;  %3408 = vmatmul.mubr.msk.bf16.gmra.mrb[196].mxu1 %vm194_vm3, %v3514_v0 }
 0x193   :  { %v4421_v12 = vpop.f32.mrb[92].mxu0  ;;  %v4423_v2 = vpop.f32.mrb[92].mxu1 }
 0x194   :  { %4939 = vst [vmem:[#allocation47_spill] sm:$0xff] %v4421_v12  ;;  %4940 = vst [vmem:[#allocation48_spill] sm:$0xff] %v4423_v2  ;;  %v3099_v54 = vpop.f32.mrb[93].mxu0  ;;  %v3201_v6 = vpop.f32.mrb[93].mxu1 }
 0x195   :  { %v4427_v23 = vpop.f32.mrb[94].mxu0  ;;  %v4429_v63 = vpop.f32.mrb[94].mxu1 }
 0x196   :  { %4941 = vst [vmem:[#allocation49_spill] sm:$0xff] %v4427_v23  ;;  %4942 = vst [vmem:[#allocation50_spill] sm:$0xff] %v4429_v63  ;;  %v3100_v42 = vpop.f32.mrb[95].mxu0  ;;  %v3202_v35 = vpop.f32.mrb[95].mxu1  ;;  %v4445_v23 = vld [vmem:[%s4838_s2] ss:$0 sm:$0xff] }
 0x19b   :  { %v4433_v11 = vpop.f32.mrb[96].mxu0  ;;  %v4435_v0 = vpop.f32.mrb[96].mxu1 }
 0x19c   :  { %4943 = vst [vmem:[#allocation51_spill] sm:$0xff] %v4433_v11  ;;  %4944 = vst [vmem:[#allocation52_spill] sm:$0xff] %v4435_v0  ;;  %v3103_v18 = vpop.f32.mrb[97].mxu0  ;;  %v3205_v47 = vpop.f32.mrb[97].mxu1 }
 0x19d   :  { %v506_v54 = vpop.f32.mrb[98].mxu0  ;;  %v986_v6 = vpop.f32.mrb[98].mxu1 }
 0x19e   :  { %v3104_v2 = vpop.f32.mrb[99].mxu0  ;;  %v3206_v12 = vpop.f32.mrb[99].mxu1 }
 0x19f   :  { %v4946_v2 = vmax.f32 %v3885_v4, %v3887_v5 }
 0x1a3   :  { %v1320_v20 = vpop.f32.mrb[100].mxu0  ;;  %v1849_v36 = vpop.f32.mrb[100].mxu1 }
 0x1a4   :  { %v1518_v42 = vmax.f32 %v4945_v62, %v1320_v20  ;;  %v3211_v35 = vpop.f32.mrb[101].mxu0  ;;  %v3313_v63 = vpop.f32.mrb[101].mxu1 }
 0x1a5   :  { %v1323_v30 = vpop.f32.mrb[102].mxu0  ;;  %v1852_v18 = vpop.f32.mrb[102].mxu1 }
 0x1a6   :  { %v2047_v47 = vmax.f32 %v1518_v42, %v1849_v36  ;;  %v1519_v12 = vmax.f32 %v4946_v2, %v1323_v30  ;;  %v3212_v54 = vpop.f32.mrb[103].mxu0  ;;  %v3314_v6 = vpop.f32.mrb[103].mxu1  ;;  %v4947_v36 = vmax.f32 %v3897_v9, %v3899_v10 }
 0x1a8   :  { %v2103_v0 = vadd.f32 %v4445_v23, %v2047_v47  ;;  %v2048_v60 = vmax.f32 %v1519_v12, %v1852_v18  ;;  %v4948_v47 = vmax.f32 %v3909_v16, %v3911_v17  ;;  %v4949_v16 = vmax.f32 %v3921_v21, %v3923_v22 }
 0x1aa   :  { %v2152_v61 = vmax.f32 %v2103_v0, 0.0  ;;  %v2104_v20 = vadd.f32 %v4445_v23, %v2048_v60 }
 0x1ab   :  { %v1328_v63 = vpop.f32.mrb[104].mxu0  ;;  %v1857_v62 = vpop.f32.mrb[104].mxu1 }
 0x1ac   :  { %v2850_v35 = vpack.c.bf16 %v2152_v61, %v2152_v61  ;;  %v2153_v11 = vmax.f32 %v2104_v20, 0.0  ;;  %v1520_v42 = vmax.f32 %v4947_v36, %v1328_v63  ;;  %v3215_v59 = vpop.f32.mrb[105].mxu0  ;;  %v3317_v4 = vpop.f32.mrb[105].mxu1 }
 0x1ad   :  { %v1331_v5 = vpop.f32.mrb[106].mxu0  ;;  %v1860_v30 = vpop.f32.mrb[106].mxu1 }
 0x1ae   :  { %2399 = vst.msk [vmem:[%s4839_s3] sm:$0xf] %vm2398_vm4, %v2850_v35  ;;  %v2851_v0 = vpack.c.bf16 %v2153_v11, %v2153_v11  ;;  %v2049_v18 = vmax.f32 %v1520_v42, %v1857_v62  ;;  %v1521_v2 = vmax.f32 %v4948_v47, %v1331_v5  ;;  %v3216_v12 = vpop.f32.mrb[107].mxu0  ;;  %v3318_v54 = vpop.f32.mrb[107].mxu1  ;;  %v4950_v5 = vmax.f32 %v3933_v28, %v3935_v29 }
 0x1af   :  { %v4951_v28 = vmax.f32 %v3945_v33, %v3947_v34 }
 0x1b0   :  { %2400 = vst.msk [vmem:[%s4839_s3 + $0x4] sm:$0xf] %vm2398_vm4, %v2851_v0  ;;  %v2105_v9 = vadd.f32 %v4445_v23, %v2049_v18  ;;  %v2050_v10 = vmax.f32 %v1521_v2, %v1860_v30 }
 0x1b2   :  { %v2154_v59 = vmax.f32 %v2105_v9, 0.0  ;;  %v2106_v6 = vadd.f32 %v4445_v23, %v2050_v10 }
 0x1b3   :  { %v1336_v60 = vpop.f32.mrb[108].mxu0  ;;  %v1865_v11 = vpop.f32.mrb[108].mxu1 }
 0x1b4   :  { %v2852_v61 = vpack.c.bf16 %v2154_v59, %v2154_v59  ;;  %v2155_v20 = vmax.f32 %v2106_v6, 0.0  ;;  %v1522_v17 = vmax.f32 %v4949_v16, %v1336_v60  ;;  %v3219_v63 = vpop.f32.mrb[109].mxu0  ;;  %v3321_v62 = vpop.f32.mrb[109].mxu1  ;;  %v4952_v16 = vmax.f32 %v3957_v40, %v3959_v41 }
 0x1b5   :  { %v1339_v35 = vpop.f32.mrb[110].mxu0  ;;  %v1868_v36 = vpop.f32.mrb[110].mxu1  ;;  %v4953_v40 = vmax.f32 %v3969_v45, %v3971_v46 }
 0x1b6   :  { %2401 = vst.msk [vmem:[%s4839_s3 + $0x8] sm:$0xf] %vm2398_vm4, %v2852_v61  ;;  %v2853_v42 = vpack.c.bf16 %v2155_v20, %v2155_v20  ;;  %v2051_v4 = vmax.f32 %v1522_v17, %v1865_v11  ;;  %v1523_v30 = vmax.f32 %v4950_v5, %v1339_v35  ;;  %v3220_v0 = vpop.f32.mrb[111].mxu0  ;;  %v3322_v18 = vpop.f32.mrb[111].mxu1 }
 0x1b8   :  { %2402 = vst.msk [vmem:[%s4839_s3 + $0xc] sm:$0xf] %vm2398_vm4, %v2853_v42  ;;  %v2107_v21 = vadd.f32 %v4445_v23, %v2051_v4  ;;  %v2052_v22 = vmax.f32 %v1523_v30, %v1868_v36 }
 0x1ba   :  { %v2156_v47 = vmax.f32 %v2107_v21, 0.0  ;;  %v2108_v2 = vadd.f32 %v4445_v23, %v2052_v22 }
 0x1bb   :  { %v1344_v12 = vpop.f32.mrb[112].mxu0  ;;  %v1873_v54 = vpop.f32.mrb[112].mxu1 }
 0x1bc   :  { %v2854_v9 = vpack.c.bf16 %v2156_v47, %v2156_v47  ;;  %v2157_v10 = vmax.f32 %v2108_v2, 0.0  ;;  %v1524_v29 = vmax.f32 %v4951_v28, %v1344_v12  ;;  %v3223_v59 = vpop.f32.mrb[113].mxu0  ;;  %v3325_v6 = vpop.f32.mrb[113].mxu1  ;;  %v4954_v12 = vmax.f32 %v3981_v52, %v3983_v53 }
 0x1bd   :  { %v1347_v60 = vpop.f32.mrb[114].mxu0  ;;  %v1876_v11 = vpop.f32.mrb[114].mxu1  ;;  %v4955_v52 = vmax.f32 %v3993_v57, %v3995_v58 }
 0x1be   :  { %2403 = vst.msk [vmem:[%s4839_s3 + $0x10] sm:$0xf] %vm2398_vm4, %v2854_v9  ;;  %v2855_v61 = vpack.c.bf16 %v2157_v10, %v2157_v10  ;;  %v2053_v20 = vmax.f32 %v1524_v29, %v1873_v54  ;;  %v1525_v17 = vmax.f32 %v4952_v16, %v1347_v60  ;;  %v3224_v63 = vpop.f32.mrb[115].mxu0  ;;  %v3326_v62 = vpop.f32.mrb[115].mxu1 }
 0x1c0   :  { %2404 = vst.msk [vmem:[%s4839_s3 + $0x14] sm:$0xf] %vm2398_vm4, %v2855_v61  ;;  %v2109_v33 = vadd.f32 %v4445_v23, %v2053_v20  ;;  %v2054_v34 = vmax.f32 %v1525_v17, %v1876_v11 }
 0x1c2   :  { %v2158_v35 = vmax.f32 %v2109_v33, 0.0  ;;  %v2110_v36 = vadd.f32 %v4445_v23, %v2054_v34  ;;  %v4956_v33 = vmax.f32 %v4005_v7, %v4007_v8  ;;  %v4957_v7 = vmax.f32 %v4017_v15, %v4019_v19 }
 0x1c3   :  { %v1352_v42 = vpop.f32.mrb[116].mxu0  ;;  %v1881_v4 = vpop.f32.mrb[116].mxu1 }
 0x1c4   :  { %v2856_v5 = vpack.c.bf16 %v2158_v35, %v2158_v35  ;;  %v2159_v30 = vmax.f32 %v2110_v36, 0.0  ;;  %v1526_v41 = vmax.f32 %v4953_v40, %v1352_v42  ;;  %v3227_v0 = vpop.f32.mrb[117].mxu0  ;;  %v3329_v18 = vpop.f32.mrb[117].mxu1 }
 0x1c5   :  { %v1355_v21 = vpop.f32.mrb[118].mxu0  ;;  %v1884_v22 = vpop.f32.mrb[118].mxu1 }
 0x1c6   :  { %2405 = vst.msk [vmem:[%s4839_s3 + $0x18] sm:$0xf] %vm2398_vm4, %v2856_v5  ;;  %v2857_v47 = vpack.c.bf16 %v2159_v30, %v2159_v30  ;;  %v2055_v2 = vmax.f32 %v1526_v41, %v1881_v4  ;;  %v1527_v54 = vmax.f32 %v4954_v12, %v1355_v21  ;;  %v3228_v9 = vpop.f32.mrb[119].mxu0  ;;  %v3330_v10 = vpop.f32.mrb[119].mxu1  ;;  %v4958_v12 = vmax.f32 %v4029_v31, %v4031_v32 }
 0x1c7   :  { %v4959_v31 = vmax.f32 %v4041_v39, %v4043_v43 }
 0x1c8   :  { %2406 = vst.msk [vmem:[%s4839_s3 + $0x1c] sm:$0xf] %vm2398_vm4, %v2857_v47  ;;  %v2111_v45 = vadd.f32 %v4445_v23, %v2055_v2  ;;  %v2056_v46 = vmax.f32 %v1527_v54, %v1884_v22 }
 0x1ca   :  { %v2160_v28 = vmax.f32 %v2111_v45, 0.0  ;;  %v2112_v29 = vadd.f32 %v4445_v23, %v2056_v46 }
 0x1cb   :  { %v1360_v59 = vpop.f32.mrb[120].mxu0  ;;  %v1889_v6 = vpop.f32.mrb[120].mxu1 }
 0x1cc   :  { %v2858_v60 = vpack.c.bf16 %v2160_v28, %v2160_v28  ;;  %v2161_v11 = vmax.f32 %v2112_v29, 0.0  ;;  %v1528_v53 = vmax.f32 %v4955_v52, %v1360_v59  ;;  %v3231_v61 = vpop.f32.mrb[121].mxu0  ;;  %v3333_v20 = vpop.f32.mrb[121].mxu1 }
 0x1cd   :  { %v1363_v16 = vpop.f32.mrb[122].mxu0  ;;  %v1892_v17 = vpop.f32.mrb[122].mxu1 }
 0x1ce   :  { %2407 = vst.msk [vmem:[%s4839_s3 + $0x20] sm:$0xf] %vm2398_vm4, %v2858_v60  ;;  %v2859_v63 = vpack.c.bf16 %v2161_v11, %v2161_v11  ;;  %v2057_v62 = vmax.f32 %v1528_v53, %v1889_v6  ;;  %v1529_v34 = vmax.f32 %v4956_v33, %v1363_v16  ;;  %v3232_v35 = vpop.f32.mrb[123].mxu0  ;;  %v3334_v36 = vpop.f32.mrb[123].mxu1  ;;  %v4960_v16 = vmax.f32 %v4053_v55, %v4055_v56 }
 0x1cf   :  { %v4961_v55 = vmax.f32 %v4065_v3, %v4067_v13 }
 0x1d0   :  { %2408 = vst.msk [vmem:[%s4839_s3 + $0x24] sm:$0xf] %vm2398_vm4, %v2859_v63  ;;  %v2113_v57 = vadd.f32 %v4445_v23, %v2057_v62  ;;  %v2058_v58 = vmax.f32 %v1529_v34, %v1892_v17 }
 0x1d2   :  { %v2162_v42 = vmax.f32 %v2113_v57, 0.0  ;;  %v2114_v4 = vadd.f32 %v4445_v23, %v2058_v58 }
 0x1d3   :  { %v1368_v5 = vpop.f32.mrb[124].mxu0  ;;  %v1897_v30 = vpop.f32.mrb[124].mxu1 }
 0x1d4   :  { %v2860_v40 = vpack.c.bf16 %v2162_v42, %v2162_v42  ;;  %v2163_v41 = vmax.f32 %v2114_v4, 0.0  ;;  %v1530_v8 = vmax.f32 %v4957_v7, %v1368_v5  ;;  %v3235_v0 = vpop.f32.mrb[125].mxu0  ;;  %v3337_v18 = vpop.f32.mrb[125].mxu1  ;;  %v4962_v7 = vmax.f32 %v4077_v37, %v4079_v38 }
 0x1d5   :  { %v1371_v21 = vpop.f32.mrb[126].mxu0  ;;  %v1900_v22 = vpop.f32.mrb[126].mxu1  ;;  %v4963_v37 = vmax.f32 %v4089_v51, %v4091_v1 }
 0x1d6   :  { %2409 = vst.msk [vmem:[%s4839_s3 + $0x28] sm:$0xf] %vm2398_vm4, %v2860_v40  ;;  %v2861_v47 = vpack.c.bf16 %v2163_v41, %v2163_v41  ;;  %v2059_v2 = vmax.f32 %v1530_v8, %v1897_v30  ;;  %v1531_v54 = vmax.f32 %v4958_v12, %v1371_v21  ;;  %v3236_v9 = vpop.f32.mrb[127].mxu0  ;;  %v3338_v10 = vpop.f32.mrb[127].mxu1 }
 0x1d8   :  { %2410 = vst.msk [vmem:[%s4839_s3 + $0x2c] sm:$0xf] %vm2398_vm4, %v2861_v47  ;;  %v2115_v15 = vadd.f32 %v4445_v23, %v2059_v2  ;;  %v2060_v19 = vmax.f32 %v1531_v54, %v1900_v22 }
 0x1da   :  { %v2164_v45 = vmax.f32 %v2115_v15, 0.0  ;;  %v2116_v46 = vadd.f32 %v4445_v23, %v2060_v19 }
 0x1db   :  { %v1376_v28 = vpop.f32.mrb[128].mxu0  ;;  %v1905_v29 = vpop.f32.mrb[128].mxu1 }
 0x1dc   :  { %v2862_v59 = vpack.c.bf16 %v2164_v45, %v2164_v45  ;;  %v2165_v6 = vmax.f32 %v2116_v46, 0.0  ;;  %v1532_v32 = vmax.f32 %v4959_v31, %v1376_v28  ;;  %v3239_v60 = vpop.f32.mrb[129].mxu0  ;;  %v3341_v11 = vpop.f32.mrb[129].mxu1  ;;  %v4964_v28 = vmax.f32 %v4101_v49, %v4103_v50 }
 0x1dd   :  { %v1379_v52 = vpop.f32.mrb[130].mxu0  ;;  %v1908_v53 = vpop.f32.mrb[130].mxu1  ;;  %v4965_v49 = vmax.f32 %v4113_v24, %v4115_v25 }
 0x1de   :  { %2411 = vst.msk [vmem:[%s4839_s3 + $0x30] sm:$0xf] %vm2398_vm4, %v2862_v59  ;;  %v2863_v61 = vpack.c.bf16 %v2165_v6, %v2165_v6  ;;  %v2061_v20 = vmax.f32 %v1532_v32, %v1905_v29  ;;  %v1533_v17 = vmax.f32 %v4960_v16, %v1379_v52  ;;  %v3240_v63 = vpop.f32.mrb[131].mxu0  ;;  %v3342_v62 = vpop.f32.mrb[131].mxu1 }
 0x1e0   :  { %2412 = vst.msk [vmem:[%s4839_s3 + $0x34] sm:$0xf] %vm2398_vm4, %v2863_v61  ;;  %v2117_v39 = vadd.f32 %v4445_v23, %v2061_v20  ;;  %v2062_v43 = vmax.f32 %v1533_v17, %v1908_v53 }
 0x1e2   :  { %v2166_v33 = vmax.f32 %v2117_v39, 0.0  ;;  %v2118_v34 = vadd.f32 %v4445_v23, %v2062_v43  ;;  %v4966_v39 = vmax.f32 %v4125_v27, %v4127_v44  ;;  %v4967_v44 = vmax.f32 %v4137_v48, %v4139_v14 }
 0x1e3   :  { %v1384_v35 = vpop.f32.mrb[132].mxu0  ;;  %v1913_v36 = vpop.f32.mrb[132].mxu1 }
 0x1e4   :  { %v2864_v57 = vpack.c.bf16 %v2166_v33, %v2166_v33  ;;  %v2167_v58 = vmax.f32 %v2118_v34, 0.0  ;;  %v1534_v56 = vmax.f32 %v4961_v55, %v1384_v35  ;;  %v3243_v42 = vpop.f32.mrb[133].mxu0  ;;  %v3345_v4 = vpop.f32.mrb[133].mxu1 }
 0x1e5   :  { %v1387_v5 = vpop.f32.mrb[134].mxu0  ;;  %v1916_v30 = vpop.f32.mrb[134].mxu1 }
 0x1e6   :  { %2413 = vst.msk [vmem:[%s4839_s3 + $0x38] sm:$0xf] %vm2398_vm4, %v2864_v57  ;;  %v2865_v40 = vpack.c.bf16 %v2167_v58, %v2167_v58  ;;  %v2063_v41 = vmax.f32 %v1534_v56, %v1913_v36  ;;  %v1535_v8 = vmax.f32 %v4962_v7, %v1387_v5  ;;  %v3244_v0 = vpop.f32.mrb[135].mxu0  ;;  %v3346_v18 = vpop.f32.mrb[135].mxu1  ;;  %v4968_v7 = vld [vmem:[#allocation2_spill] sm:$0xff] }
 0x1e8   :  { %2414 = vst.msk [vmem:[%s4839_s3 + $0x3c] sm:$0xf] %vm2398_vm4, %v2865_v40  ;;  %v2119_v3 = vadd.f32 %v4445_v23, %v2063_v41  ;;  %v2064_v13 = vmax.f32 %v1535_v8, %v1916_v30  ;;  %v4969_v8 = vmax.f32 %v4149_v26, %v4968_v7  ;;  %v4971_v26 = vld [vmem:[#allocation4_spill] sm:$0xff] }
 0x1ea   :  { %v2168_v21 = vmax.f32 %v2119_v3, 0.0  ;;  %v2120_v22 = vadd.f32 %v4445_v23, %v2064_v13 }
 0x1eb   :  { %v1392_v47 = vpop.f32.mrb[136].mxu0  ;;  %v1921_v2 = vpop.f32.mrb[136].mxu1 }
 0x1ec   :  { %v2866_v12 = vpack.c.bf16 %v2168_v21, %v2168_v21  ;;  %v2169_v54 = vmax.f32 %v2120_v22, 0.0  ;;  %v1536_v38 = vmax.f32 %v4963_v37, %v1392_v47  ;;  %v3247_v9 = vpop.f32.mrb[137].mxu0  ;;  %v3349_v10 = vpop.f32.mrb[137].mxu1 }
 0x1ed   :  { %v1395_v15 = vpop.f32.mrb[138].mxu0  ;;  %v1924_v19 = vpop.f32.mrb[138].mxu1 }
 0x1ee   :  { %2415 = vst.msk [vmem:[%s4839_s3 + $0x40] sm:$0xf] %vm2398_vm4, %v2866_v12  ;;  %v2867_v45 = vpack.c.bf16 %v2169_v54, %v2169_v54  ;;  %v2065_v46 = vmax.f32 %v1536_v38, %v1921_v2  ;;  %v1537_v29 = vmax.f32 %v4964_v28, %v1395_v15  ;;  %v3248_v59 = vpop.f32.mrb[139].mxu0  ;;  %v3350_v6 = vpop.f32.mrb[139].mxu1  ;;  %v4970_v54 = vld [vmem:[#allocation3_spill] sm:$0xff]  ;;  %v4973_v28 = vld [vmem:[#allocation5_spill] sm:$0xff] }
 0x1ef   :  { %v4972_v37 = vmax.f32 %v4970_v54, %v4971_v26 }
 0x1f0   :  { %2416 = vst.msk [vmem:[%s4839_s3 + $0x44] sm:$0xf] %vm2398_vm4, %v2867_v45  ;;  %v2121_v51 = vadd.f32 %v4445_v23, %v2065_v46  ;;  %v2066_v1 = vmax.f32 %v1537_v29, %v1924_v19  ;;  %v4974_v29 = vld [vmem:[#allocation6_spill] sm:$0xff] }
 0x1f1   :  { %v4975_v59 = vmax.f32 %v4973_v28, %v4974_v29  ;;  %v4989_v28 = vld [vmem:[#allocation16_spill] sm:$0xff] }
 0x1f2   :  { %v2170_v31 = vmax.f32 %v2121_v51, 0.0  ;;  %v2122_v32 = vadd.f32 %v4445_v23, %v2066_v1 }
 0x1f3   :  { %v1400_v60 = vpop.f32.mrb[140].mxu0  ;;  %v1929_v11 = vpop.f32.mrb[140].mxu1 }
 0x1f4   :  { %v2868_v52 = vpack.c.bf16 %v2170_v31, %v2170_v31  ;;  %v2171_v53 = vmax.f32 %v2122_v32, 0.0  ;;  %v1538_v50 = vmax.f32 %v4965_v49, %v1400_v60  ;;  %v3251_v61 = vpop.f32.mrb[141].mxu0  ;;  %v3353_v20 = vpop.f32.mrb[141].mxu1 }
 0x1f5   :  { %v1403_v16 = vpop.f32.mrb[142].mxu0  ;;  %v1932_v17 = vpop.f32.mrb[142].mxu1  ;;  %v4976_v61 = vld [vmem:[#allocation7_spill] sm:$0xff]  ;;  %v4977_v20 = vld [vmem:[#allocation8_spill] sm:$0xff] }
 0x1f6   :  { %2417 = vst.msk [vmem:[%s4839_s3 + $0x48] sm:$0xf] %vm2398_vm4, %v2868_v52  ;;  %v2869_v63 = vpack.c.bf16 %v2171_v53, %v2171_v53  ;;  %v2067_v62 = vmax.f32 %v1538_v50, %v1929_v11  ;;  %v1539_v43 = vmax.f32 %v4966_v39, %v1403_v16  ;;  %v3252_v33 = vpop.f32.mrb[143].mxu0  ;;  %v3354_v34 = vpop.f32.mrb[143].mxu1  ;;  %v4978_v16 = vmax.f32 %v4976_v61, %v4977_v20 }
 0x1f8   :  { %2418 = vst.msk [vmem:[%s4839_s3 + $0x4c] sm:$0xf] %vm2398_vm4, %v2869_v63  ;;  %v2123_v24 = vadd.f32 %v4445_v23, %v2067_v62  ;;  %v2068_v25 = vmax.f32 %v1539_v43, %v1932_v17 }
 0x1fa   :  { %v2172_v35 = vmax.f32 %v2123_v24, 0.0  ;;  %v2124_v36 = vadd.f32 %v4445_v23, %v2068_v25  ;;  %v4979_v24 = vld [vmem:[#allocation9_spill] sm:$0xff]  ;;  %v4980_v25 = vld [vmem:[#allocation10_spill] sm:$0xff] }
 0x1fb   :  { %v1408_v57 = vpop.f32.mrb[144].mxu0  ;;  %v1937_v58 = vpop.f32.mrb[144].mxu1 }
 0x1fc   :  { %v2870_v55 = vpack.c.bf16 %v2172_v35, %v2172_v35  ;;  %v2173_v56 = vmax.f32 %v2124_v36, 0.0  ;;  %v1540_v27 = vmax.f32 %v4967_v44, %v1408_v57  ;;  %v3255_v42 = vpop.f32.mrb[145].mxu0  ;;  %v3357_v4 = vpop.f32.mrb[145].mxu1  ;;  %v4981_v35 = vmax.f32 %v4979_v24, %v4980_v25  ;;  %v4995_v24 = vld [vmem:[#allocation20_spill] sm:$0xff] }
 0x1fd   :  { %v1411_v5 = vpop.f32.mrb[146].mxu0  ;;  %v1940_v30 = vpop.f32.mrb[146].mxu1 }
 0x1fe   :  { %2419 = vst.msk [vmem:[%s4839_s3 + $0x50] sm:$0xf] %vm2398_vm4, %v2870_v55  ;;  %v2871_v40 = vpack.c.bf16 %v2173_v56, %v2173_v56  ;;  %v2069_v41 = vmax.f32 %v1540_v27, %v1937_v58  ;;  %v1541_v0 = vmax.f32 %v4969_v8, %v1411_v5  ;;  %v3256_v18 = vpop.f32.mrb[147].mxu0  ;;  %v3358_v3 = vpop.f32.mrb[147].mxu1 }
 0x200   :  { %2420 = vst.msk [vmem:[%s4839_s3 + $0x54] sm:$0xf] %vm2398_vm4, %v2871_v40  ;;  %v2125_v48 = vadd.f32 %v4445_v23, %v2069_v41  ;;  %v2070_v14 = vmax.f32 %v1541_v0, %v1940_v30  ;;  %v4982_v40 = vld [vmem:[#allocation11_spill] sm:$0xff]  ;;  %v4983_v41 = vld [vmem:[#allocation12_spill] sm:$0xff] }
 0x201   :  { %v4984_v7 = vmax.f32 %v4982_v40, %v4983_v41 }
 0x202   :  { %v2174_v13 = vmax.f32 %v2125_v48, 0.0  ;;  %v2126_v21 = vadd.f32 %v4445_v23, %v2070_v14 }
 0x203   :  { %v1416_v22 = vpop.f32.mrb[148].mxu0  ;;  %v1945_v47 = vpop.f32.mrb[148].mxu1 }
 0x204   :  { %v2872_v2 = vpack.c.bf16 %v2174_v13, %v2174_v13  ;;  %v2175_v12 = vmax.f32 %v2126_v21, 0.0  ;;  %v1542_v38 = vmax.f32 %v4972_v37, %v1416_v22  ;;  %v3259_v9 = vpop.f32.mrb[149].mxu0  ;;  %v3361_v10 = vpop.f32.mrb[149].mxu1  ;;  %v4985_v21 = vld [vmem:[#allocation13_spill] sm:$0xff]  ;;  %v4986_v22 = vld [vmem:[#allocation14_spill] sm:$0xff] }
 0x205   :  { %v1419_v15 = vpop.f32.mrb[150].mxu0  ;;  %v1948_v19 = vpop.f32.mrb[150].mxu1 }
 0x206   :  { %2421 = vst.msk [vmem:[%s4839_s3 + $0x58] sm:$0xf] %vm2398_vm4, %v2872_v2  ;;  %v2873_v45 = vpack.c.bf16 %v2175_v12, %v2175_v12  ;;  %v2071_v46 = vmax.f32 %v1542_v38, %v1945_v47  ;;  %v1543_v6 = vmax.f32 %v4975_v59, %v1419_v15  ;;  %v3260_v51 = vpop.f32.mrb[151].mxu0  ;;  %v3362_v1 = vpop.f32.mrb[151].mxu1  ;;  %v4987_v47 = vmax.f32 %v4985_v21, %v4986_v22  ;;  %v5001_v21 = vld [vmem:[#allocation24_spill] sm:$0xff] }
 0x208   :  { %2422 = vst.msk [vmem:[%s4839_s3 + $0x5c] sm:$0xf] %vm2398_vm4, %v2873_v45  ;;  %v2127_v31 = vadd.f32 %v4445_v23, %v2071_v46  ;;  %v2072_v32 = vmax.f32 %v1543_v6, %v1948_v19  ;;  %v4988_v46 = vld [vmem:[#allocation15_spill] sm:$0xff] }
 0x209   :  { %v4990_v29 = vmax.f32 %v4988_v46, %v4989_v28 }
 0x20a   :  { %v2176_v60 = vmax.f32 %v2127_v31, 0.0  ;;  %v2128_v11 = vadd.f32 %v4445_v23, %v2072_v32 }
 0x20b   :  { %v1424_v52 = vpop.f32.mrb[152].mxu0  ;;  %v1953_v53 = vpop.f32.mrb[152].mxu1 }
 0x20c   :  { %v2874_v49 = vpack.c.bf16 %v2176_v60, %v2176_v60  ;;  %v2177_v50 = vmax.f32 %v2128_v11, 0.0  ;;  %v1544_v17 = vmax.f32 %v4978_v16, %v1424_v52  ;;  %v3263_v63 = vpop.f32.mrb[153].mxu0  ;;  %v3365_v62 = vpop.f32.mrb[153].mxu1  ;;  %v4991_v11 = vld [vmem:[#allocation17_spill] sm:$0xff]  ;;  %v4992_v52 = vld [vmem:[#allocation18_spill] sm:$0xff] }
 0x20d   :  { %v1427_v39 = vpop.f32.mrb[154].mxu0  ;;  %v1956_v43 = vpop.f32.mrb[154].mxu1 }
 0x20e   :  { %2423 = vst.msk [vmem:[%s4839_s3 + $0x60] sm:$0xf] %vm2398_vm4, %v2874_v49  ;;  %v2875_v33 = vpack.c.bf16 %v2177_v50, %v2177_v50  ;;  %v2073_v34 = vmax.f32 %v1544_v17, %v1953_v53  ;;  %v1545_v36 = vmax.f32 %v4981_v35, %v1427_v39  ;;  %v3264_v57 = vpop.f32.mrb[155].mxu0  ;;  %v3366_v58 = vpop.f32.mrb[155].mxu1  ;;  %v4993_v53 = vmax.f32 %v4991_v11, %v4992_v52  ;;  %v5007_v11 = vld [vmem:[#allocation28_spill] sm:$0xff] }
 0x210   :  { %2424 = vst.msk [vmem:[%s4839_s3 + $0x64] sm:$0xf] %vm2398_vm4, %v2875_v33  ;;  %v2129_v55 = vadd.f32 %v4445_v23, %v2073_v34  ;;  %v2074_v56 = vmax.f32 %v1545_v36, %v1956_v43  ;;  %v4994_v34 = vld [vmem:[#allocation19_spill] sm:$0xff] }
 0x211   :  { %v4996_v25 = vmax.f32 %v4994_v34, %v4995_v24 }
 0x212   :  { %v2178_v44 = vmax.f32 %v2129_v55, 0.0  ;;  %v2130_v27 = vadd.f32 %v4445_v23, %v2074_v56 }
 0x213   :  { %v1432_v42 = vpop.f32.mrb[156].mxu0  ;;  %v1961_v4 = vpop.f32.mrb[156].mxu1 }
 0x214   :  { %v2876_v5 = vpack.c.bf16 %v2178_v44, %v2178_v44  ;;  %v2179_v30 = vmax.f32 %v2130_v27, 0.0  ;;  %v1546_v8 = vmax.f32 %v4984_v7, %v1432_v42  ;;  %v3267_v0 = vpop.f32.mrb[157].mxu0  ;;  %v3369_v18 = vpop.f32.mrb[157].mxu1  ;;  %v4997_v27 = vld [vmem:[#allocation21_spill] sm:$0xff]  ;;  %v4998_v42 = vld [vmem:[#allocation22_spill] sm:$0xff] }
 0x215   :  { %v1435_v3 = vpop.f32.mrb[158].mxu0  ;;  %v1964_v48 = vpop.f32.mrb[158].mxu1 }
 0x216   :  { %2425 = vst.msk [vmem:[%s4839_s3 + $0x68] sm:$0xf] %vm2398_vm4, %v2876_v5  ;;  %v2877_v14 = vpack.c.bf16 %v2179_v30, %v2179_v30  ;;  %v2075_v13 = vmax.f32 %v1546_v8, %v1961_v4  ;;  %v1547_v2 = vmax.f32 %v4987_v47, %v1435_v3  ;;  %v3268_v12 = vpop.f32.mrb[159].mxu0  ;;  %v3370_v54 = vpop.f32.mrb[159].mxu1  ;;  %v4999_v4 = vmax.f32 %v4997_v27, %v4998_v42  ;;  %v5013_v27 = vld [vmem:[#allocation32_spill] sm:$0xff] }
 0x218   :  { %2426 = vst.msk [vmem:[%s4839_s3 + $0x6c] sm:$0xf] %vm2398_vm4, %v2877_v14  ;;  %v2131_v26 = vadd.f32 %v4445_v23, %v2075_v13  ;;  %v2076_v37 = vmax.f32 %v1547_v2, %v1964_v48  ;;  %v5000_v13 = vld [vmem:[#allocation23_spill] sm:$0xff] }
 0x219   :  { %v5002_v22 = vmax.f32 %v5000_v13, %v5001_v21 }
 0x21a   :  { %v2180_v38 = vmax.f32 %v2131_v26, 0.0  ;;  %v2132_v9 = vadd.f32 %v4445_v23, %v2076_v37 }
 0x21b   :  { %v1440_v10 = vpop.f32.mrb[160].mxu0  ;;  %v1969_v15 = vpop.f32.mrb[160].mxu1 }
 0x21c   :  { %v2878_v19 = vpack.c.bf16 %v2180_v38, %v2180_v38  ;;  %v2181_v45 = vmax.f32 %v2132_v9, 0.0  ;;  %v1548_v59 = vmax.f32 %v4990_v29, %v1440_v10  ;;  %v3271_v6 = vpop.f32.mrb[161].mxu0  ;;  %v3373_v51 = vpop.f32.mrb[161].mxu1  ;;  %v5003_v9 = vld [vmem:[#allocation25_spill] sm:$0xff]  ;;  %v5004_v10 = vld [vmem:[#allocation26_spill] sm:$0xff] }
 0x21d   :  { %v1443_v1 = vpop.f32.mrb[162].mxu0  ;;  %v1972_v31 = vpop.f32.mrb[162].mxu1 }
 0x21e   :  { %2427 = vst.msk [vmem:[%s4839_s3 + $0x70] sm:$0xf] %vm2398_vm4, %v2878_v19  ;;  %v2879_v32 = vpack.c.bf16 %v2181_v45, %v2181_v45  ;;  %v2077_v60 = vmax.f32 %v1548_v59, %v1969_v15  ;;  %v1549_v49 = vmax.f32 %v4993_v53, %v1443_v1  ;;  %v3272_v50 = vpop.f32.mrb[163].mxu0  ;;  %v3374_v61 = vpop.f32.mrb[163].mxu1  ;;  %v5005_v15 = vmax.f32 %v5003_v9, %v5004_v10  ;;  %v5019_v9 = vld [vmem:[#allocation36_spill] sm:$0xff] }
 0x220   :  { %2428 = vst.msk [vmem:[%s4839_s3 + $0x74] sm:$0xf] %vm2398_vm4, %v2879_v32  ;;  %v2133_v20 = vadd.f32 %v4445_v23, %v2077_v60  ;;  %v2078_v16 = vmax.f32 %v1549_v49, %v1972_v31  ;;  %v5006_v60 = vld [vmem:[#allocation27_spill] sm:$0xff] }
 0x221   :  { %v5008_v52 = vmax.f32 %v5006_v60, %v5007_v11 }
 0x222   :  { %v2182_v17 = vmax.f32 %v2133_v20, 0.0  ;;  %v2134_v63 = vadd.f32 %v4445_v23, %v2078_v16 }
 0x223   :  { %v1448_v62 = vpop.f32.mrb[164].mxu0  ;;  %v1977_v39 = vpop.f32.mrb[164].mxu1 }
 0x224   :  { %v2880_v43 = vpack.c.bf16 %v2182_v17, %v2182_v17  ;;  %v2183_v33 = vmax.f32 %v2134_v63, 0.0  ;;  %v1550_v35 = vmax.f32 %v4996_v25, %v1448_v62  ;;  %v3275_v36 = vpop.f32.mrb[165].mxu0  ;;  %v3377_v57 = vpop.f32.mrb[165].mxu1  ;;  %v5009_v63 = vld [vmem:[#allocation29_spill] sm:$0xff]  ;;  %v5010_v62 = vld [vmem:[#allocation30_spill] sm:$0xff] }
 0x225   :  { %v1451_v58 = vpop.f32.mrb[166].mxu0  ;;  %v1980_v55 = vpop.f32.mrb[166].mxu1 }
 0x226   :  { %2429 = vst.msk [vmem:[%s4839_s3 + $0x78] sm:$0xf] %vm2398_vm4, %v2880_v43  ;;  %v2881_v56 = vpack.c.bf16 %v2183_v33, %v2183_v33  ;;  %v2079_v44 = vmax.f32 %v1550_v35, %v1977_v39  ;;  %v1551_v5 = vmax.f32 %v4999_v4, %v1451_v58  ;;  %v3276_v30 = vpop.f32.mrb[167].mxu0  ;;  %v3378_v40 = vpop.f32.mrb[167].mxu1  ;;  %v5011_v39 = vmax.f32 %v5009_v63, %v5010_v62  ;;  %v5025_v63 = vld [vmem:[#allocation40_spill] sm:$0xff] }
 0x228   :  { %2430 = vst.msk [vmem:[%s4839_s3 + $0x7c] sm:$0xf] %vm2398_vm4, %v2881_v56  ;;  %v2135_v41 = vadd.f32 %v4445_v23, %v2079_v44  ;;  %v2080_v7 = vmax.f32 %v1551_v5, %v1980_v55  ;;  %v5012_v44 = vld [vmem:[#allocation31_spill] sm:$0xff] }
 0x229   :  { %v5014_v42 = vmax.f32 %v5012_v44, %v5013_v27 }
 0x22a   :  { %v2184_v8 = vmax.f32 %v2135_v41, 0.0  ;;  %v2136_v0 = vadd.f32 %v4445_v23, %v2080_v7 }
 0x22b   :  { %v1456_v18 = vpop.f32.mrb[168].mxu0  ;;  %v1985_v3 = vpop.f32.mrb[168].mxu1 }
 0x22c   :  { %v2882_v48 = vpack.c.bf16 %v2184_v8, %v2184_v8  ;;  %v2185_v14 = vmax.f32 %v2136_v0, 0.0  ;;  %v1552_v47 = vmax.f32 %v5002_v22, %v1456_v18  ;;  %v3279_v2 = vpop.f32.mrb[169].mxu0  ;;  %v3381_v12 = vpop.f32.mrb[169].mxu1  ;;  %v5015_v0 = vld [vmem:[#allocation33_spill] sm:$0xff]  ;;  %v5016_v18 = vld [vmem:[#allocation34_spill] sm:$0xff] }
 0x22d   :  { %v1459_v54 = vpop.f32.mrb[170].mxu0  ;;  %v1988_v26 = vpop.f32.mrb[170].mxu1 }
 0x22e   :  { %2431 = vst.msk [vmem:[%s4839_s3 + $0x80] sm:$0xf] %vm2398_vm4, %v2882_v48  ;;  %v2883_v37 = vpack.c.bf16 %v2185_v14, %v2185_v14  ;;  %v2081_v38 = vmax.f32 %v1552_v47, %v1985_v3  ;;  %v1553_v19 = vmax.f32 %v5005_v15, %v1459_v54  ;;  %v3280_v45 = vpop.f32.mrb[171].mxu0  ;;  %v3382_v46 = vpop.f32.mrb[171].mxu1  ;;  %v5017_v3 = vmax.f32 %v5015_v0, %v5016_v18  ;;  %v5031_v0 = vld [vmem:[#allocation44_spill] sm:$0xff] }
 0x230   :  { %2432 = vst.msk [vmem:[%s4839_s3 + $0x84] sm:$0xf] %vm2398_vm4, %v2883_v37  ;;  %v2137_v28 = vadd.f32 %v4445_v23, %v2081_v38  ;;  %v2082_v29 = vmax.f32 %v1553_v19, %v1988_v26  ;;  %v5018_v38 = vld [vmem:[#allocation35_spill] sm:$0xff] }
 0x231   :  { %v5020_v10 = vmax.f32 %v5018_v38, %v5019_v9 }
 0x232   :  { %v2186_v59 = vmax.f32 %v2137_v28, 0.0  ;;  %v2138_v6 = vadd.f32 %v4445_v23, %v2082_v29 }
 0x233   :  { %v1464_v51 = vpop.f32.mrb[172].mxu0  ;;  %v1993_v1 = vpop.f32.mrb[172].mxu1 }
 0x234   :  { %v2884_v31 = vpack.c.bf16 %v2186_v59, %v2186_v59  ;;  %v2187_v32 = vmax.f32 %v2138_v6, 0.0  ;;  %v1554_v53 = vmax.f32 %v5008_v52, %v1464_v51  ;;  %v3283_v49 = vpop.f32.mrb[173].mxu0  ;;  %v3385_v50 = vpop.f32.mrb[173].mxu1  ;;  %v5021_v6 = vld [vmem:[#allocation37_spill] sm:$0xff]  ;;  %v5022_v51 = vld [vmem:[#allocation38_spill] sm:$0xff] }
 0x235   :  { %v1467_v61 = vpop.f32.mrb[174].mxu0  ;;  %v1996_v20 = vpop.f32.mrb[174].mxu1 }
 0x236   :  { %2433 = vst.msk [vmem:[%s4839_s3 + $0x88] sm:$0xf] %vm2398_vm4, %v2884_v31  ;;  %v2885_v16 = vpack.c.bf16 %v2187_v32, %v2187_v32  ;;  %v2083_v17 = vmax.f32 %v1554_v53, %v1993_v1  ;;  %v1555_v43 = vmax.f32 %v5011_v39, %v1467_v61  ;;  %v3284_v33 = vpop.f32.mrb[175].mxu0  ;;  %v3386_v34 = vpop.f32.mrb[175].mxu1  ;;  %v5023_v1 = vmax.f32 %v5021_v6, %v5022_v51  ;;  %v5037_v6 = vld [vmem:[#allocation48_spill] sm:$0xff] }
 0x238   :  { %2434 = vst.msk [vmem:[%s4839_s3 + $0x8c] sm:$0xf] %vm2398_vm4, %v2885_v16  ;;  %v2139_v24 = vadd.f32 %v4445_v23, %v2083_v17  ;;  %v2084_v25 = vmax.f32 %v1555_v43, %v1996_v20  ;;  %v5024_v17 = vld [vmem:[#allocation39_spill] sm:$0xff] }
 0x239   :  { %v5026_v62 = vmax.f32 %v5024_v17, %v5025_v63 }
 0x23a   :  { %v2188_v35 = vmax.f32 %v2139_v24, 0.0  ;;  %v2140_v36 = vadd.f32 %v4445_v23, %v2084_v25 }
 0x23b   :  { %v1472_v57 = vpop.f32.mrb[176].mxu0  ;;  %v2001_v58 = vpop.f32.mrb[176].mxu1 }
 0x23c   :  { %v2886_v55 = vpack.c.bf16 %v2188_v35, %v2188_v35  ;;  %v2189_v56 = vmax.f32 %v2140_v36, 0.0  ;;  %v1556_v4 = vmax.f32 %v5014_v42, %v1472_v57  ;;  %v3287_v5 = vpop.f32.mrb[177].mxu0  ;;  %v3389_v30 = vpop.f32.mrb[177].mxu1  ;;  %v5027_v36 = vld [vmem:[#allocation41_spill] sm:$0xff]  ;;  %v5028_v57 = vld [vmem:[#allocation42_spill] sm:$0xff] }
 0x23d   :  { %v1475_v40 = vpop.f32.mrb[178].mxu0  ;;  %v2004_v41 = vpop.f32.mrb[178].mxu1 }
 0x23e   :  { %2435 = vst.msk [vmem:[%s4839_s3 + $0x90] sm:$0xf] %vm2398_vm4, %v2886_v55  ;;  %v2887_v7 = vpack.c.bf16 %v2189_v56, %v2189_v56  ;;  %v2085_v8 = vmax.f32 %v1556_v4, %v2001_v58  ;;  %v1557_v48 = vmax.f32 %v5017_v3, %v1475_v40  ;;  %v3288_v14 = vpop.f32.mrb[179].mxu0  ;;  %v3390_v13 = vpop.f32.mrb[179].mxu1  ;;  %v5029_v58 = vmax.f32 %v5027_v36, %v5028_v57  ;;  %v5043_v36 = vld [vmem:[#allocation52_spill] sm:$0xff] }
 0x240   :  { %2436 = vst.msk [vmem:[%s4839_s3 + $0x94] sm:$0xf] %vm2398_vm4, %v2887_v7  ;;  %v2141_v21 = vadd.f32 %v4445_v23, %v2085_v8  ;;  %v2086_v22 = vmax.f32 %v1557_v48, %v2004_v41  ;;  %v5030_v8 = vld [vmem:[#allocation43_spill] sm:$0xff] }
 0x241   :  { %v5032_v18 = vmax.f32 %v5030_v8, %v5031_v0 }
 0x242   :  { %v2190_v47 = vmax.f32 %v2141_v21, 0.0  ;;  %v2142_v2 = vadd.f32 %v4445_v23, %v2086_v22 }
 0x243   :  { %v1480_v12 = vpop.f32.mrb[180].mxu0  ;;  %v2009_v54 = vpop.f32.mrb[180].mxu1 }
 0x244   :  { %v2888_v26 = vpack.c.bf16 %v2190_v47, %v2190_v47  ;;  %v2191_v37 = vmax.f32 %v2142_v2, 0.0  ;;  %v1558_v15 = vmax.f32 %v5020_v10, %v1480_v12  ;;  %v3291_v19 = vpop.f32.mrb[181].mxu0  ;;  %v3393_v45 = vpop.f32.mrb[181].mxu1  ;;  %v5033_v2 = vld [vmem:[#allocation45_spill] sm:$0xff]  ;;  %v5034_v12 = vld [vmem:[#allocation46_spill] sm:$0xff] }
 0x245   :  { %v1483_v46 = vpop.f32.mrb[182].mxu0  ;;  %v2012_v28 = vpop.f32.mrb[182].mxu1 }
 0x246   :  { %2437 = vst.msk [vmem:[%s4839_s3 + $0x98] sm:$0xf] %vm2398_vm4, %v2888_v26  ;;  %v2889_v29 = vpack.c.bf16 %v2191_v37, %v2191_v37  ;;  %v2087_v59 = vmax.f32 %v1558_v15, %v2009_v54  ;;  %v1559_v31 = vmax.f32 %v5023_v1, %v1483_v46  ;;  %v3292_v32 = vpop.f32.mrb[183].mxu0  ;;  %v3394_v60 = vpop.f32.mrb[183].mxu1  ;;  %v5035_v54 = vmax.f32 %v5033_v2, %v5034_v12 }
 0x248   :  { %2438 = vst.msk [vmem:[%s4839_s3 + $0x9c] sm:$0xf] %vm2398_vm4, %v2889_v29  ;;  %v2143_v11 = vadd.f32 %v4445_v23, %v2087_v59  ;;  %v2088_v52 = vmax.f32 %v1559_v31, %v2012_v28  ;;  %v5036_v59 = vld [vmem:[#allocation47_spill] sm:$0xff] }
 0x249   :  { %v5038_v51 = vmax.f32 %v5036_v59, %v5037_v6 }
 0x24a   :  { %v2192_v53 = vmax.f32 %v2143_v11, 0.0  ;;  %v2144_v49 = vadd.f32 %v4445_v23, %v2088_v52 }
 0x24b   :  { %v1488_v50 = vpop.f32.mrb[184].mxu0  ;;  %v2017_v61 = vpop.f32.mrb[184].mxu1 }
 0x24c   :  { %v2890_v20 = vpack.c.bf16 %v2192_v53, %v2192_v53  ;;  %v2193_v16 = vmax.f32 %v2144_v49, 0.0  ;;  %v1560_v39 = vmax.f32 %v5026_v62, %v1488_v50  ;;  %v3295_v43 = vpop.f32.mrb[185].mxu0  ;;  %v3397_v33 = vpop.f32.mrb[185].mxu1  ;;  %v5039_v49 = vld [vmem:[#allocation49_spill] sm:$0xff]  ;;  %v5040_v50 = vld [vmem:[#allocation50_spill] sm:$0xff] }
 0x24d   :  { %v1491_v34 = vpop.f32.mrb[186].mxu0  ;;  %v2020_v24 = vpop.f32.mrb[186].mxu1 }
 0x24e   :  { %2439 = vst.msk [vmem:[%s4839_s3 + $0xa0] sm:$0xf] %vm2398_vm4, %v2890_v20  ;;  %v2891_v25 = vpack.c.bf16 %v2193_v16, %v2193_v16  ;;  %v2089_v35 = vmax.f32 %v1560_v39, %v2017_v61  ;;  %v1561_v55 = vmax.f32 %v5029_v58, %v1491_v34  ;;  %v3296_v56 = vpop.f32.mrb[187].mxu0  ;;  %v3398_v44 = vpop.f32.mrb[187].mxu1  ;;  %v5041_v61 = vmax.f32 %v5039_v49, %v5040_v50 }
 0x250   :  { %2440 = vst.msk [vmem:[%s4839_s3 + $0xa4] sm:$0xf] %vm2398_vm4, %v2891_v25  ;;  %v2145_v27 = vadd.f32 %v4445_v23, %v2089_v35  ;;  %v2090_v42 = vmax.f32 %v1561_v55, %v2020_v24  ;;  %v5042_v35 = vld [vmem:[#allocation51_spill] sm:$0xff] }
 0x251   :  { %v5044_v57 = vmax.f32 %v5042_v35, %v5043_v36 }
 0x252   :  { %v2194_v4 = vmax.f32 %v2145_v27, 0.0  ;;  %v2146_v5 = vadd.f32 %v4445_v23, %v2090_v42 }
 0x253   :  { %v1496_v30 = vpop.f32.mrb[188].mxu0  ;;  %v2025_v40 = vpop.f32.mrb[188].mxu1 }
 0x254   :  { %v2892_v41 = vpack.c.bf16 %v2194_v4, %v2194_v4  ;;  %v2195_v7 = vmax.f32 %v2146_v5, 0.0  ;;  %v1562_v3 = vmax.f32 %v5032_v18, %v1496_v30  ;;  %v3299_v48 = vpop.f32.mrb[189].mxu0  ;;  %v3401_v14 = vpop.f32.mrb[189].mxu1 }
 0x255   :  { %v1499_v13 = vpop.f32.mrb[190].mxu0  ;;  %v2028_v21 = vpop.f32.mrb[190].mxu1 }
 0x256   :  { %2441 = vst.msk [vmem:[%s4839_s3 + $0xa8] sm:$0xf] %vm2398_vm4, %v2892_v41  ;;  %v2893_v22 = vpack.c.bf16 %v2195_v7, %v2195_v7  ;;  %v2091_v47 = vmax.f32 %v1562_v3, %v2025_v40  ;;  %v1563_v26 = vmax.f32 %v5035_v54, %v1499_v13  ;;  %v3300_v37 = vpop.f32.mrb[191].mxu0  ;;  %v3402_v38 = vpop.f32.mrb[191].mxu1 }
 0x258   :  { %2442 = vst.msk [vmem:[%s4839_s3 + $0xac] sm:$0xf] %vm2398_vm4, %v2893_v22  ;;  %v2147_v9 = vadd.f32 %v4445_v23, %v2091_v47  ;;  %v2092_v10 = vmax.f32 %v1563_v26, %v2028_v21 }
 0x25a   :  { %v2196_v15 = vmax.f32 %v2147_v9, 0.0  ;;  %v2148_v19 = vadd.f32 %v4445_v23, %v2092_v10 }
 0x25b   :  { %v1504_v45 = vpop.f32.mrb[192].mxu0  ;;  %v2033_v46 = vpop.f32.mrb[192].mxu1 }
 0x25c   :  { %v2894_v28 = vpack.c.bf16 %v2196_v15, %v2196_v15  ;;  %v2197_v29 = vmax.f32 %v2148_v19, 0.0  ;;  %v1564_v1 = vmax.f32 %v5038_v51, %v1504_v45  ;;  %v3303_v31 = vpop.f32.mrb[193].mxu0  ;;  %v3405_v32 = vpop.f32.mrb[193].mxu1 }
 0x25d   :  { %v1507_v60 = vpop.f32.mrb[194].mxu0  ;;  %v2036_v11 = vpop.f32.mrb[194].mxu1 }
 0x25e   :  { %2443 = vst.msk [vmem:[%s4839_s3 + $0xb0] sm:$0xf] %vm2398_vm4, %v2894_v28  ;;  %v2895_v52 = vpack.c.bf16 %v2197_v29, %v2197_v29  ;;  %v2093_v53 = vmax.f32 %v1564_v1, %v2033_v46  ;;  %v1565_v20 = vmax.f32 %v5041_v61, %v1507_v60  ;;  %v3304_v16 = vpop.f32.mrb[195].mxu0  ;;  %v3406_v17 = vpop.f32.mrb[195].mxu1 }
 0x260   :  { %2444 = vst.msk [vmem:[%s4839_s3 + $0xb4] sm:$0xf] %vm2398_vm4, %v2895_v52  ;;  %v2149_v63 = vadd.f32 %v4445_v23, %v2093_v53  ;;  %v2094_v62 = vmax.f32 %v1565_v20, %v2036_v11 }
 0x262   :  { %v2198_v39 = vmax.f32 %v2149_v63, 0.0  ;;  %v2150_v43 = vadd.f32 %v4445_v23, %v2094_v62 }
 0x263   :  { %v1512_v33 = vpop.f32.mrb[196].mxu0  ;;  %v2041_v34 = vpop.f32.mrb[196].mxu1 }
 0x264   :  { %v2896_v24 = vpack.c.bf16 %v2198_v39, %v2198_v39  ;;  %v2199_v25 = vmax.f32 %v2150_v43, 0.0  ;;  %v1566_v58 = vmax.f32 %v5044_v57, %v1512_v33  ;;  %v3307_v55 = vpop.f32.mrb[197].mxu0  ;;  %v3409_v56 = vpop.f32.mrb[197].mxu1 }
 0x265   :  { %v1515_v44 = vpop.f32.mrb[198].mxu0  ;;  %v2044_v27 = vpop.f32.mrb[198].mxu1 }
 0x266   :  { %2445 = vst.msk [vmem:[%s4839_s3 + $0xb8] sm:$0xf] %vm2398_vm4, %v2896_v24  ;;  %v2897_v42 = vpack.c.bf16 %v2199_v25, %v2199_v25  ;;  %v2095_v4 = vmax.f32 %v1566_v58, %v2041_v34  ;;  %v3308_v5 = vpop.f32.mrb[199].mxu0  ;;  %v3410_v30 = vpop.f32.mrb[199].mxu1 }
 0x268   :  { %2446 = vst.msk [vmem:[%s4839_s3 + $0xbc] sm:$0xf] %vm2398_vm4, %v2897_v42  ;;  %v2151_v40 = vadd.f32 %v4445_v23, %v2095_v4 }
 0x26a   :  { %v2200_v41 = vmax.f32 %v2151_v40, 0.0 }
 0x26c   :  { %v2898_v7 = vpack.c.bf16 %v2200_v41, %v2200_v41 }
 0x26e   :  { %2447 = vst.msk [vmem:[%s4839_s3 + $0xc0] sm:$0xf] %vm2398_vm4, %v2898_v7 }

// kernel: joint_embedding_forward.5
= control target key start
LH: loop header
LB: loop body
LE: loop exit
PB: predicated region body
PF: predicated region fallthrough
CT: control target
= control target key end

     0   :  { %v2362_v0 = vmov 0.0   ;;  %vm2363_vm0 = vmmov 0   ;;  %vm285_vm1 = vcmask 261120   ;;  %vm1580_vm2 = vcmask 519168   ;;  %s3125_s1 = inlined_call_operand.vmem [shape: bf16[288,64], index: 1, kind: input, shape index: {}]   ;;  %s3126_s0 = inlined_call_operand.vmem [shape: bf16[4,98,288], index: 0, kind: input, shape index: {}]   ;;  %s3127_s2 = inlined_call_operand.vmem [shape: f32[1,64], index: 2, kind: input, shape index: {}]   ;;  %s3128_s3 = inlined_call_operand.vmem [shape: bf16[98,64], index: 3, kind: output, shape index: {}]  }
   0x1   :  { %2102 = vmatprep.subr.bf16.mxu1 %v2362_v0  ;;  %v2388_v1 = vld [vmem:[%s3125_s1 + $0x40] sm:$0xff]   ;;  %2106 = vmatprep.mubr.msk.bf16.mxu1 %vm2363_vm0, %v2362_v0  ;;  %v2407_v4 = vld [vmem:[%s3125_s1 + $0x48] sm:$0xff]   ;;  %v2429_v8 = vld [vmem:[%s3125_s1 + $0x50] sm:$0xff]   ;;  %vm1593_vm3 = vcmask 516096  }
   0x2   :  { %v2395_v2 = vld [vmem:[%s3125_s1 + $0x80] sm:$0xff]   ;;  %1834 = vmatprep.subr.bf16.mxu0 %v2388_v1  ;;  %v2414_v5 = vld [vmem:[%s3125_s1 + $0x88] sm:$0xff]   ;;  %v2435_v9 = vld [vmem:[%s3125_s1 + $0x10] sm:$0xff]  }
   0x3   :  { %v2401_v3 = vld [vmem:[%s3125_s1] sm:$0xff]   ;;  %2103 = vmatpush3.bf16.msra.mxu1 %v2395_v2  ;;  %v2420_v6 = vld [vmem:[%s3125_s1 + $0x8] sm:$0xff]   ;;  %v2442_v10 = vld [vmem:[%s3125_s1 + $0x58] sm:$0xff]  }
   0x4   :  { %1835 = vmatpush3.bf16.msra.mxu0 %v2401_v3  ;;  %2104 = vmatprep.subr.bf16.mxu1 %v2362_v0  ;;  %v2242_v7 = vld [vmem:[%s3126_s0 + $0x8] ss:$12 sps:$4 sm:$0xff]   ;;  %v2452_v11 = vld [vmem:[%s3125_s1 + $0x18] sm:$0xff]   ;;  %v2459_v12 = vld [vmem:[%s3125_s1 + $0x60] sm:$0xff]  }
   0x5   :  { %1836 = vmatprep.subr.bf16.mxu0 %v2407_v4  ;;  %v2247_v13 = vld [vmem:[%s3126_s0 + $0x20] ss:$12 sps:$4 sm:$0xff]   ;;  %v2252_v17 = vld [vmem:[%s3126_s0 + $0x38] ss:$12 sps:$4 sm:$0xff]   ;;  %v2496_v18 = vld [vmem:[%s3125_s1 + $0x70] sm:$0xff]  }
   0x6   :  { %v2469_v14 = vld [vmem:[%s3125_s1 + $0x20] sm:$0xff]   ;;  %v2476_v15 = vld [vmem:[%s3125_s1 + $0x68] sm:$0xff]   ;;  %v2506_v20 = vld [vmem:[%s3125_s1 + $0x30] sm:$0xff]  }
   0x7   :  { %2105 = vmatpush3.bf16.msra.mxu1 %v2414_v5  ;;  %v2482_v16 = vld [vmem:[%s3125_s1 + $0x28] sm:$0xff]   ;;  %v2259_v19 = vld [vmem:[%s3126_s0 + $0x4] ss:$12 sps:$4 sm:$0xff]   ;;  %v2512_v21 = vld [vmem:[%s3125_s1 + $0x78] sm:$0xff]  }
   0x8   :  { %1837 = vmatpush3.bf16.msra.mxu0 %v2420_v6  ;;  %1901 = vmatprep.subr.bf16.mxu1 %v2388_v1  ;;  %v2523_v22 = vld [vmem:[%s3125_s1 + $0x38] sm:$0xff]   ;;  %v2257_v24 = vld [vmem:[%s3126_s0] ss:$12 sps:$4 sm:$0xff]   ;;  %v2263_v26 = vld [vmem:[%s3126_s0 + $0x68] ss:$12 sps:$4 sm:$0xff]  }
   0x9   :  { %1838 = vmatprep.subr.bf16.mxu0 %v2429_v8  ;;  %339 = vmatprep.mubr.bf16.mxu0 %v2259_v19  ;;  %v2260_v23 = vld [vmem:[%s3126_s0 + $0x50] ss:$12 sps:$4 sm:$0xff]   ;;  %v2264_v27 = vld [vmem:[%s3126_s0 + $0x18] ss:$12 sps:$4 sm:$0xff]   ;;  %v2265_v28 = vld [vmem:[%s3126_s0 + $0x34] ss:$12 sps:$4 sm:$0xff]  }
   0xa   :  { %2107 = vmatmul.mubr.msk.bf16.vlgmr.msra.gmra.mrb[0].mxu1 %vm285_vm1, %v2242_v7  ;;  %v2261_v25 = vld [vmem:[%s3126_s0 + $0x1c] ss:$12 sps:$4 sm:$0xff]   ;;  %v2267_v29 = vld [vmem:[%s3126_s0 + $0x80] ss:$12 sps:$4 sm:$0xff]   ;;  %v2276_v35 = vld [vmem:[%s3126_s0 + $0x64] ss:$12 sps:$4 sm:$0xff]  }
   0xb   :  { %2110 = vmatprep.mubr.msk.bf16.mxu1 %vm2363_vm0, %v2362_v0  ;;  %1902 = vmatpush3.bf16.msra.mxu1 %v2401_v3  ;;  %v2268_v30 = vld [vmem:[%s3126_s0 + $0x30] ss:$12 sps:$4 sm:$0xff]   ;;  %v2269_v31 = vld [vmem:[%s3126_s0 + $0x4c] ss:$12 sps:$4 sm:$0xff]   ;;  %v2272_v33 = vld [vmem:[%s3126_s0 + $0x48] ss:$12 sps:$4 sm:$0xff]  }
   0xc   :  { %1839 = vmatpush3.bf16.msra.mxu0 %v2435_v9  ;;  %1903 = vmatprep.subr.bf16.mxu1 %v2407_v4  ;;  %v2271_v32 = vld [vmem:[%s3126_s0 + $0x98] ss:$0 sps:$4 sm:$0x11]   ;;  %v2275_v34 = vld [vmem:[%s3126_s0 + $0xa0] ss:$12 sps:$4 sm:$0xff]  }
   0xd   :  { %1840 = vmatprep.subr.bf16.mxu0 %v2442_v10  ;;  %v2273_v36 = vld [vmem:[%s3126_s0 + $0x9c] ss:$12 sps:$4 sm:$0xff]   ;;  %v2278_v37 = vld [vmem:[%s3126_s0 + $0x60] ss:$12 sps:$4 sm:$0xff]   ;;  %v2279_v38 = vld [vmem:[%s3126_s0 + $0xb8] ss:$12 sps:$4 sm:$0xff]  }
   0xe   :  { %v2281_v39 = vld [vmem:[%s3126_s0 + $0x7c] ss:$12 sps:$4 sm:$0xff]   ;;  %v2283_v40 = vld [vmem:[%s3126_s0 + $0xb4] ss:$12 sps:$4 sm:$0xff]   ;;  %v2284_v42 = vld [vmem:[%s3126_s0 + $0x78] ss:$12 sps:$4 sm:$0xff]  }
   0xf   :  { %1904 = vmatpush3.bf16.msra.mxu1 %v2420_v6  ;;  %v75_v41 = vld [vmem:[%s3126_s0 + $0x90] sm:$0x11]  ;;  %v2288_v45 = vld [vmem:[%s3126_s0 + $0xcc] ss:$12 sps:$4 sm:$0xff]   ;;  %v2296_v51 = vld [vmem:[%s3126_s0 + $0xfc] ss:$12 sps:$4 sm:$0xff]  }
  0x10   :  { %1841 = vmatpush3.bf16.msra.mxu0 %v2452_v11  ;;  %1905 = vmatprep.subr.bf16.mxu1 %v2429_v8  ;;  %v2285_v43 = vld [vmem:[%s3126_s0 + $0xd0] ss:$12 sps:$4 sm:$0xff]   ;;  %v1618_v44 = vcombine.high %v75_v41, %v75_v41  ;;  %v1617_v46 = vcombine.low %v75_v41, %v75_v41  ;;  %v2290_v47 = vld [vmem:[%s3126_s0 + $0xe8] ss:$12 sps:$4 sm:$0xff]   ;;  %v2294_v50 = vld [vmem:[%s3126_s0 + $0x100] ss:$12 sps:$4 sm:$0xff]  }
  0x11   :  { %1842 = vmatprep.subr.bf16.mxu0 %v2459_v12  ;;  %v2292_v48 = vld [vmem:[%s3126_s0 + $0xe4] ss:$12 sps:$4 sm:$0xff]   ;;  %v2297_v52 = vld [vmem:[%s3126_s0 + $0xbc] ss:$12 sps:$4 sm:$0xff]   ;;  %v2300_v55 = vld [vmem:[%s3126_s0 + $0x114] ss:$12 sps:$4 sm:$0xff]  }
  0x12   :  { %2111 = vmatmul.mubr.msk.bf16.gmra.mrb[4].mxu1 %vm285_vm1, %v2247_v13  ;;  %v2293_v49 = vld [vmem:[%s3126_s0 + $0xa4] ss:$12 sps:$4 sm:$0xff]   ;;  %v2301_v56 = vld [vmem:[%s3126_s0 + $0xd4] ss:$12 sps:$4 sm:$0xff]   ;;  %v2304_v59 = vld [vmem:[%s3126_s0 + $0xec] ss:$12 sps:$4 sm:$0xff]  }
  0x13   :  { %2114 = vmatprep.mubr.msk.bf16.mxu1 %vm2363_vm0, %v2362_v0  ;;  %1906 = vmatpush3.bf16.msra.mxu1 %v2435_v9  ;;  %v2298_v53 = vld [vmem:[%s3126_s0 + $0x118] ss:$12 sps:$4 sm:$0xff]   ;;  %v1669_v54 = vld [vmem:[%s3126_s0 + $0x12c] sm:$0x11]  ;;  %v2307_v60 = vld [vmem:[%s3126_s0 + $0x13c] ss:$12 sps:$4 sm:$0xff]  }
  0x14   :  { %1843 = vmatpush3.bf16.msra.mxu0 %v2469_v14  ;;  %1907 = vmatprep.subr.bf16.mxu1 %v2442_v10  ;;  %v1690_v57 = vcombine.high %v1669_v54, %v1669_v54  ;;  %v1689_v58 = vcombine.low %v1669_v54, %v1669_v54  ;;  %v2305_v61 = vld [vmem:[%s3126_s0 + $0x138] ss:$12 sps:$4 sm:$0xff]   ;;  %v2309_v63 = vld [vmem:[%s3126_s0 + $0x154] ss:$12 sps:$4 sm:$0xff]   ;;  %v2312_v7 = vld [vmem:[%s3126_s0 + $0x11c] ss:$12 sps:$4 sm:$0xff]  }
  0x15   :  { %1844 = vmatprep.subr.bf16.mxu0 %v2476_v15  ;;  %v2308_v62 = vld [vmem:[%s3126_s0 + $0x104] ss:$12 sps:$4 sm:$0xff]   ;;  %v2313_v13 = vld [vmem:[%s3126_s0 + $0x16c] ss:$12 sps:$4 sm:$0xff]  }
  0x17   :  { %1908 = vmatpush3.bf16.msra.mxu1 %v2452_v11 }
  0x18   :  { %1845 = vmatpush3.bf16.msra.mxu0 %v2482_v16  ;;  %1909 = vmatprep.subr.bf16.mxu1 %v2459_v12 }
  0x19   :  { %1846 = vmatprep.subr.bf16.mxu0 %v2496_v18 }
  0x1a   :  { %2115 = vmatmul.mubr.msk.bf16.gmra.mrb[8].mxu1 %vm285_vm1, %v2252_v17  ;;  %v2328_v17 = vld [vmem:[%s3126_s0 + $0x170] ss:$12 sps:$4 sm:$0xff]  }
  0x1b   :  { %2118 = vmatprep.mubr.msk.bf16.mxu1 %vm2363_vm0, %v2362_v0  ;;  %1910 = vmatpush3.bf16.msra.mxu1 %v2469_v14 }
  0x1c   :  { %1847 = vmatpush3.bf16.msra.mxu0 %v2506_v20  ;;  %1911 = vmatprep.subr.bf16.mxu1 %v2476_v15 }
  0x1d   :  { %1848 = vmatprep.subr.bf16.mxu0 %v2512_v21 }
  0x1f   :  { %1912 = vmatpush3.bf16.msra.mxu1 %v2482_v16 }
  0x20   :  { %1849 = vmatpush3.bf16.msra.mxu0 %v2523_v22  ;;  %1913 = vmatprep.subr.bf16.mxu1 %v2496_v18 }
  0x21   :  { %2134 = vmatprep.subr.bf16.mxu0 %v2362_v0 }
  0x22   :  { %2119 = vmatmul.mubr.msk.bf16.gmra.mrb[12].mxu1 %vm285_vm1, %v2260_v23  ;;  %v2335_v23 = vld [vmem:[%s3126_s0 + $0x1a0] ss:$12 sps:$4 sm:$0xff]  }
  0x23   :  { %340 = vmatmul.mubr.bf16.vlgmr.msra.gmra.mrb[0].mxu0 %v2257_v24  ;;  %2122 = vmatprep.mubr.msk.bf16.mxu1 %vm2363_vm0, %v2362_v0  ;;  %v2336_v24 = vld [vmem:[%s3126_s0 + $0x1f0] ss:$12 sps:$4 sm:$0xff]  }
  0x24   :  { %2135 = vmatpush3.bf16.msra.mxu0 %v2395_v2  ;;  %347 = vmatprep.mubr.bf16.mxu0 %v2261_v25  ;;  %v2338_v25 = vld [vmem:[%s3126_s0 + $0x1ec] ss:$12 sps:$4 sm:$0xff]  }
  0x25   :  { %1914 = vmatpush3.bf16.msra.mxu1 %v2506_v20  ;;  %2136 = vmatprep.subr.bf16.mxu0 %v2362_v0 }
  0x26   :  { %1915 = vmatprep.subr.bf16.mxu1 %v2512_v21 }
  0x28   :  { %2137 = vmatpush3.bf16.msra.mxu0 %v2414_v5 }
  0x29   :  { %1916 = vmatpush3.bf16.msra.mxu1 %v2523_v22  ;;  %2166 = vmatprep.subr.bf16.mxu0 %v2362_v0 }
  0x2a   :  { %2123 = vmatmul.mubr.msk.bf16.gmra.mrb[16].mxu1 %vm285_vm1, %v2263_v26  ;;  %1968 = vmatprep.subr.bf16.mxu1 %v2388_v1  ;;  %v2339_v26 = vld [vmem:[%s3126_s0 + $0x1b8] ss:$12 sps:$4 sm:$0xff]  }
  0x2b   :  { %348 = vmatmul.mubr.bf16.gmra.mrb[4].mxu0 %v2264_v27  ;;  %2126 = vmatprep.mubr.msk.bf16.mxu1 %vm2363_vm0, %v2362_v0  ;;  %v2340_v27 = vld [vmem:[%s3126_s0 + $0x208] ss:$12 sps:$4 sm:$0xff]  }
  0x2c   :  { %355 = vmatprep.mubr.bf16.mxu0 %v2265_v28  ;;  %v2343_v28 = vld [vmem:[%s3126_s0 + $0x1d0] ss:$0 sps:$4 sm:$0x11]  }
  0x32   :  { %2127 = vmatmul.mubr.msk.bf16.gmra.mrb[20].mxu1 %vm285_vm1, %v2267_v29  ;;  %v2344_v29 = vld [vmem:[%s3126_s0 + $0x220] ss:$12 sps:$4 sm:$0xff]  }
  0x33   :  { %356 = vmatmul.mubr.bf16.gmra.mrb[8].mxu0 %v2268_v30  ;;  %2130 = vmatprep.mubr.msk.bf16.mxu1 %vm2363_vm0, %v2362_v0  ;;  %v2347_v30 = vld [vmem:[%s3126_s0 + $0x1dc] ss:$12 sps:$4 sm:$0xff]  }
  0x34   :  { %363 = vmatprep.mubr.bf16.mxu0 %v2269_v31  ;;  %v2348_v31 = vld [vmem:[%s3126_s0 + $0x238] ss:$12 sps:$4 sm:$0xff]  }
  0x3a   :  { %2131 = vmatmul.mubr.msk.bf16.gmra.mrb[24].mxu1 %vm285_vm1, %v2271_v32  ;;  %v2350_v32 = vld [vmem:[%s3126_s0 + $0x234] ss:$12 sps:$4 sm:$0xff]  }
  0x3b   :  { %364 = vmatmul.mubr.bf16.gmra.mrb[12].mxu0 %v2272_v33  ;;  %663 = vmatprep.mubr.bf16.mxu1 %v2275_v34  ;;  %v2351_v33 = vld [vmem:[%s3126_s0 + $0x1f4] ss:$12 sps:$4 sm:$0xff]   ;;  %v2352_v34 = vld [vmem:[%s3126_s0 + $0x250] ss:$12 sps:$4 sm:$0xff]  }
  0x3c   :  { %371 = vmatprep.mubr.bf16.mxu0 %v2276_v35  ;;  %v1777_v35 = vld [vmem:[%s3126_s0 + $0x264] sm:$0x11] }
  0x42   :  { %664 = vmatmul.mubr.bf16.vlgmr.msra.gmra.mrb[28].mxu1 %v2273_v36  ;;  %v2354_v36 = vld [vmem:[%s3126_s0 + $0x24c] ss:$12 sps:$4 sm:$0xff]  }
  0x43   :  { %372 = vmatmul.mubr.bf16.gmra.mrb[16].mxu0 %v2278_v37  ;;  %671 = vmatprep.mubr.bf16.mxu1 %v2279_v38  ;;  %v2355_v37 = vld [vmem:[%s3126_s0 + $0x20c] ss:$12 sps:$4 sm:$0xff]   ;;  %v1798_v38 = vcombine.high %v1777_v35, %v1777_v35 }
  0x44   :  { %379 = vmatprep.mubr.bf16.mxu0 %v2281_v39  ;;  %1969 = vmatpush3.bf16.msra.mxu1 %v2401_v3 }
  0x45   :  { %1970 = vmatprep.subr.bf16.mxu1 %v2407_v4 }
  0x48   :  { %1971 = vmatpush3.bf16.msra.mxu1 %v2420_v6 }
  0x49   :  { %1972 = vmatprep.subr.bf16.mxu1 %v2429_v8 }
  0x4a   :  { %672 = vmatmul.mubr.bf16.gmra.mrb[32].mxu1 %v2283_v40  ;;  %v1797_v40 = vcombine.low %v1777_v35, %v1777_v35 }
  0x4b   :  { %380 = vmatmul.mubr.bf16.gmra.mrb[20].mxu0 %v2284_v42  ;;  %679 = vmatprep.mubr.bf16.mxu1 %v2285_v43  ;;  %v2358_v42 = vld [vmem:[%s3126_s0 + $0x224] ss:$12 sps:$4 sm:$0xff]  }
  0x4c   :  { %387 = vmatprep.mubr.bf16.mxu0 %v1618_v44  ;;  %1973 = vmatpush3.bf16.msra.mxu1 %v2435_v9 }
  0x4d   :  { %1974 = vmatprep.subr.bf16.mxu1 %v2442_v10 }
  0x50   :  { %1975 = vmatpush3.bf16.msra.mxu1 %v2452_v11 }
  0x51   :  { %1976 = vmatprep.subr.bf16.mxu1 %v2459_v12 }
  0x52   :  { %680 = vmatmul.mubr.bf16.gmra.mrb[36].mxu1 %v2288_v45 }
  0x53   :  { %388 = vmatmul.mubr.bf16.gmra.mrb[24].mxu0 %v1617_v46  ;;  %687 = vmatprep.mubr.bf16.mxu1 %v2290_v47  ;;  %v2359_v46 = vld [vmem:[%s3126_s0 + $0x26c] ss:$0 sps:$4 sm:$0x11]  }
  0x54   :  { %2138 = vmatprep.mubr.msk.bf16.mxu0 %vm2363_vm0, %v2362_v0  ;;  %1977 = vmatpush3.bf16.msra.mxu1 %v2469_v14 }
  0x55   :  { %1978 = vmatprep.subr.bf16.mxu1 %v2476_v15 }
  0x58   :  { %1979 = vmatpush3.bf16.msra.mxu1 %v2482_v16 }
  0x59   :  { %1980 = vmatprep.subr.bf16.mxu1 %v2496_v18 }
  0x5a   :  { %688 = vmatmul.mubr.bf16.gmra.mrb[40].mxu1 %v2292_v48  ;;  %v2360_v48 = vld [vmem:[%s3126_s0 + $0x23c] ss:$12 sps:$4 sm:$0xff]  }
  0x5b   :  { %2139 = vmatmul.mubr.msk.bf16.vlgmr.msra.gmra.mrb[28].mxu0 %vm285_vm1, %v2293_v49  ;;  %695 = vmatprep.mubr.bf16.mxu1 %v2294_v50 }
  0x5c   :  { %2167 = vmatpush3.bf16.msra.mxu0 %v2395_v2  ;;  %2142 = vmatprep.mubr.msk.bf16.mxu0 %vm2363_vm0, %v2362_v0 }
  0x5d   :  { %1981 = vmatpush3.bf16.msra.mxu1 %v2506_v20  ;;  %2168 = vmatprep.subr.bf16.mxu0 %v2362_v0 }
  0x5e   :  { %1982 = vmatprep.subr.bf16.mxu1 %v2512_v21 }
  0x60   :  { %2169 = vmatpush3.bf16.msra.mxu0 %v2414_v5 }
  0x61   :  { %1983 = vmatpush3.bf16.msra.mxu1 %v2523_v22  ;;  %2198 = vmatprep.subr.bf16.mxu0 %v2362_v0 }
  0x62   :  { %696 = vmatmul.mubr.bf16.gmra.mrb[44].mxu1 %v2296_v51  ;;  %2035 = vmatprep.subr.bf16.mxu1 %v2388_v1  ;;  %v2311_v1 = vld [vmem:[%s3126_s0 + $0x150] ss:$12 sps:$4 sm:$0xff]  }
  0x63   :  { %2143 = vmatmul.mubr.msk.bf16.gmra.mrb[32].mxu0 %vm285_vm1, %v2297_v52  ;;  %703 = vmatprep.mubr.bf16.mxu1 %v2298_v53  ;;  %v2361_v53 = vld [vmem:[%s3126_s0 + $0x254] ss:$12 sps:$4 sm:$0xff]  }
  0x64   :  { %2146 = vmatprep.mubr.msk.bf16.mxu0 %vm2363_vm0, %v2362_v0 }
  0x6a   :  { %704 = vmatmul.mubr.bf16.gmra.mrb[48].mxu1 %v2300_v55 }
  0x6b   :  { %2147 = vmatmul.mubr.msk.bf16.gmra.mrb[36].mxu0 %vm285_vm1, %v2301_v56  ;;  %711 = vmatprep.mubr.bf16.mxu1 %v1690_v57 }
  0x6c   :  { %2150 = vmatprep.mubr.msk.bf16.mxu0 %vm2363_vm0, %v2362_v0 }
  0x72   :  { %712 = vmatmul.mubr.bf16.gmra.mrb[52].mxu1 %v1689_v58 }
  0x73   :  { %2151 = vmatmul.mubr.msk.bf16.gmra.mrb[40].mxu0 %vm285_vm1, %v2304_v59  ;;  %1000 = vmatprep.mubr.bf16.mxu1 %v2307_v60 }
  0x74   :  { %2154 = vmatprep.mubr.msk.bf16.mxu0 %vm2363_vm0, %v2362_v0 }
  0x7a   :  { %1001 = vmatmul.mubr.bf16.vlgmr.msra.gmra.mrb[56].mxu1 %v2305_v61 }
  0x7b   :  { %2155 = vmatmul.mubr.msk.bf16.gmra.mrb[44].mxu0 %vm285_vm1, %v2308_v62  ;;  %1008 = vmatprep.mubr.bf16.mxu1 %v2309_v63 }
  0x7c   :  { %2158 = vmatprep.mubr.msk.bf16.mxu0 %vm2363_vm0, %v2362_v0  ;;  %2036 = vmatpush3.bf16.msra.mxu1 %v2401_v3  ;;  %v2315_v3 = vld [vmem:[%s3126_s0 + $0x168] ss:$12 sps:$4 sm:$0xff]  }
  0x7d   :  { %2037 = vmatprep.subr.bf16.mxu1 %v2407_v4  ;;  %v2316_v4 = vld [vmem:[%s3126_s0 + $0x134] ss:$0 sps:$4 sm:$0x11]  }
  0x80   :  { %2038 = vmatpush3.bf16.msra.mxu1 %v2420_v6  ;;  %v2317_v6 = vld [vmem:[%s3126_s0 + $0x184] ss:$12 sps:$4 sm:$0xff]  }
  0x81   :  { %2039 = vmatprep.subr.bf16.mxu1 %v2429_v8  ;;  %v2319_v8 = vld [vmem:[%s3126_s0 + $0x180] ss:$12 sps:$4 sm:$0xff]  }
  0x82   :  { %1009 = vmatmul.mubr.bf16.gmra.mrb[60].mxu1 %v2311_v1 }
  0x83   :  { %2159 = vmatmul.mubr.msk.bf16.gmra.mrb[48].mxu0 %vm285_vm1, %v2312_v7  ;;  %1016 = vmatprep.mubr.bf16.mxu1 %v2313_v13 }
  0x84   :  { %2162 = vmatprep.mubr.msk.bf16.mxu0 %vm2363_vm0, %v2362_v0  ;;  %2040 = vmatpush3.bf16.msra.mxu1 %v2435_v9  ;;  %v2320_v9 = vld [vmem:[%s3126_s0 + $0x140] ss:$12 sps:$4 sm:$0xff]  }
  0x85   :  { %2041 = vmatprep.subr.bf16.mxu1 %v2442_v10  ;;  %v2321_v10 = vld [vmem:[%s3126_s0 + $0x19c] ss:$12 sps:$4 sm:$0xff]  }
  0x88   :  { %2042 = vmatpush3.bf16.msra.mxu1 %v2452_v11  ;;  %v2323_v11 = vld [vmem:[%s3126_s0 + $0x198] ss:$12 sps:$4 sm:$0xff]  }
  0x89   :  { %2043 = vmatprep.subr.bf16.mxu1 %v2459_v12  ;;  %v2324_v12 = vld [vmem:[%s3126_s0 + $0x158] ss:$12 sps:$4 sm:$0xff]  }
  0x8a   :  { %1017 = vmatmul.mubr.bf16.gmra.mrb[64].mxu1 %v2315_v3 }
  0x8b   :  { %2163 = vmatmul.mubr.msk.bf16.gmra.mrb[52].mxu0 %vm285_vm1, %v2316_v4  ;;  %1024 = vmatprep.mubr.bf16.mxu1 %v2317_v6 }
  0x8c   :  { %2170 = vmatprep.mubr.msk.bf16.mxu0 %vm2363_vm0, %v2362_v0  ;;  %2044 = vmatpush3.bf16.msra.mxu1 %v2469_v14  ;;  %v2325_v14 = vld [vmem:[%s3126_s0 + $0x1b4] ss:$12 sps:$4 sm:$0xff]  }
  0x8d   :  { %2045 = vmatprep.subr.bf16.mxu1 %v2476_v15  ;;  %v1723_v15 = vld [vmem:[%s3126_s0 + $0x1c8] sm:$0x11] }
  0x8e   :  { %v1743_v19 = vcombine.low %v1723_v15, %v1723_v15 }
  0x90   :  { %2046 = vmatpush3.bf16.msra.mxu1 %v2482_v16  ;;  %v2327_v16 = vld [vmem:[%s3126_s0 + $0x1b0] ss:$12 sps:$4 sm:$0xff]  }
  0x91   :  { %2047 = vmatprep.subr.bf16.mxu1 %v2496_v18  ;;  %v1744_v18 = vcombine.high %v1723_v15, %v1723_v15 }
  0x92   :  { %1025 = vmatmul.mubr.bf16.gmra.mrb[68].mxu1 %v2319_v8 }
  0x93   :  { %2171 = vmatmul.mubr.msk.bf16.vlgmr.msra.gmra.mrb[56].mxu0 %vm285_vm1, %v2320_v9  ;;  %1032 = vmatprep.mubr.bf16.mxu1 %v2321_v10 }
  0x94   :  { %2199 = vmatpush3.bf16.msra.mxu0 %v2395_v2  ;;  %2174 = vmatprep.mubr.msk.bf16.mxu0 %vm2363_vm0, %v2362_v0 }
  0x95   :  { %2048 = vmatpush3.bf16.msra.mxu1 %v2506_v20  ;;  %2200 = vmatprep.subr.bf16.mxu0 %v2362_v0  ;;  %v2331_v20 = vld [vmem:[%s3126_s0 + $0x188] ss:$12 sps:$4 sm:$0xff]  }
  0x96   :  { %2049 = vmatprep.subr.bf16.mxu1 %v2512_v21  ;;  %v2334_v21 = vld [vmem:[%s3126_s0 + $0x1d8] ss:$12 sps:$4 sm:$0xff]  }
  0x98   :  { %2201 = vmatpush3.bf16.msra.mxu0 %v2414_v5 }
  0x99   :  { %2050 = vmatpush3.bf16.msra.mxu1 %v2523_v22  ;;  %v2332_v22 = vld [vmem:[%s3126_s0 + $0x1d4] ss:$12 sps:$4 sm:$0xff]  }
  0x9a   :  { %1033 = vmatmul.mubr.bf16.gmra.mrb[72].mxu1 %v2323_v11  ;;  %2230 = vmatprep.subr.bf16.mxu1 %v2362_v0 }
  0x9b   :  { %2175 = vmatmul.mubr.msk.bf16.gmra.mrb[60].mxu0 %vm285_vm1, %v2324_v12  ;;  %1040 = vmatprep.mubr.bf16.mxu1 %v2325_v14 }
  0x9c   :  { %2178 = vmatprep.mubr.msk.bf16.mxu0 %vm2363_vm0, %v2362_v0 }
  0xa2   :  { %1041 = vmatmul.mubr.bf16.gmra.mrb[76].mxu1 %v2327_v16 }
  0xa3   :  { %2179 = vmatmul.mubr.msk.bf16.gmra.mrb[64].mxu0 %vm285_vm1, %v2328_v17  ;;  %1048 = vmatprep.mubr.bf16.mxu1 %v1744_v18 }
  0xa4   :  { %2182 = vmatprep.mubr.msk.bf16.mxu0 %vm2363_vm0, %v2362_v0 }
  0xaa   :  { %1049 = vmatmul.mubr.bf16.gmra.mrb[80].mxu1 %v1743_v19 }
  0xab   :  { %2183 = vmatmul.mubr.msk.bf16.gmra.mrb[68].mxu0 %vm285_vm1, %v2331_v20  ;;  %1337 = vmatprep.mubr.bf16.mxu1 %v2334_v21 }
  0xac   :  { %2186 = vmatprep.mubr.msk.bf16.mxu0 %vm2363_vm0, %v2362_v0 }
  0xb2   :  { %1338 = vmatmul.mubr.bf16.vlgmr.msra.gmra.mrb[84].mxu1 %v2332_v22 }
  0xb3   :  { %2187 = vmatmul.mubr.msk.bf16.gmra.mrb[72].mxu0 %vm285_vm1, %v2335_v23  ;;  %1345 = vmatprep.mubr.bf16.mxu1 %v2336_v24 }
  0xb4   :  { %2190 = vmatprep.mubr.msk.bf16.mxu0 %vm2363_vm0, %v2362_v0  ;;  %2232 = vmatpush3.bf16.msra.mxu1 %v2395_v2  ;;  %v2342_v2 = vld [vmem:[%s3126_s0 + $0x204] ss:$12 sps:$4 sm:$0xff]  }
  0xb5   :  { %2231 = vmatprep.subr.bf16.mxu1 %v2362_v0 }
  0xb8   :  { %2233 = vmatpush3.bf16.msra.mxu1 %v2414_v5  ;;  %v2346_v5 = vld [vmem:[%s3126_s0 + $0x21c] ss:$12 sps:$4 sm:$0xff]  }
  0xba   :  { %1346 = vmatmul.mubr.bf16.gmra.mrb[88].mxu1 %v2338_v25 }
  0xbb   :  { %2191 = vmatmul.mubr.msk.bf16.gmra.mrb[76].mxu0 %vm285_vm1, %v2339_v26  ;;  %1353 = vmatprep.mubr.bf16.mxu1 %v2340_v27 }
  0xbc   :  { %2194 = vmatprep.mubr.msk.bf16.mxu0 %vm2363_vm0, %v2362_v0 }
  0xc2   :  { %1354 = vmatmul.mubr.bf16.gmra.mrb[92].mxu1 %v2342_v2 }
  0xc3   :  { %2195 = vmatmul.mubr.msk.bf16.gmra.mrb[80].mxu0 %vm285_vm1, %v2343_v28  ;;  %1361 = vmatprep.mubr.bf16.mxu1 %v2344_v29 }
  0xc4   :  { %2202 = vmatprep.mubr.msk.bf16.mxu0 %vm2363_vm0, %v2362_v0 }
  0xca   :  { %1362 = vmatmul.mubr.bf16.gmra.mrb[96].mxu1 %v2346_v5 }
  0xcb   :  { %2203 = vmatmul.mubr.msk.bf16.vlgmr.msra.gmra.mrb[84].mxu0 %vm285_vm1, %v2347_v30  ;;  %1369 = vmatprep.mubr.bf16.mxu1 %v2348_v31 }
  0xcc   :  { %2206 = vmatprep.mubr.msk.bf16.mxu0 %vm2363_vm0, %v2362_v0 }
  0xd2   :  { %1370 = vmatmul.mubr.bf16.gmra.mrb[100].mxu1 %v2350_v32 }
  0xd3   :  { %2207 = vmatmul.mubr.msk.bf16.gmra.mrb[88].mxu0 %vm285_vm1, %v2351_v33  ;;  %1377 = vmatprep.mubr.bf16.mxu1 %v2352_v34 }
  0xd4   :  { %2210 = vmatprep.mubr.msk.bf16.mxu0 %vm2363_vm0, %v2362_v0 }
  0xda   :  { %1378 = vmatmul.mubr.bf16.gmra.mrb[104].mxu1 %v2354_v36 }
  0xdb   :  { %2211 = vmatmul.mubr.msk.bf16.gmra.mrb[92].mxu0 %vm285_vm1, %v2355_v37  ;;  %1385 = vmatprep.mubr.bf16.mxu1 %v1798_v38 }
  0xdc   :  { %2214 = vmatprep.mubr.msk.bf16.mxu0 %vm2363_vm0, %v2362_v0 }
  0xdd   :  { %v429_v39 = vpop.f32.mrb[0].mxu1 }
  0xde   :  { %v2108_v41 = vpop.f32.mrb[1].mxu1 }
  0xdf   :  { %v432_v43 = vpop.f32.mrb[2].mxu1 }
  0xe0   :  { %v2109_v44 = vpop.f32.mrb[3].mxu1 }
  0xe2   :  { %1386 = vmatmul.mubr.bf16.gmra.mrb[108].mxu1 %v1797_v40 }
  0xe3   :  { %2215 = vmatmul.mubr.msk.bf16.gmra.mrb[96].mxu0 %vm285_vm1, %v2358_v42  ;;  %2226 = vmatprep.mubr.msk.bf16.mxu1 %vm2363_vm0, %v2362_v0 }
  0xe4   :  { %2218 = vmatprep.mubr.msk.bf16.mxu0 %vm2363_vm0, %v2362_v0 }
  0xe5   :  { %v437_v45 = vpop.f32.mrb[4].mxu1 }
  0xe6   :  { %v2112_v47 = vpop.f32.mrb[5].mxu1 }
  0xe7   :  { %v440_v49 = vpop.f32.mrb[6].mxu1 }
  0xe8   :  { %v2113_v50 = vpop.f32.mrb[7].mxu1 }
  0xea   :  { %2227 = vmatmul.mubr.msk.bf16.vlgmr.msra.gmra.mrb[112].mxu1 %vm285_vm1, %v2359_v46 }
  0xeb   :  { %2219 = vmatmul.mubr.msk.bf16.gmra.mrb[100].mxu0 %vm285_vm1, %v2360_v48 }
  0xec   :  { %2222 = vmatprep.mubr.msk.bf16.mxu0 %vm2363_vm0, %v2362_v0 }
  0xed   :  { %v445_v51 = vpop.f32.mrb[8].mxu1 }
  0xee   :  { %v2116_v52 = vpop.f32.mrb[9].mxu1 }
  0xef   :  { %v448_v54 = vpop.f32.mrb[10].mxu1 }
  0xf0   :  { %v2117_v55 = vpop.f32.mrb[11].mxu1 }
  0xf3   :  { %2223 = vmatmul.mubr.msk.bf16.gmra.mrb[104].mxu0 %vm285_vm1, %v2361_v53 }
  0xf5   :  { %v453_v56 = vpop.f32.mrb[12].mxu1 }
  0xf6   :  { %v1850_v57 = vpop.f32.mrb[0].mxu0  ;;  %v2120_v58 = vpop.f32.mrb[13].mxu1 }
  0xf7   :  { %v1851_v59 = vpop.f32.mrb[1].mxu0  ;;  %v456_v60 = vpop.f32.mrb[14].mxu1 }
  0xf8   :  { %v1852_v61 = vadd.f32 %v1851_v59, %v1850_v57  ;;  %v1853_v62 = vpop.f32.mrb[2].mxu0  ;;  %v2121_v63 = vpop.f32.mrb[15].mxu1 }
  0xf9   :  { %v1854_v1 = vpop.f32.mrb[3].mxu0 }
  0xfa   :  { %v2882_v0 = vadd.f32 %v1852_v61, %v429_v39  ;;  %v1855_v7 = vadd.f32 %v1854_v1, %v1853_v62 }
  0xfc   :  { %v2884_v13 = vadd.f32 %v1855_v7, %v432_v43 }
  0xfd   :  { %v461_v3 = vpop.f32.mrb[16].mxu1 }
  0xfe   :  { %v1856_v4 = vpop.f32.mrb[4].mxu0  ;;  %v2124_v6 = vpop.f32.mrb[17].mxu1 }
  0xff   :  { %v1857_v8 = vpop.f32.mrb[5].mxu0  ;;  %v464_v9 = vpop.f32.mrb[18].mxu1 }
 0x100   :  { %v1858_v10 = vadd.f32 %v1857_v8, %v1856_v4  ;;  %v1859_v11 = vpop.f32.mrb[6].mxu0  ;;  %v2125_v12 = vpop.f32.mrb[19].mxu1 }
 0x101   :  { %v1860_v14 = vpop.f32.mrb[7].mxu0 }
 0x102   :  { %v2886_v15 = vadd.f32 %v1858_v10, %v437_v45  ;;  %v1861_v16 = vadd.f32 %v1860_v14, %v1859_v11 }
 0x104   :  { %v2888_v17 = vadd.f32 %v1861_v16, %v440_v49 }
 0x105   :  { %v469_v18 = vpop.f32.mrb[20].mxu1 }
 0x106   :  { %v1862_v19 = vpop.f32.mrb[8].mxu0  ;;  %v2128_v20 = vpop.f32.mrb[21].mxu1 }
 0x107   :  { %v1863_v21 = vpop.f32.mrb[9].mxu0  ;;  %v472_v22 = vpop.f32.mrb[22].mxu1 }
 0x108   :  { %v1864_v23 = vadd.f32 %v1863_v21, %v1862_v19  ;;  %v1865_v24 = vpop.f32.mrb[10].mxu0  ;;  %v2129_v25 = vpop.f32.mrb[23].mxu1 }
 0x109   :  { %v1866_v26 = vpop.f32.mrb[11].mxu0 }
 0x10a   :  { %v2890_v27 = vadd.f32 %v1864_v23, %v445_v51  ;;  %v1867_v2 = vadd.f32 %v1866_v26, %v1865_v24 }
 0x10c   :  { %v2892_v28 = vadd.f32 %v1867_v2, %v448_v54 }
 0x10d   :  { %v477_v29 = vpop.f32.mrb[24].mxu1 }
 0x10e   :  { %v1868_v5 = vpop.f32.mrb[12].mxu0  ;;  %v2132_v30 = vpop.f32.mrb[25].mxu1 }
 0x10f   :  { %v1869_v31 = vpop.f32.mrb[13].mxu0  ;;  %v480_v32 = vpop.f32.mrb[26].mxu1 }
 0x110   :  { %v1870_v33 = vadd.f32 %v1869_v31, %v1868_v5  ;;  %v1871_v34 = vpop.f32.mrb[14].mxu0  ;;  %v2133_v35 = vpop.f32.mrb[27].mxu1 }
 0x111   :  { %v1872_v36 = vpop.f32.mrb[15].mxu0 }
 0x112   :  { %v2894_v37 = vadd.f32 %v1870_v33, %v453_v56  ;;  %v1873_v38 = vadd.f32 %v1872_v36, %v1871_v34 }
 0x114   :  { %v2896_v39 = vadd.f32 %v1873_v38, %v456_v60 }
 0x115   :  { %v1917_v40 = vpop.f32.mrb[28].mxu1 }
 0x116   :  { %v1874_v41 = vpop.f32.mrb[16].mxu0  ;;  %v1918_v42 = vpop.f32.mrb[29].mxu1 }
 0x117   :  { %v1875_v43 = vpop.f32.mrb[17].mxu0  ;;  %v1919_v44 = vadd.f32 %v1918_v42, %v1917_v40  ;;  %v1920_v45 = vpop.f32.mrb[30].mxu1 }
 0x118   :  { %v1876_v46 = vadd.f32 %v1875_v43, %v1874_v41  ;;  %v1877_v47 = vpop.f32.mrb[18].mxu0  ;;  %v1921_v48 = vpop.f32.mrb[31].mxu1 }
 0x119   :  { %v1878_v49 = vpop.f32.mrb[19].mxu0  ;;  %v1922_v50 = vadd.f32 %v1921_v48, %v1920_v45 }
 0x11a   :  { %v2898_v51 = vadd.f32 %v1876_v46, %v461_v3  ;;  %v1879_v52 = vadd.f32 %v1878_v49, %v1877_v47 }
 0x11c   :  { %v2900_v53 = vadd.f32 %v1879_v52, %v464_v9 }
 0x11d   :  { %v1923_v54 = vpop.f32.mrb[32].mxu1 }
 0x11e   :  { %v1880_v55 = vpop.f32.mrb[20].mxu0  ;;  %v1924_v56 = vpop.f32.mrb[33].mxu1 }
 0x11f   :  { %v1881_v57 = vpop.f32.mrb[21].mxu0  ;;  %v1925_v58 = vadd.f32 %v1924_v56, %v1923_v54  ;;  %v1926_v59 = vpop.f32.mrb[34].mxu1 }
 0x120   :  { %v1882_v60 = vadd.f32 %v1881_v57, %v1880_v55  ;;  %v1883_v61 = vpop.f32.mrb[22].mxu0  ;;  %v1927_v62 = vpop.f32.mrb[35].mxu1 }
 0x121   :  { %v1884_v63 = vpop.f32.mrb[23].mxu0  ;;  %v1928_v1 = vadd.f32 %v1927_v62, %v1926_v59 }
 0x122   :  { %v2902_v7 = vadd.f32 %v1882_v60, %v469_v18  ;;  %v1885_v4 = vadd.f32 %v1884_v63, %v1883_v61 }
 0x124   :  { %v2904_v6 = vadd.f32 %v1885_v4, %v472_v22 }
 0x125   :  { %v1929_v3 = vpop.f32.mrb[36].mxu1 }
 0x126   :  { %v1886_v8 = vpop.f32.mrb[24].mxu0  ;;  %v1930_v9 = vpop.f32.mrb[37].mxu1 }
 0x127   :  { %v1887_v10 = vpop.f32.mrb[25].mxu0  ;;  %v1931_v11 = vadd.f32 %v1930_v9, %v1929_v3  ;;  %v1932_v12 = vpop.f32.mrb[38].mxu1 }
 0x128   :  { %v1888_v14 = vadd.f32 %v1887_v10, %v1886_v8  ;;  %v1889_v16 = vpop.f32.mrb[26].mxu0  ;;  %v1933_v19 = vpop.f32.mrb[39].mxu1 }
 0x129   :  { %v1890_v20 = vpop.f32.mrb[27].mxu0  ;;  %v1934_v21 = vadd.f32 %v1933_v19, %v1932_v12 }
 0x12a   :  { %v2906_v23 = vadd.f32 %v1888_v14, %v477_v29 }
 0x12d   :  { %v1935_v24 = vpop.f32.mrb[40].mxu1 }
 0x12e   :  { %v753_v25 = vpop.f32.mrb[28].mxu0  ;;  %v1936_v18 = vpop.f32.mrb[41].mxu1 }
 0x12f   :  { %v2908_v26 = vadd.f32 %v1919_v44, %v753_v25  ;;  %v2140_v22 = vpop.f32.mrb[29].mxu0  ;;  %v1937_v2 = vadd.f32 %v1936_v18, %v1935_v24  ;;  %v1938_v5 = vpop.f32.mrb[42].mxu1 }
 0x130   :  { %v756_v30 = vpop.f32.mrb[30].mxu0  ;;  %v1939_v31 = vpop.f32.mrb[43].mxu1 }
 0x131   :  { %v807_v32 = vmax.f32 %v2882_v0, %v2908_v26  ;;  %v2912_v33 = vadd.f32 %v1922_v50, %v756_v30  ;;  %v2141_v34 = vpop.f32.mrb[31].mxu0  ;;  %v1940_v35 = vadd.f32 %v1939_v31, %v1938_v5 }
 0x133   :  { %v808_v29 = vmax.f32 %v2884_v13, %v2912_v33 }
 0x135   :  { %v1941_v36 = vpop.f32.mrb[44].mxu1 }
 0x136   :  { %v761_v38 = vpop.f32.mrb[32].mxu0  ;;  %v1942_v40 = vpop.f32.mrb[45].mxu1 }
 0x137   :  { %v2916_v41 = vadd.f32 %v1925_v58, %v761_v38  ;;  %v2144_v42 = vpop.f32.mrb[33].mxu0  ;;  %v1943_v43 = vadd.f32 %v1942_v40, %v1941_v36  ;;  %v1944_v44 = vpop.f32.mrb[46].mxu1 }
 0x138   :  { %v764_v45 = vpop.f32.mrb[34].mxu0  ;;  %v1945_v46 = vpop.f32.mrb[47].mxu1 }
 0x139   :  { %v809_v47 = vmax.f32 %v2886_v15, %v2916_v41  ;;  %v2920_v48 = vadd.f32 %v1928_v1, %v764_v45  ;;  %v2145_v49 = vpop.f32.mrb[35].mxu0  ;;  %v1946_v50 = vadd.f32 %v1945_v46, %v1944_v44 }
 0x13b   :  { %v810_v52 = vmax.f32 %v2888_v17, %v2920_v48 }
 0x13d   :  { %v1947_v54 = vpop.f32.mrb[48].mxu1 }
 0x13e   :  { %v769_v55 = vpop.f32.mrb[36].mxu0  ;;  %v1948_v56 = vpop.f32.mrb[49].mxu1 }
 0x13f   :  { %v2924_v57 = vadd.f32 %v1931_v11, %v769_v55  ;;  %v2148_v58 = vpop.f32.mrb[37].mxu0  ;;  %v1949_v59 = vadd.f32 %v1948_v56, %v1947_v54  ;;  %v1950_v60 = vpop.f32.mrb[50].mxu1 }
 0x140   :  { %v772_v61 = vpop.f32.mrb[38].mxu0  ;;  %v1951_v62 = vpop.f32.mrb[51].mxu1 }
 0x141   :  { %v811_v63 = vmax.f32 %v2890_v27, %v2924_v57  ;;  %v2928_v1 = vadd.f32 %v1934_v21, %v772_v61  ;;  %v2149_v4 = vpop.f32.mrb[39].mxu0  ;;  %v1952_v3 = vadd.f32 %v1951_v62, %v1950_v60 }
 0x143   :  { %v812_v8 = vmax.f32 %v2892_v28, %v2928_v1 }
 0x145   :  { %v1953_v9 = vpop.f32.mrb[52].mxu1 }
 0x146   :  { %v777_v10 = vpop.f32.mrb[40].mxu0  ;;  %v1954_v12 = vpop.f32.mrb[53].mxu1 }
 0x147   :  { %v2932_v11 = vadd.f32 %v1937_v2, %v777_v10  ;;  %v2152_v14 = vpop.f32.mrb[41].mxu0  ;;  %v1955_v16 = vadd.f32 %v1954_v12, %v1953_v9  ;;  %v1956_v19 = vpop.f32.mrb[54].mxu1 }
 0x148   :  { %v780_v20 = vpop.f32.mrb[42].mxu0  ;;  %v1957_v24 = vpop.f32.mrb[55].mxu1 }
 0x149   :  { %v813_v25 = vmax.f32 %v2894_v37, %v2932_v11  ;;  %v2936_v21 = vadd.f32 %v1940_v35, %v780_v20  ;;  %v2153_v18 = vpop.f32.mrb[43].mxu0 }
 0x14b   :  { %v814_v22 = vmax.f32 %v2896_v39, %v2936_v21 }
 0x14d   :  { %v1984_v5 = vpop.f32.mrb[56].mxu1 }
 0x14e   :  { %v785_v30 = vpop.f32.mrb[44].mxu0  ;;  %v1985_v31 = vpop.f32.mrb[57].mxu1 }
 0x14f   :  { %v2940_v34 = vadd.f32 %v1943_v43, %v785_v30  ;;  %v2156_v2 = vpop.f32.mrb[45].mxu0  ;;  %v1986_v36 = vadd.f32 %v1985_v31, %v1984_v5  ;;  %v1987_v38 = vpop.f32.mrb[58].mxu1 }
 0x150   :  { %v788_v40 = vpop.f32.mrb[46].mxu0  ;;  %v1988_v42 = vpop.f32.mrb[59].mxu1 }
 0x151   :  { %v815_v44 = vmax.f32 %v2898_v51, %v2940_v34  ;;  %v2944_v45 = vadd.f32 %v1946_v50, %v788_v40  ;;  %v2157_v35 = vpop.f32.mrb[47].mxu0  ;;  %v1989_v46 = vadd.f32 %v1988_v42, %v1987_v38 }
 0x153   :  { %v816_v49 = vmax.f32 %v2900_v53, %v2944_v45 }
 0x155   :  { %v1990_v54 = vpop.f32.mrb[60].mxu1 }
 0x156   :  { %v793_v55 = vpop.f32.mrb[48].mxu0  ;;  %v1991_v56 = vpop.f32.mrb[61].mxu1 }
 0x157   :  { %v2948_v43 = vadd.f32 %v1949_v59, %v793_v55  ;;  %v2160_v58 = vpop.f32.mrb[49].mxu0  ;;  %v1992_v60 = vadd.f32 %v1991_v56, %v1990_v54  ;;  %v1993_v61 = vpop.f32.mrb[62].mxu1 }
 0x158   :  { %v796_v62 = vpop.f32.mrb[50].mxu0  ;;  %v1994_v4 = vpop.f32.mrb[63].mxu1 }
 0x159   :  { %v817_v9 = vmax.f32 %v2902_v7, %v2948_v43  ;;  %v2952_v50 = vadd.f32 %v1952_v3, %v796_v62  ;;  %v2161_v10 = vpop.f32.mrb[51].mxu0  ;;  %v1995_v12 = vadd.f32 %v1994_v4, %v1993_v61 }
 0x15b   :  { %v818_v14 = vmax.f32 %v2904_v6, %v2952_v50 }
 0x15d   :  { %v1996_v19 = vpop.f32.mrb[64].mxu1 }
 0x15e   :  { %v801_v20 = vpop.f32.mrb[52].mxu0  ;;  %v1997_v24 = vpop.f32.mrb[65].mxu1 }
 0x15f   :  { %v2956_v59 = vadd.f32 %v1955_v16, %v801_v20  ;;  %v2164_v18 = vpop.f32.mrb[53].mxu0  ;;  %v1998_v5 = vadd.f32 %v1997_v24, %v1996_v19  ;;  %v1999_v30 = vpop.f32.mrb[66].mxu1 }
 0x160   :  { %v804_v31 = vpop.f32.mrb[54].mxu0  ;;  %v2000_v2 = vpop.f32.mrb[67].mxu1 }
 0x161   :  { %v819_v38 = vmax.f32 %v2906_v23, %v2956_v59  ;;  %v2165_v3 = vpop.f32.mrb[55].mxu0  ;;  %v2001_v40 = vadd.f32 %v2000_v2, %v1999_v30 }
 0x165   :  { %v2002_v42 = vpop.f32.mrb[68].mxu1 }
 0x166   :  { %v1090_v35 = vpop.f32.mrb[56].mxu0  ;;  %v2003_v54 = vpop.f32.mrb[69].mxu1 }
 0x167   :  { %v1091_v55 = vadd.f32 %v1986_v36, %v1090_v35  ;;  %v2172_v56 = vpop.f32.mrb[57].mxu0  ;;  %v2004_v58 = vadd.f32 %v2003_v54, %v2002_v42  ;;  %v2005_v61 = vpop.f32.mrb[70].mxu1 }
 0x168   :  { %v1093_v62 = vpop.f32.mrb[58].mxu0  ;;  %v2006_v16 = vpop.f32.mrb[71].mxu1 }
 0x169   :  { %v2963_v4 = vmax.f32 %v807_v32, %v1091_v55  ;;  %v1094_v10 = vadd.f32 %v1989_v46, %v1093_v62  ;;  %v2173_v19 = vpop.f32.mrb[59].mxu0  ;;  %v2007_v20 = vadd.f32 %v2006_v16, %v2005_v61 }
 0x16b   :  { %v2968_v24 = vmax.f32 %v808_v29, %v1094_v10 }
 0x16d   :  { %v2008_v18 = vpop.f32.mrb[72].mxu1 }
 0x16e   :  { %v1098_v36 = vpop.f32.mrb[60].mxu0  ;;  %v2009_v30 = vpop.f32.mrb[73].mxu1 }
 0x16f   :  { %v1099_v31 = vadd.f32 %v1992_v60, %v1098_v36  ;;  %v2176_v2 = vpop.f32.mrb[61].mxu0  ;;  %v2010_v3 = vadd.f32 %v2009_v30, %v2008_v18  ;;  %v2011_v42 = vpop.f32.mrb[74].mxu1 }
 0x170   :  { %v1101_v35 = vpop.f32.mrb[62].mxu0  ;;  %v2012_v54 = vpop.f32.mrb[75].mxu1 }
 0x171   :  { %v2973_v0 = vmax.f32 %v809_v47, %v1099_v31  ;;  %v1102_v26 = vadd.f32 %v1995_v12, %v1101_v35  ;;  %v2177_v32 = vpop.f32.mrb[63].mxu0  ;;  %v2013_v46 = vadd.f32 %v2012_v54, %v2011_v42 }
 0x173   :  { %v2978_v13 = vmax.f32 %v810_v52, %v1102_v26 }
 0x175   :  { %v2014_v33 = vpop.f32.mrb[76].mxu1 }
 0x176   :  { %v1106_v29 = vpop.f32.mrb[64].mxu0  ;;  %v2015_v60 = vpop.f32.mrb[77].mxu1 }
 0x177   :  { %v1107_v55 = vadd.f32 %v1998_v5, %v1106_v29  ;;  %v2180_v56 = vpop.f32.mrb[65].mxu0  ;;  %v2016_v61 = vadd.f32 %v2015_v60, %v2014_v33  ;;  %v2017_v62 = vpop.f32.mrb[78].mxu1 }
 0x178   :  { %v1109_v16 = vpop.f32.mrb[66].mxu0  ;;  %v2018_v10 = vpop.f32.mrb[79].mxu1 }
 0x179   :  { %v2983_v15 = vmax.f32 %v811_v63, %v1107_v55  ;;  %v1110_v41 = vadd.f32 %v2001_v40, %v1109_v16  ;;  %v2181_v47 = vpop.f32.mrb[67].mxu0  ;;  %v2019_v12 = vadd.f32 %v2018_v10, %v2017_v62 }
 0x17b   :  { %v2988_v17 = vmax.f32 %v812_v8, %v1110_v41 }
 0x17d   :  { %v2020_v48 = vpop.f32.mrb[80].mxu1 }
 0x17e   :  { %v1114_v52 = vpop.f32.mrb[68].mxu0  ;;  %v2021_v5 = vpop.f32.mrb[81].mxu1 }
 0x17f   :  { %v1115_v19 = vadd.f32 %v2004_v58, %v1114_v52  ;;  %v2184_v18 = vpop.f32.mrb[69].mxu0  ;;  %v2022_v36 = vadd.f32 %v2021_v5, %v2020_v48  ;;  %v2023_v30 = vpop.f32.mrb[82].mxu1 }
 0x180   :  { %v1117_v31 = vpop.f32.mrb[70].mxu0  ;;  %v2024_v2 = vpop.f32.mrb[83].mxu1 }
 0x181   :  { %v2993_v27 = vmax.f32 %v813_v25, %v1115_v19  ;;  %v1118_v57 = vadd.f32 %v2007_v20, %v1117_v31  ;;  %v2185_v63 = vpop.f32.mrb[71].mxu0 }
 0x183   :  { %v2998_v28 = vmax.f32 %v814_v22, %v1118_v57 }
 0x185   :  { %v2051_v1 = vpop.f32.mrb[84].mxu1 }
 0x186   :  { %v1122_v8 = vpop.f32.mrb[72].mxu0  ;;  %v2052_v40 = vpop.f32.mrb[85].mxu1 }
 0x187   :  { %v1123_v58 = vadd.f32 %v2010_v3, %v1122_v8  ;;  %v2188_v42 = vpop.f32.mrb[73].mxu0  ;;  %v2053_v35 = vadd.f32 %v2052_v40, %v2051_v1  ;;  %v2054_v54 = vpop.f32.mrb[86].mxu1 }
 0x188   :  { %v1125_v26 = vpop.f32.mrb[74].mxu0  ;;  %v2055_v32 = vpop.f32.mrb[87].mxu1 }
 0x189   :  { %v3003_v37 = vmax.f32 %v815_v44, %v1123_v58  ;;  %v1126_v11 = vadd.f32 %v2013_v46, %v1125_v26  ;;  %v2189_v25 = vpop.f32.mrb[75].mxu0  ;;  %v2056_v20 = vadd.f32 %v2055_v32, %v2054_v54 }
 0x18b   :  { %v3008_v39 = vmax.f32 %v816_v49, %v1126_v11 }
 0x18d   :  { %v2057_v21 = vpop.f32.mrb[88].mxu1 }
 0x18e   :  { %v1130_v22 = vpop.f32.mrb[76].mxu0  ;;  %v2058_v3 = vpop.f32.mrb[89].mxu1 }
 0x18f   :  { %v1131_v33 = vadd.f32 %v2016_v61, %v1130_v22  ;;  %v2192_v29 = vpop.f32.mrb[77].mxu0  ;;  %v2059_v60 = vadd.f32 %v2058_v3, %v2057_v21  ;;  %v2060_v55 = vpop.f32.mrb[90].mxu1 }
 0x190   :  { %v1133_v56 = vpop.f32.mrb[78].mxu0  ;;  %v2061_v62 = vpop.f32.mrb[91].mxu1 }
 0x191   :  { %v3013_v51 = vmax.f32 %v817_v9, %v1131_v33  ;;  %v1134_v34 = vadd.f32 %v2019_v12, %v1133_v56  ;;  %v2193_v44 = vpop.f32.mrb[79].mxu0  ;;  %v2062_v46 = vadd.f32 %v2061_v62, %v2060_v55 }
 0x193   :  { %v3018_v53 = vmax.f32 %v818_v14, %v1134_v34 }
 0x195   :  { %v2063_v45 = vpop.f32.mrb[92].mxu1 }
 0x196   :  { %v1138_v49 = vpop.f32.mrb[80].mxu0  ;;  %v2064_v61 = vpop.f32.mrb[93].mxu1 }
 0x197   :  { %v1139_v16 = vadd.f32 %v2022_v36, %v1138_v49  ;;  %v2196_v10 = vpop.f32.mrb[81].mxu0  ;;  %v2065_v41 = vadd.f32 %v2064_v61, %v2063_v45  ;;  %v2066_v47 = vpop.f32.mrb[94].mxu1  ;;  %v3030_v36 = vld [vmem:[%s3127_s2] ss:$0 sm:$0xff] }
 0x198   :  { %v1141_v48 = vpop.f32.mrb[82].mxu0  ;;  %v2067_v52 = vpop.f32.mrb[95].mxu1 }
 0x199   :  { %v3023_v7 = vmax.f32 %v819_v38, %v1139_v16  ;;  %v2197_v43 = vpop.f32.mrb[83].mxu0  ;;  %v2068_v9 = vadd.f32 %v2067_v52, %v2066_v47 }
 0x19d   :  { %v2069_v12 = vpop.f32.mrb[96].mxu1 }
 0x19e   :  { %v1427_v6 = vpop.f32.mrb[84].mxu0  ;;  %v2070_v50 = vpop.f32.mrb[97].mxu1 }
 0x19f   :  { %v1428_v14 = vadd.f32 %v2053_v35, %v1427_v6  ;;  %v2204_v5 = vpop.f32.mrb[85].mxu0  ;;  %v3025_v19 = vadd.f32 %v2070_v50, %v2069_v12  ;;  %v2072_v18 = vpop.f32.mrb[98].mxu1 }
 0x1a0   :  { %v1430_v30 = vpop.f32.mrb[86].mxu0  ;;  %v2073_v31 = vpop.f32.mrb[99].mxu1 }
 0x1a1   :  { %v1481_v23 = vmax.f32 %v2963_v4, %v1428_v14  ;;  %v1431_v59 = vadd.f32 %v2056_v20, %v1430_v30  ;;  %v2205_v38 = vpop.f32.mrb[87].mxu0  ;;  %v3033_v2 = vadd.f32 %v2073_v31, %v2072_v18 }
 0x1a3   :  { %v1501_v57 = vadd.f32 %v3030_v36, %v1481_v23  ;;  %v1482_v63 = vmax.f32 %v2968_v24, %v1431_v59 }
 0x1a5   :  { %v1514_v1 = vmax.f32 %v1501_v57, 0.0  ;;  %v1502_v8 = vadd.f32 %v3030_v36, %v1482_v63  ;;  %v2075_v40 = vpop.f32.mrb[100].mxu1 }
 0x1a6   :  { %v1435_v58 = vpop.f32.mrb[88].mxu0  ;;  %v2076_v42 = vpop.f32.mrb[101].mxu1 }
 0x1a7   :  { %v1821_v35 = vpack.c.bf16 %v1514_v1, %v1514_v1  ;;  %v1515_v54 = vmax.f32 %v1502_v8, 0.0  ;;  %v1436_v26 = vadd.f32 %v2059_v60, %v1435_v58  ;;  %v2208_v32 = vpop.f32.mrb[89].mxu0  ;;  %v3038_v4 = vadd.f32 %v2076_v42, %v2075_v40  ;;  %v2078_v11 = vpop.f32.mrb[102].mxu1 }
 0x1a8   :  { %v1438_v25 = vpop.f32.mrb[90].mxu0  ;;  %v2079_v20 = vpop.f32.mrb[103].mxu1 }
 0x1a9   :  { %1581 = vst.msk [vmem:[%s3128_s3] sm:$0xf] %vm1580_vm2, %v1821_v35  ;;  %v1822_v24 = vpack.c.bf16 %v1515_v54, %v1515_v54  ;;  %v1483_v21 = vmax.f32 %v2973_v0, %v1436_v26  ;;  %v1439_v22 = vadd.f32 %v2062_v46, %v1438_v25  ;;  %v2209_v3 = vpop.f32.mrb[91].mxu0  ;;  %v3045_v33 = vadd.f32 %v2079_v20, %v2078_v11 }
 0x1ab   :  { %1582 = vst.msk [vmem:[%s3128_s3 + $0x4] sm:$0xf] %vm1580_vm2, %v1822_v24  ;;  %v1503_v29 = vadd.f32 %v3030_v36, %v1483_v21  ;;  %v1484_v60 = vmax.f32 %v2978_v13, %v1439_v22 }
 0x1ad   :  { %v1516_v55 = vmax.f32 %v1503_v29, 0.0  ;;  %v1504_v56 = vadd.f32 %v3030_v36, %v1484_v60  ;;  %v2081_v62 = vpop.f32.mrb[104].mxu1 }
 0x1ae   :  { %v1443_v34 = vpop.f32.mrb[92].mxu0  ;;  %v2082_v44 = vpop.f32.mrb[105].mxu1 }
 0x1af   :  { %v1823_v0 = vpack.c.bf16 %v1516_v55, %v1516_v55  ;;  %v1517_v46 = vmax.f32 %v1504_v56, 0.0  ;;  %v1444_v45 = vadd.f32 %v2065_v41, %v1443_v34  ;;  %v2212_v49 = vpop.f32.mrb[93].mxu0  ;;  %v3054_v61 = vadd.f32 %v2082_v44, %v2081_v62  ;;  %v2084_v16 = vpop.f32.mrb[106].mxu1 }
 0x1b0   :  { %v1446_v10 = vpop.f32.mrb[94].mxu0  ;;  %v2085_v47 = vpop.f32.mrb[107].mxu1 }
 0x1b1   :  { %1583 = vst.msk [vmem:[%s3128_s3 + $0x8] sm:$0xf] %vm1580_vm2, %v1823_v0  ;;  %v1824_v13 = vpack.c.bf16 %v1517_v46, %v1517_v46  ;;  %v1485_v48 = vmax.f32 %v2983_v15, %v1444_v45  ;;  %v1447_v52 = vadd.f32 %v2068_v9, %v1446_v10  ;;  %v2213_v43 = vpop.f32.mrb[95].mxu0  ;;  %v3061_v12 = vadd.f32 %v2085_v47, %v2084_v16 }
 0x1b3   :  { %1584 = vst.msk [vmem:[%s3128_s3 + $0xc] sm:$0xf] %vm1580_vm2, %v1824_v13  ;;  %v1505_v41 = vadd.f32 %v3030_v36, %v1485_v48  ;;  %v1486_v6 = vmax.f32 %v2988_v17, %v1447_v52 }
 0x1b5   :  { %v1518_v50 = vmax.f32 %v1505_v41, 0.0  ;;  %v1506_v14 = vadd.f32 %v3030_v36, %v1486_v6  ;;  %v2087_v5 = vpop.f32.mrb[108].mxu1 }
 0x1b6   :  { %v1451_v18 = vpop.f32.mrb[96].mxu0  ;;  %v2088_v30 = vpop.f32.mrb[109].mxu1 }
 0x1b7   :  { %v1825_v15 = vpack.c.bf16 %v1518_v50, %v1518_v50  ;;  %v1519_v9 = vmax.f32 %v1506_v14, 0.0  ;;  %v1452_v31 = vadd.f32 %v3025_v19, %v1451_v18  ;;  %v2216_v23 = vpop.f32.mrb[97].mxu0  ;;  %v2089_v59 = vadd.f32 %v2088_v30, %v2087_v5  ;;  %v2090_v38 = vpop.f32.mrb[110].mxu1 }
 0x1b8   :  { %v1454_v57 = vpop.f32.mrb[98].mxu0  ;;  %v2091_v63 = vpop.f32.mrb[111].mxu1 }
 0x1b9   :  { %1585 = vst.msk [vmem:[%s3128_s3 + $0x10] sm:$0xf] %vm1580_vm2, %v1825_v15  ;;  %v1826_v17 = vpack.c.bf16 %v1519_v9, %v1519_v9  ;;  %v1487_v1 = vmax.f32 %v2993_v27, %v1452_v31  ;;  %v1455_v8 = vadd.f32 %v3033_v2, %v1454_v57  ;;  %v2217_v40 = vpop.f32.mrb[99].mxu0 }
 0x1bb   :  { %1586 = vst.msk [vmem:[%s3128_s3 + $0x14] sm:$0xf] %vm1580_vm2, %v1826_v17  ;;  %v1507_v19 = vadd.f32 %v3030_v36, %v1487_v1  ;;  %v1488_v58 = vmax.f32 %v2998_v28, %v1455_v8 }
 0x1bd   :  { %v1520_v42 = vmax.f32 %v1507_v19, 0.0  ;;  %v1508_v35 = vadd.f32 %v3030_v36, %v1488_v58  ;;  %v1475_v54 = vpop.f32.mrb[112].mxu1 }
 0x1be   :  { %v1476_v26 = vadd.f32 %v2089_v59, %v1475_v54  ;;  %v1459_v32 = vpop.f32.mrb[100].mxu0  ;;  %v2228_v11 = vpop.f32.mrb[113].mxu1 }
 0x1bf   :  { %v1827_v27 = vpack.c.bf16 %v1520_v42, %v1520_v42  ;;  %v1521_v25 = vmax.f32 %v1508_v35, 0.0  ;;  %v1460_v2 = vadd.f32 %v3038_v4, %v1459_v32  ;;  %v2220_v20 = vpop.f32.mrb[101].mxu0  ;;  %v1478_v24 = vpop.f32.mrb[114].mxu1 }
 0x1c0   :  { %v1493_v21 = vmax.f32 %v3023_v7, %v1476_v26  ;;  %v1462_v22 = vpop.f32.mrb[102].mxu0  ;;  %v2229_v3 = vpop.f32.mrb[115].mxu1 }
 0x1c1   :  { %1587 = vst.msk [vmem:[%s3128_s3 + $0x18] sm:$0xf] %vm1580_vm2, %v1827_v27  ;;  %v1828_v28 = vpack.c.bf16 %v1521_v25, %v1521_v25  ;;  %v1489_v29 = vmax.f32 %v3003_v37, %v1460_v2  ;;  %v1463_v60 = vadd.f32 %v3045_v33, %v1462_v22  ;;  %v2221_v55 = vpop.f32.mrb[103].mxu0 }
 0x1c2   :  { %v1513_v56 = vadd.f32 %v3030_v36, %v1493_v21 }
 0x1c3   :  { %1588 = vst.msk [vmem:[%s3128_s3 + $0x1c] sm:$0xf] %vm1580_vm2, %v1828_v28  ;;  %v1509_v7 = vadd.f32 %v3030_v36, %v1489_v29  ;;  %v1490_v4 = vmax.f32 %v3008_v39, %v1463_v60 }
 0x1c4   :  { %v1526_v62 = vmax.f32 %v1513_v56, 0.0 }
 0x1c5   :  { %v1522_v34 = vmax.f32 %v1509_v7, 0.0  ;;  %v1510_v44 = vadd.f32 %v3030_v36, %v1490_v4 }
 0x1c6   :  { %v1833_v37 = vpack.c.bf16 %v1526_v62, %v1526_v62  ;;  %v1467_v0 = vpop.f32.mrb[104].mxu0 }
 0x1c7   :  { %v1829_v33 = vpack.c.bf16 %v1522_v34, %v1522_v34  ;;  %v1523_v46 = vmax.f32 %v1510_v44, 0.0  ;;  %v1468_v45 = vadd.f32 %v3054_v61, %v1467_v0  ;;  %v2224_v49 = vpop.f32.mrb[105].mxu0 }
 0x1c8   :  { %1594 = vst.msk [vmem:[%s3128_s3 + $0x30] sm:$0x1] %vm1593_vm3, %v1833_v37  ;;  %v1470_v16 = vpop.f32.mrb[106].mxu0 }
 0x1c9   :  { %1589 = vst.msk [vmem:[%s3128_s3 + $0x20] sm:$0xf] %vm1580_vm2, %v1829_v33  ;;  %v1830_v39 = vpack.c.bf16 %v1523_v46, %v1523_v46  ;;  %v1491_v10 = vmax.f32 %v3013_v51, %v1468_v45  ;;  %v1471_v47 = vadd.f32 %v3061_v12, %v1470_v16  ;;  %v2225_v13 = vpop.f32.mrb[107].mxu0 }
 0x1cb   :  { %1590 = vst.msk [vmem:[%s3128_s3 + $0x24] sm:$0xf] %vm1580_vm2, %v1830_v39  ;;  %v1511_v61 = vadd.f32 %v3030_v36, %v1491_v10  ;;  %v1492_v48 = vmax.f32 %v3018_v53, %v1471_v47 }
 0x1cd   :  { %v1524_v52 = vmax.f32 %v1511_v61, 0.0  ;;  %v1512_v43 = vadd.f32 %v3030_v36, %v1492_v48 }
 0x1cf   :  { %v1831_v41 = vpack.c.bf16 %v1524_v52, %v1524_v52  ;;  %v1525_v6 = vmax.f32 %v1512_v43, 0.0 }
 0x1d1   :  { %1591 = vst.msk [vmem:[%s3128_s3 + $0x28] sm:$0xf] %vm1580_vm2, %v1831_v41  ;;  %v1832_v51 = vpack.c.bf16 %v1525_v6, %v1525_v6 }
 0x1d3   :  { %1592 = vst.msk [vmem:[%s3128_s3 + $0x2c] sm:$0xf] %vm1580_vm2, %v1832_v51 }

// kernel: joint_embedding_forward.6
= control target key start
LH: loop header
LB: loop body
LE: loop exit
PB: predicated region body
PF: predicated region fallthrough
CT: control target
= control target key end

     0   :  { %v433_v27 = vlaneseq  ;;  %v3073_v35 = vmov 1966171168   ;;  %s3764_s0 = inlined_call_operand.vmem [shape: bf16[2,3136], index: 0, kind: input, shape index: {}]   ;;  %s3765_s1 = inlined_call_operand.vmem [shape: bf16[3136,128], index: 1, kind: input, shape index: {}]   ;;  %s3766_s2 = inlined_call_operand.vmem [shape: f32[1,128], index: 2, kind: input, shape index: {}]   ;;  %s3767_s3 = inlined_call_operand.vmem [shape: f32[1,128], index: 3, kind: input, shape index: {}]   ;;  %s3768_s4 = inlined_call_operand.vmem [shape: f32[1,128], index: 4, kind: input, shape index: {}]   ;;  %s3769_s5 = inlined_call_operand.hbm [shape: f32[2,128], index: 5, kind: output, shape index: {}]  }
   0x1   :  { %v2848_v0 = vld [vmem:[%s3765_s1 + $0x40] sm:$0xff]   ;;  %v2852_v4 = vld [vmem:[%s3765_s1 + $0x48] sm:$0xff]   ;;  %v2856_v8 = vld [vmem:[%s3765_s1 + $0x50] sm:$0xff]   ;;  %v431_v36 = vunpack.c.l.s4 %v3073_v35 }
   0x2   :  { %v2849_v1 = vld [vmem:[%s3765_s1] sm:$0xff]   ;;  %2563 = vmatprep.subr.bf16.mxu0 %v2848_v0  ;;  %v2853_v5 = vld [vmem:[%s3765_s1 + $0x8] sm:$0xff]   ;;  %v2857_v9 = vld [vmem:[%s3765_s1 + $0x10] sm:$0xff]   ;;  %v434_v32 = vshrl.u32 %v433_v27, 7 }
   0x3   :  { %v2850_v2 = vld [vmem:[%s3765_s1 + $0xc0] sm:$0xff]   ;;  %2564 = vmatpush3.bf16.msra.mxu0 %v2849_v1  ;;  %v2854_v6 = vld [vmem:[%s3765_s1 + $0xc8] sm:$0xff]   ;;  %v2858_v10 = vld [vmem:[%s3765_s1 + $0xd0] sm:$0xff]   ;;  %v432_v39 = vunpack.c.0.s8 %v431_v36 }
   0x4   :  { %v2851_v3 = vld [vmem:[%s3765_s1 + $0x80] sm:$0xff]   ;;  %2585 = vmatprep.subr.bf16.mxu1 %v2850_v2  ;;  %2565 = vmatprep.subr.bf16.mxu0 %v2852_v4  ;;  %v2855_v7 = vld [vmem:[%s3765_s1 + $0x88] sm:$0xff]   ;;  %v2859_v11 = vld [vmem:[%s3765_s1 + $0x90] sm:$0xff]  }
   0x5   :  { %2586 = vmatpush3.bf16.msra.mxu1 %v2851_v3  ;;  %v2860_v12 = vld [vmem:[%s3765_s1 + $0x58] sm:$0xff]   ;;  %v2864_v16 = vld [vmem:[%s3765_s1 + $0x60] sm:$0xff]   ;;  %v2868_v20 = vld [vmem:[%s3765_s1 + $0x68] sm:$0xff]   ;;  %v3212_v41 = vsub.s32 %v432_v39, %v434_v32 }
   0x6   :  { %2587 = vmatprep.subr.bf16.mxu1 %v2854_v6  ;;  %v2861_v13 = vld [vmem:[%s3765_s1 + $0x18] sm:$0xff]   ;;  %v2865_v17 = vld [vmem:[%s3765_s1 + $0x20] sm:$0xff]   ;;  %v2869_v21 = vld [vmem:[%s3765_s1 + $0x28] sm:$0xff]  }
   0x7   :  { %2566 = vmatpush3.bf16.msra.mxu0 %v2853_v5  ;;  %v2862_v14 = vld [vmem:[%s3765_s1 + $0xd8] sm:$0xff]   ;;  %v2866_v18 = vld [vmem:[%s3765_s1 + $0xe0] sm:$0xff]   ;;  %v2870_v22 = vld [vmem:[%s3765_s1 + $0xe8] sm:$0xff]  }
   0x8   :  { %2567 = vmatprep.subr.bf16.mxu0 %v2856_v8  ;;  %v2863_v15 = vld [vmem:[%s3765_s1 + $0x98] sm:$0xff]   ;;  %v2867_v19 = vld [vmem:[%s3765_s1 + $0xa0] sm:$0xff]   ;;  %v2871_v23 = vld [vmem:[%s3765_s1 + $0xa8] sm:$0xff]  }
   0x9   :  { %2588 = vmatpush3.bf16.msra.mxu1 %v2855_v7  ;;  %v2872_v24 = vld [vmem:[%s3765_s1 + $0x70] sm:$0xff]   ;;  %v2876_v29 = vld [vmem:[%s3765_s1 + $0x78] sm:$0xff]   ;;  %v22_v33 = vld [vmem:[%s3764_s0] sm:$0xff] }
   0xa   :  { %2589 = vmatprep.subr.bf16.mxu1 %v2858_v10  ;;  %v2873_v25 = vld [vmem:[%s3765_s1 + $0x30] sm:$0xff]   ;;  %v2877_v30 = vld [vmem:[%s3765_s1 + $0x38] sm:$0xff]   ;;  %v2881_v37 = vld [vmem:[%s3765_s1 + $0x140] sm:$0xff]   ;;  %v429_v38 = vcombine.high %v22_v33, %v22_v33  ;;  %v436_v42 = vrot.slane %v22_v33, %v3212_v41 }
   0xb   :  { %2568 = vmatpush3.bf16.msra.mxu0 %v2857_v9  ;;  %v2874_v26 = vld [vmem:[%s3765_s1 + $0xf0] sm:$0xff]   ;;  %v2878_v31 = vld [vmem:[%s3765_s1 + $0xf8] sm:$0xff]   ;;  %v2883_v40 = vld [vmem:[%s3765_s1 + $0x1c0] sm:$0xff]  }
   0xc   :  { %2569 = vmatprep.subr.bf16.mxu0 %v2860_v12  ;;  %v2875_v28 = vld [vmem:[%s3765_s1 + $0xb0] sm:$0xff]   ;;  %v2880_v34 = vld [vmem:[%s3765_s1 + $0xb8] sm:$0xff]   ;;  %v3216_v43 = vrot.slane %v429_v38, %v3212_v41  ;;  %v444_v44 = vcombine.high %v436_v42, %v436_v42  ;;  %v452_v45 = vrot.slane %v436_v42, %v3212_v41  ;;  %v2882_v48 = vld [vmem:[%s3765_s1 + $0x100] sm:$0xff]  }
   0xd   :  { %2590 = vmatpush3.bf16.msra.mxu1 %v2859_v11  ;;  %v2885_v51 = vld [vmem:[%s3765_s1 + $0x148] sm:$0xff]   ;;  %v2884_v53 = vld [vmem:[%s3765_s1 + $0x180] sm:$0xff]   ;;  %v2889_v57 = vld [vmem:[%s3765_s1 + $0x150] sm:$0xff]  }
   0xe   :  { %2591 = vmatprep.subr.bf16.mxu1 %v2862_v14  ;;  %v445_v46 = vcombine.high %v3216_v43, %v3216_v43  ;;  %v466_v47 = vrot.slane %v444_v44, %v3212_v41  ;;  %v474_v50 = vcombine.high %v452_v45, %v452_v45  ;;  %v2887_v54 = vld [vmem:[%s3765_s1 + $0x1c8] sm:$0xff]   ;;  %v2891_v59 = vld [vmem:[%s3765_s1 + $0x1d0] sm:$0xff]   ;;  %v2893_v61 = vld [vmem:[%s3765_s1 + $0x158] sm:$0xff]  }
   0xf   :  { %2570 = vmatpush3.bf16.msra.mxu0 %v2861_v13  ;;  %v2886_v56 = vld [vmem:[%s3765_s1 + $0x108] sm:$0xff]   ;;  %v2890_v60 = vld [vmem:[%s3765_s1 + $0x110] sm:$0xff]   ;;  %v2895_v63 = vld [vmem:[%s3765_s1 + $0x1d8] sm:$0xff]  }
  0x10   :  { %2571 = vmatprep.subr.bf16.mxu0 %v2864_v16  ;;  %v473_v49 = vrot.slane %v445_v46, %v3212_v41  ;;  %1826 = vmatprep.mubr.bf16.mxu0 %v466_v47  ;;  %v476_v52 = vcombine.high %v466_v47, %v466_v47  ;;  %v2888_v58 = vld [vmem:[%s3765_s1 + $0x188] sm:$0xff]   ;;  %v2892_v62 = vld [vmem:[%s3765_s1 + $0x190] sm:$0xff]   ;;  %v2894_v0 = vld [vmem:[%s3765_s1 + $0x118] sm:$0xff]  }
  0x11   :  { %2592 = vmatpush3.bf16.msra.mxu1 %v2863_v15  ;;  %v2897_v1 = vld [vmem:[%s3765_s1 + $0x160] sm:$0xff]   ;;  %v2896_v2 = vld [vmem:[%s3765_s1 + $0x198] sm:$0xff]   ;;  %v2901_v5 = vld [vmem:[%s3765_s1 + $0x168] sm:$0xff]  }
  0x12   :  { %2593 = vmatprep.subr.bf16.mxu1 %v2866_v18  ;;  %v477_v55 = vcombine.high %v473_v49, %v473_v49  ;;  %1866 = vmatprep.mubr.bf16.mxu1 %v476_v52  ;;  %v2899_v3 = vld [vmem:[%s3765_s1 + $0x1e0] sm:$0xff]   ;;  %v2903_v7 = vld [vmem:[%s3765_s1 + $0x1e8] sm:$0xff]   ;;  %v2905_v9 = vld [vmem:[%s3765_s1 + $0x170] sm:$0xff]  }
  0x13   :  { %2572 = vmatpush3.bf16.msra.mxu0 %v2865_v17  ;;  %v2898_v4 = vld [vmem:[%s3765_s1 + $0x120] sm:$0xff]   ;;  %v2902_v8 = vld [vmem:[%s3765_s1 + $0x128] sm:$0xff]   ;;  %v2907_v11 = vld [vmem:[%s3765_s1 + $0x1f0] sm:$0xff]   ;;  %v459_v17 = vrot.slane %v3216_v43, %v3212_v41 }
  0x14   :  { %2573 = vmatprep.subr.bf16.mxu0 %v2868_v20  ;;  %v2900_v6 = vld [vmem:[%s3765_s1 + $0x1a0] sm:$0xff]   ;;  %v2904_v10 = vld [vmem:[%s3765_s1 + $0x1a8] sm:$0xff]   ;;  %v2906_v12 = vld [vmem:[%s3765_s1 + $0x130] sm:$0xff]  }
  0x15   :  { %2594 = vmatpush3.bf16.msra.mxu1 %v2867_v19  ;;  %v2909_v13 = vld [vmem:[%s3765_s1 + $0x178] sm:$0xff]   ;;  %v2908_v14 = vld [vmem:[%s3765_s1 + $0x1b0] sm:$0xff]   ;;  %v2913_v18 = vld [vmem:[%s3765_s1 + $0x240] sm:$0xff]  }
  0x16   :  { %2595 = vmatprep.subr.bf16.mxu1 %v2870_v22  ;;  %v2911_v15 = vld [vmem:[%s3765_s1 + $0x1f8] sm:$0xff]   ;;  %v2915_v20 = vld [vmem:[%s3765_s1 + $0x2c0] sm:$0xff]   ;;  %v475_v22 = vcombine.high %v459_v17, %v459_v17  ;;  %v2921_v27 = vld [vmem:[%s3765_s1 + $0x250] sm:$0xff]  }
  0x17   :  { %2574 = vmatpush3.bf16.msra.mxu0 %v2869_v21  ;;  %v2910_v16 = vld [vmem:[%s3765_s1 + $0x138] sm:$0xff]   ;;  %v2914_v21 = vld [vmem:[%s3765_s1 + $0x200] sm:$0xff]   ;;  %v2924_v32 = vld [vmem:[%s3765_s1 + $0x290] sm:$0xff]  }
  0x18   :  { %2575 = vmatprep.subr.bf16.mxu0 %v2872_v24  ;;  %v2912_v19 = vld [vmem:[%s3765_s1 + $0x1b8] sm:$0xff]   ;;  %v2916_v24 = vld [vmem:[%s3765_s1 + $0x280] sm:$0xff]   ;;  %v2933_v39 = vld [vmem:[%s3765_s1 + $0x268] sm:$0xff]  }
  0x19   :  { %2596 = vmatpush3.bf16.msra.mxu1 %v2871_v23  ;;  %v2917_v23 = vld [vmem:[%s3765_s1 + $0x248] sm:$0xff]   ;;  %v2927_v33 = vld [vmem:[%s3765_s1 + $0x2d8] sm:$0xff]   ;;  %v2929_v35 = vld [vmem:[%s3765_s1 + $0x260] sm:$0xff]  }
  0x1a   :  { %2597 = vmatprep.subr.bf16.mxu1 %v2874_v26  ;;  %v2918_v26 = vld [vmem:[%s3765_s1 + $0x208] sm:$0xff]   ;;  %v2928_v36 = vld [vmem:[%s3765_s1 + $0x298] sm:$0xff]   ;;  %v2930_v38 = vld [vmem:[%s3765_s1 + $0x220] sm:$0xff]  }
  0x1b   :  { %2576 = vmatpush3.bf16.msra.mxu0 %v2873_v25  ;;  %v2919_v25 = vld [vmem:[%s3765_s1 + $0x2c8] sm:$0xff]   ;;  %v2937_v44 = vld [vmem:[%s3765_s1 + $0x270] sm:$0xff]  }
  0x1c   :  { %2577 = vmatprep.subr.bf16.mxu0 %v2876_v29  ;;  %v2923_v29 = vld [vmem:[%s3765_s1 + $0x2d0] sm:$0xff]   ;;  %v2935_v42 = vld [vmem:[%s3765_s1 + $0x2e8] sm:$0xff]  }
  0x1d   :  { %2598 = vmatpush3.bf16.msra.mxu1 %v2875_v28  ;;  %v2920_v28 = vld [vmem:[%s3765_s1 + $0x288] sm:$0xff]  }
  0x1e   :  { %2599 = vmatprep.subr.bf16.mxu1 %v2878_v31  ;;  %v2925_v31 = vld [vmem:[%s3765_s1 + $0x258] sm:$0xff]   ;;  %v2934_v43 = vld [vmem:[%s3765_s1 + $0x228] sm:$0xff]  }
  0x1f   :  { %2578 = vmatpush3.bf16.msra.mxu0 %v2877_v30  ;;  %v2922_v30 = vld [vmem:[%s3765_s1 + $0x210] sm:$0xff]   ;;  %v2936_v46 = vld [vmem:[%s3765_s1 + $0x2a8] sm:$0xff]  }
  0x20   :  { %2607 = vmatprep.subr.bf16.mxu0 %v2881_v37  ;;  %v2931_v37 = vld [vmem:[%s3765_s1 + $0x2e0] sm:$0xff]  }
  0x21   :  { %2600 = vmatpush3.bf16.msra.mxu1 %v2880_v34  ;;  %v2926_v34 = vld [vmem:[%s3765_s1 + $0x218] sm:$0xff]  }
  0x22   :  { %2629 = vmatprep.subr.bf16.mxu1 %v2883_v40  ;;  %1827 = vmatmul.mubr.bf16.vlgmr.msra.gmra.mrb[0].mxu0 %v452_v45  ;;  %v2932_v40 = vld [vmem:[%s3765_s1 + $0x2a0] sm:$0xff]   ;;  %v23_v45 = vld [vmem:[%s3764_s0 + $0x8] sm:$0xff] }
  0x23   :  { %2608 = vmatpush3.bf16.msra.mxu0 %v2882_v48  ;;  %1906 = vmatprep.mubr.bf16.mxu0 %v473_v49  ;;  %v485_v47 = vrot.slane %v23_v45, %v3212_v41  ;;  %v478_v48 = vcombine.high %v23_v45, %v23_v45  ;;  %v2939_v49 = vld [vmem:[%s3765_s1 + $0x2f0] sm:$0xff]  }
  0x24   :  { %1867 = vmatmul.mubr.bf16.vlgmr.msra.gmra.mrb[0].mxu1 %v474_v50  ;;  %2609 = vmatprep.subr.bf16.mxu0 %v2885_v51  ;;  %v2938_v50 = vld [vmem:[%s3765_s1 + $0x230] sm:$0xff]  }
  0x25   :  { %2630 = vmatpush3.bf16.msra.mxu1 %v2884_v53  ;;  %1946 = vmatprep.mubr.bf16.mxu1 %v477_v55  ;;  %v493_v51 = vcombine.high %v485_v47, %v485_v47  ;;  %v3401_v52 = vrot.slane %v478_v48, %v3212_v41  ;;  %v2941_v53 = vld [vmem:[%s3765_s1 + $0x278] sm:$0xff]   ;;  %v2988_v45 = vld [vmem:[%s3765_s1 + $0x4d0] sm:$0xff]  }
  0x26   :  { %2631 = vmatprep.subr.bf16.mxu1 %v2887_v54  ;;  %v2940_v54 = vld [vmem:[%s3765_s1 + $0x2b0] sm:$0xff]  }
  0x27   :  { %2610 = vmatpush3.bf16.msra.mxu0 %v2886_v56  ;;  %v515_v55 = vrot.slane %v493_v51, %v3212_v41  ;;  %v494_v56 = vcombine.high %v3401_v52, %v3401_v52  ;;  %v2989_v48 = vld [vmem:[%s3765_s1 + $0x490] sm:$0xff]   ;;  %v2994_v51 = vld [vmem:[%s3765_s1 + $0x460] sm:$0xff]  }
  0x28   :  { %2611 = vmatprep.subr.bf16.mxu0 %v2889_v57  ;;  %v2943_v57 = vld [vmem:[%s3765_s1 + $0x2f8] sm:$0xff]  }
  0x29   :  { %2632 = vmatpush3.bf16.msra.mxu1 %v2888_v58  ;;  %v2942_v58 = vld [vmem:[%s3765_s1 + $0x238] sm:$0xff]  }
  0x2a   :  { %2633 = vmatprep.subr.bf16.mxu1 %v2891_v59  ;;  %v525_v59 = vcombine.high %v515_v55, %v515_v55 }
  0x2b   :  { %2612 = vmatpush3.bf16.msra.mxu0 %v2890_v60  ;;  %v501_v60 = vrot.slane %v485_v47, %v3212_v41  ;;  %v2990_v47 = vld [vmem:[%s3765_s1 + $0x458] sm:$0xff]  }
  0x2c   :  { %2613 = vmatprep.subr.bf16.mxu0 %v2893_v61  ;;  %v2945_v61 = vld [vmem:[%s3765_s1 + $0x340] sm:$0xff]  }
  0x2d   :  { %2634 = vmatpush3.bf16.msra.mxu1 %v2892_v62  ;;  %v2944_v62 = vld [vmem:[%s3765_s1 + $0x2b8] sm:$0xff]  }
  0x2e   :  { %2635 = vmatprep.subr.bf16.mxu1 %v2895_v63  ;;  %v522_v63 = vrot.slane %v494_v56, %v3212_v41  ;;  %v2997_v56 = vld [vmem:[%s3765_s1 + $0x4a0] sm:$0xff]  }
  0x2f   :  { %2614 = vmatpush3.bf16.msra.mxu0 %v2894_v0  ;;  %v2947_v0 = vld [vmem:[%s3765_s1 + $0x3c0] sm:$0xff]  }
  0x30   :  { %2615 = vmatprep.subr.bf16.mxu0 %v2897_v1  ;;  %v2946_v1 = vld [vmem:[%s3765_s1 + $0x300] sm:$0xff]  }
  0x31   :  { %2636 = vmatpush3.bf16.msra.mxu1 %v2896_v2  ;;  %v523_v2 = vcombine.high %v501_v60, %v501_v60 }
  0x32   :  { %2637 = vmatprep.subr.bf16.mxu1 %v2899_v3  ;;  %v2949_v3 = vld [vmem:[%s3765_s1 + $0x348] sm:$0xff]  }
  0x33   :  { %2616 = vmatpush3.bf16.msra.mxu0 %v2898_v4  ;;  %v2948_v4 = vld [vmem:[%s3765_s1 + $0x380] sm:$0xff]  }
  0x34   :  { %2617 = vmatprep.subr.bf16.mxu0 %v2901_v5  ;;  %v526_v5 = vcombine.high %v522_v63, %v522_v63 }
  0x35   :  { %2638 = vmatpush3.bf16.msra.mxu1 %v2900_v6  ;;  %v2951_v6 = vld [vmem:[%s3765_s1 + $0x3c8] sm:$0xff]  }
  0x36   :  { %2639 = vmatprep.subr.bf16.mxu1 %v2903_v7  ;;  %v2950_v7 = vld [vmem:[%s3765_s1 + $0x308] sm:$0xff]  }
  0x37   :  { %2618 = vmatpush3.bf16.msra.mxu0 %v2902_v8  ;;  %v2953_v8 = vld [vmem:[%s3765_s1 + $0x350] sm:$0xff]  }
  0x38   :  { %2619 = vmatprep.subr.bf16.mxu0 %v2905_v9  ;;  %v2952_v9 = vld [vmem:[%s3765_s1 + $0x388] sm:$0xff]  }
  0x39   :  { %2640 = vmatpush3.bf16.msra.mxu1 %v2904_v10  ;;  %v2955_v10 = vld [vmem:[%s3765_s1 + $0x3d0] sm:$0xff]  }
  0x3a   :  { %2641 = vmatprep.subr.bf16.mxu1 %v2907_v11  ;;  %v2954_v11 = vld [vmem:[%s3765_s1 + $0x310] sm:$0xff]  }
  0x3b   :  { %2620 = vmatpush3.bf16.msra.mxu0 %v2906_v12  ;;  %v2957_v12 = vld [vmem:[%s3765_s1 + $0x358] sm:$0xff]  }
  0x3c   :  { %2621 = vmatprep.subr.bf16.mxu0 %v2909_v13  ;;  %v2956_v13 = vld [vmem:[%s3765_s1 + $0x390] sm:$0xff]  }
  0x3d   :  { %2642 = vmatpush3.bf16.msra.mxu1 %v2908_v14  ;;  %v2959_v14 = vld [vmem:[%s3765_s1 + $0x3d8] sm:$0xff]  }
  0x3e   :  { %2643 = vmatprep.subr.bf16.mxu1 %v2911_v15  ;;  %v2958_v15 = vld [vmem:[%s3765_s1 + $0x318] sm:$0xff]  }
  0x3f   :  { %2622 = vmatpush3.bf16.msra.mxu0 %v2910_v16  ;;  %v2961_v16 = vld [vmem:[%s3765_s1 + $0x360] sm:$0xff]  }
  0x40   :  { %2651 = vmatprep.subr.bf16.mxu0 %v2913_v18  ;;  %v2963_v18 = vld [vmem:[%s3765_s1 + $0x3e0] sm:$0xff]  }
  0x41   :  { %2644 = vmatpush3.bf16.msra.mxu1 %v2912_v19  ;;  %v2962_v19 = vld [vmem:[%s3765_s1 + $0x320] sm:$0xff]  }
  0x42   :  { %1907 = vmatmul.mubr.bf16.vlgmr.msra.gmra.mrb[4].mxu0 %v459_v17  ;;  %2673 = vmatprep.subr.bf16.mxu1 %v2915_v20  ;;  %v2960_v17 = vld [vmem:[%s3765_s1 + $0x398] sm:$0xff]   ;;  %v2965_v20 = vld [vmem:[%s3765_s1 + $0x368] sm:$0xff]  }
  0x43   :  { %2652 = vmatpush3.bf16.msra.mxu0 %v2914_v21  ;;  %1986 = vmatprep.mubr.bf16.mxu0 %v515_v55  ;;  %v2964_v21 = vld [vmem:[%s3765_s1 + $0x3a0] sm:$0xff]   ;;  %v2998_v55 = vld [vmem:[%s3765_s1 + $0x468] sm:$0xff]  }
  0x44   :  { %1947 = vmatmul.mubr.bf16.vlgmr.msra.gmra.mrb[4].mxu1 %v475_v22  ;;  %2653 = vmatprep.subr.bf16.mxu0 %v2917_v23  ;;  %v2967_v22 = vld [vmem:[%s3765_s1 + $0x3e8] sm:$0xff]  }
  0x45   :  { %2674 = vmatpush3.bf16.msra.mxu1 %v2916_v24  ;;  %2026 = vmatprep.mubr.bf16.mxu1 %v525_v59  ;;  %v2966_v23 = vld [vmem:[%s3765_s1 + $0x328] sm:$0xff]   ;;  %v2969_v24 = vld [vmem:[%s3765_s1 + $0x370] sm:$0xff]  }
  0x46   :  { %2675 = vmatprep.subr.bf16.mxu1 %v2919_v25  ;;  %v2968_v25 = vld [vmem:[%s3765_s1 + $0x3a8] sm:$0xff]   ;;  %v3002_v59 = vld [vmem:[%s3765_s1 + $0x470] sm:$0xff]  }
  0x47   :  { %2654 = vmatpush3.bf16.msra.mxu0 %v2918_v26  ;;  %v2971_v26 = vld [vmem:[%s3765_s1 + $0x3f0] sm:$0xff]  }
  0x48   :  { %2655 = vmatprep.subr.bf16.mxu0 %v2921_v27  ;;  %v2970_v27 = vld [vmem:[%s3765_s1 + $0x330] sm:$0xff]  }
  0x49   :  { %2676 = vmatpush3.bf16.msra.mxu1 %v2920_v28  ;;  %v2973_v28 = vld [vmem:[%s3765_s1 + $0x378] sm:$0xff]  }
  0x4a   :  { %2677 = vmatprep.subr.bf16.mxu1 %v2923_v29  ;;  %v2972_v29 = vld [vmem:[%s3765_s1 + $0x3b0] sm:$0xff]  }
  0x4b   :  { %2656 = vmatpush3.bf16.msra.mxu0 %v2922_v30  ;;  %v2975_v30 = vld [vmem:[%s3765_s1 + $0x3f8] sm:$0xff]  }
  0x4c   :  { %2657 = vmatprep.subr.bf16.mxu0 %v2925_v31  ;;  %v2974_v31 = vld [vmem:[%s3765_s1 + $0x338] sm:$0xff]  }
  0x4d   :  { %2678 = vmatpush3.bf16.msra.mxu1 %v2924_v32  ;;  %v508_v32 = vrot.slane %v3401_v52, %v3212_v41  ;;  %v2993_v52 = vld [vmem:[%s3765_s1 + $0x498] sm:$0xff]  }
  0x4e   :  { %2679 = vmatprep.subr.bf16.mxu1 %v2927_v33  ;;  %v2978_v33 = vld [vmem:[%s3765_s1 + $0x440] sm:$0xff]  }
  0x4f   :  { %2658 = vmatpush3.bf16.msra.mxu0 %v2926_v34  ;;  %v2977_v34 = vld [vmem:[%s3765_s1 + $0x3b8] sm:$0xff]  }
  0x50   :  { %2659 = vmatprep.subr.bf16.mxu0 %v2929_v35  ;;  %v2980_v35 = vld [vmem:[%s3765_s1 + $0x4c0] sm:$0xff]  }
  0x51   :  { %2680 = vmatpush3.bf16.msra.mxu1 %v2928_v36  ;;  %v2979_v36 = vld [vmem:[%s3765_s1 + $0x400] sm:$0xff]  }
  0x52   :  { %2681 = vmatprep.subr.bf16.mxu1 %v2931_v37  ;;  %v524_v37 = vcombine.high %v508_v32, %v508_v32 }
  0x53   :  { %2660 = vmatpush3.bf16.msra.mxu0 %v2930_v38  ;;  %v2982_v38 = vld [vmem:[%s3765_s1 + $0x448] sm:$0xff]  }
  0x54   :  { %2661 = vmatprep.subr.bf16.mxu0 %v2933_v39  ;;  %v2981_v39 = vld [vmem:[%s3765_s1 + $0x480] sm:$0xff]  }
  0x55   :  { %2682 = vmatpush3.bf16.msra.mxu1 %v2932_v40  ;;  %v2984_v40 = vld [vmem:[%s3765_s1 + $0x4c8] sm:$0xff]  }
  0x56   :  { %2683 = vmatprep.subr.bf16.mxu1 %v2935_v42  ;;  %v2983_v42 = vld [vmem:[%s3765_s1 + $0x408] sm:$0xff]  }
  0x57   :  { %2662 = vmatpush3.bf16.msra.mxu0 %v2934_v43  ;;  %v2986_v43 = vld [vmem:[%s3765_s1 + $0x450] sm:$0xff]  }
  0x58   :  { %2663 = vmatprep.subr.bf16.mxu0 %v2937_v44  ;;  %v2985_v44 = vld [vmem:[%s3765_s1 + $0x488] sm:$0xff]  }
  0x59   :  { %2684 = vmatpush3.bf16.msra.mxu1 %v2936_v46  ;;  %v2987_v46 = vld [vmem:[%s3765_s1 + $0x410] sm:$0xff]  }
  0x5a   :  { %2685 = vmatprep.subr.bf16.mxu1 %v2939_v49  ;;  %v2992_v49 = vld [vmem:[%s3765_s1 + $0x4d8] sm:$0xff]  }
  0x5b   :  { %2664 = vmatpush3.bf16.msra.mxu0 %v2938_v50  ;;  %v2991_v50 = vld [vmem:[%s3765_s1 + $0x418] sm:$0xff]  }
  0x5c   :  { %2665 = vmatprep.subr.bf16.mxu0 %v2941_v53  ;;  %v2996_v53 = vld [vmem:[%s3765_s1 + $0x4e0] sm:$0xff]  }
  0x5d   :  { %2686 = vmatpush3.bf16.msra.mxu1 %v2940_v54  ;;  %v2995_v54 = vld [vmem:[%s3765_s1 + $0x420] sm:$0xff]  }
  0x5e   :  { %2687 = vmatprep.subr.bf16.mxu1 %v2943_v57  ;;  %v3000_v57 = vld [vmem:[%s3765_s1 + $0x4e8] sm:$0xff]  }
  0x5f   :  { %2666 = vmatpush3.bf16.msra.mxu0 %v2942_v58  ;;  %v2999_v58 = vld [vmem:[%s3765_s1 + $0x428] sm:$0xff]  }
  0x60   :  { %2695 = vmatprep.subr.bf16.mxu0 %v2945_v61  ;;  %v3001_v61 = vld [vmem:[%s3765_s1 + $0x4a8] sm:$0xff]  }
  0x61   :  { %2688 = vmatpush3.bf16.msra.mxu1 %v2944_v62 }
  0x62   :  { %1987 = vmatmul.mubr.bf16.vlgmr.msra.gmra.mrb[8].mxu0 %v501_v60  ;;  %2717 = vmatprep.subr.bf16.mxu1 %v2947_v0  ;;  %v24_v60 = vld [vmem:[%s3764_s0 + $0x10] sm:$0xff] }
  0x63   :  { %2696 = vmatpush3.bf16.msra.mxu0 %v2946_v1  ;;  %2066 = vmatprep.mubr.bf16.mxu0 %v522_v63  ;;  %v534_v62 = vrot.slane %v24_v60, %v3212_v41  ;;  %v527_v63 = vcombine.high %v24_v60, %v24_v60  ;;  %v3004_v0 = vld [vmem:[%s3765_s1 + $0x4f0] sm:$0xff]  }
  0x64   :  { %2027 = vmatmul.mubr.bf16.vlgmr.msra.gmra.mrb[8].mxu1 %v523_v2  ;;  %2697 = vmatprep.subr.bf16.mxu0 %v2949_v3  ;;  %v3003_v1 = vld [vmem:[%s3765_s1 + $0x430] sm:$0xff]  }
  0x65   :  { %2718 = vmatpush3.bf16.msra.mxu1 %v2948_v4  ;;  %2106 = vmatprep.mubr.bf16.mxu1 %v526_v5  ;;  %v542_v2 = vcombine.high %v534_v62, %v534_v62  ;;  %v3607_v3 = vrot.slane %v527_v63, %v3212_v41  ;;  %v3006_v4 = vld [vmem:[%s3765_s1 + $0x478] sm:$0xff]   ;;  %v3005_v5 = vld [vmem:[%s3765_s1 + $0x4b0] sm:$0xff]  }
  0x66   :  { %2719 = vmatprep.subr.bf16.mxu1 %v2951_v6 }
  0x67   :  { %2698 = vmatpush3.bf16.msra.mxu0 %v2950_v7  ;;  %v564_v6 = vrot.slane %v542_v2, %v3212_v41  ;;  %v543_v7 = vcombine.high %v3607_v3, %v3607_v3 }
  0x68   :  { %2699 = vmatprep.subr.bf16.mxu0 %v2953_v8  ;;  %v3008_v8 = vld [vmem:[%s3765_s1 + $0x4f8] sm:$0xff]  }
  0x69   :  { %2720 = vmatpush3.bf16.msra.mxu1 %v2952_v9  ;;  %v3007_v9 = vld [vmem:[%s3765_s1 + $0x438] sm:$0xff]  }
  0x6a   :  { %2721 = vmatprep.subr.bf16.mxu1 %v2955_v10  ;;  %v574_v10 = vcombine.high %v564_v6, %v564_v6 }
  0x6b   :  { %2700 = vmatpush3.bf16.msra.mxu0 %v2954_v11  ;;  %v550_v11 = vrot.slane %v534_v62, %v3212_v41 }
  0x6c   :  { %2701 = vmatprep.subr.bf16.mxu0 %v2957_v12  ;;  %v3010_v12 = vld [vmem:[%s3765_s1 + $0x540] sm:$0xff]  }
  0x6d   :  { %2722 = vmatpush3.bf16.msra.mxu1 %v2956_v13  ;;  %v3009_v13 = vld [vmem:[%s3765_s1 + $0x4b8] sm:$0xff]  }
  0x6e   :  { %2723 = vmatprep.subr.bf16.mxu1 %v2959_v14  ;;  %v571_v14 = vrot.slane %v543_v7, %v3212_v41 }
  0x6f   :  { %2702 = vmatpush3.bf16.msra.mxu0 %v2958_v15  ;;  %v3012_v15 = vld [vmem:[%s3765_s1 + $0x5c0] sm:$0xff]  }
  0x70   :  { %2703 = vmatprep.subr.bf16.mxu0 %v2961_v16  ;;  %v3011_v16 = vld [vmem:[%s3765_s1 + $0x500] sm:$0xff]  }
  0x71   :  { %2724 = vmatpush3.bf16.msra.mxu1 %v2960_v17  ;;  %v572_v17 = vcombine.high %v550_v11, %v550_v11 }
  0x72   :  { %2725 = vmatprep.subr.bf16.mxu1 %v2963_v18  ;;  %v3014_v18 = vld [vmem:[%s3765_s1 + $0x548] sm:$0xff]  }
  0x73   :  { %2704 = vmatpush3.bf16.msra.mxu0 %v2962_v19  ;;  %v3013_v19 = vld [vmem:[%s3765_s1 + $0x580] sm:$0xff]  }
  0x74   :  { %2705 = vmatprep.subr.bf16.mxu0 %v2965_v20  ;;  %v575_v20 = vcombine.high %v571_v14, %v571_v14 }
  0x75   :  { %2726 = vmatpush3.bf16.msra.mxu1 %v2964_v21  ;;  %v3016_v21 = vld [vmem:[%s3765_s1 + $0x5c8] sm:$0xff]  }
  0x76   :  { %2727 = vmatprep.subr.bf16.mxu1 %v2967_v22  ;;  %v3015_v22 = vld [vmem:[%s3765_s1 + $0x508] sm:$0xff]  }
  0x77   :  { %2706 = vmatpush3.bf16.msra.mxu0 %v2966_v23  ;;  %v3018_v23 = vld [vmem:[%s3765_s1 + $0x550] sm:$0xff]  }
  0x78   :  { %2707 = vmatprep.subr.bf16.mxu0 %v2969_v24  ;;  %v3017_v24 = vld [vmem:[%s3765_s1 + $0x588] sm:$0xff]  }
  0x79   :  { %2728 = vmatpush3.bf16.msra.mxu1 %v2968_v25  ;;  %v3020_v25 = vld [vmem:[%s3765_s1 + $0x5d0] sm:$0xff]  }
  0x7a   :  { %2729 = vmatprep.subr.bf16.mxu1 %v2971_v26  ;;  %v3019_v26 = vld [vmem:[%s3765_s1 + $0x510] sm:$0xff]  }
  0x7b   :  { %2708 = vmatpush3.bf16.msra.mxu0 %v2970_v27  ;;  %v3022_v27 = vld [vmem:[%s3765_s1 + $0x558] sm:$0xff]  }
  0x7c   :  { %2709 = vmatprep.subr.bf16.mxu0 %v2973_v28  ;;  %v3021_v28 = vld [vmem:[%s3765_s1 + $0x590] sm:$0xff]  }
  0x7d   :  { %2730 = vmatpush3.bf16.msra.mxu1 %v2972_v29  ;;  %v3024_v29 = vld [vmem:[%s3765_s1 + $0x5d8] sm:$0xff]  }
  0x7e   :  { %2731 = vmatprep.subr.bf16.mxu1 %v2975_v30  ;;  %v3023_v30 = vld [vmem:[%s3765_s1 + $0x518] sm:$0xff]  }
  0x7f   :  { %2710 = vmatpush3.bf16.msra.mxu0 %v2974_v31  ;;  %v3026_v31 = vld [vmem:[%s3765_s1 + $0x560] sm:$0xff]  }
  0x80   :  { %2739 = vmatprep.subr.bf16.mxu0 %v2978_v33  ;;  %v3028_v33 = vld [vmem:[%s3765_s1 + $0x5e0] sm:$0xff]  }
  0x81   :  { %2732 = vmatpush3.bf16.msra.mxu1 %v2977_v34  ;;  %v3027_v34 = vld [vmem:[%s3765_s1 + $0x520] sm:$0xff]  }
  0x82   :  { %2067 = vmatmul.mubr.bf16.vlgmr.msra.gmra.mrb[12].mxu0 %v508_v32  ;;  %2761 = vmatprep.subr.bf16.mxu1 %v2980_v35  ;;  %v3025_v32 = vld [vmem:[%s3765_s1 + $0x598] sm:$0xff]   ;;  %v3030_v35 = vld [vmem:[%s3765_s1 + $0x568] sm:$0xff]  }
  0x83   :  { %2740 = vmatpush3.bf16.msra.mxu0 %v2979_v36  ;;  %2146 = vmatprep.mubr.bf16.mxu0 %v564_v6  ;;  %v3029_v36 = vld [vmem:[%s3765_s1 + $0x5a0] sm:$0xff]  }
  0x84   :  { %2107 = vmatmul.mubr.bf16.vlgmr.msra.gmra.mrb[12].mxu1 %v524_v37  ;;  %2741 = vmatprep.subr.bf16.mxu0 %v2982_v38  ;;  %v3032_v37 = vld [vmem:[%s3765_s1 + $0x5e8] sm:$0xff]  }
  0x85   :  { %2762 = vmatpush3.bf16.msra.mxu1 %v2981_v39  ;;  %2186 = vmatprep.mubr.bf16.mxu1 %v574_v10  ;;  %v3031_v38 = vld [vmem:[%s3765_s1 + $0x528] sm:$0xff]   ;;  %v3034_v39 = vld [vmem:[%s3765_s1 + $0x570] sm:$0xff]  }
  0x86   :  { %2763 = vmatprep.subr.bf16.mxu1 %v2984_v40  ;;  %v3033_v40 = vld [vmem:[%s3765_s1 + $0x5a8] sm:$0xff]  }
  0x87   :  { %2742 = vmatpush3.bf16.msra.mxu0 %v2983_v42  ;;  %v3036_v42 = vld [vmem:[%s3765_s1 + $0x5f0] sm:$0xff]  }
  0x88   :  { %2743 = vmatprep.subr.bf16.mxu0 %v2986_v43  ;;  %v3035_v43 = vld [vmem:[%s3765_s1 + $0x530] sm:$0xff]  }
  0x89   :  { %2764 = vmatpush3.bf16.msra.mxu1 %v2985_v44  ;;  %v3038_v44 = vld [vmem:[%s3765_s1 + $0x578] sm:$0xff]  }
  0x8a   :  { %2765 = vmatprep.subr.bf16.mxu1 %v2988_v45  ;;  %v3037_v45 = vld [vmem:[%s3765_s1 + $0x5b0] sm:$0xff]  }
  0x8b   :  { %2744 = vmatpush3.bf16.msra.mxu0 %v2987_v46  ;;  %v3040_v46 = vld [vmem:[%s3765_s1 + $0x5f8] sm:$0xff]  }
  0x8c   :  { %2745 = vmatprep.subr.bf16.mxu0 %v2990_v47  ;;  %v3039_v47 = vld [vmem:[%s3765_s1 + $0x538] sm:$0xff]  }
  0x8d   :  { %2766 = vmatpush3.bf16.msra.mxu1 %v2989_v48 }
  0x8e   :  { %2767 = vmatprep.subr.bf16.mxu1 %v2992_v49 }
  0x8f   :  { %2746 = vmatpush3.bf16.msra.mxu0 %v2991_v50 }
  0x90   :  { %2747 = vmatprep.subr.bf16.mxu0 %v2994_v51 }
  0x91   :  { %2768 = vmatpush3.bf16.msra.mxu1 %v2993_v52 }
  0x92   :  { %2769 = vmatprep.subr.bf16.mxu1 %v2996_v53 }
  0x93   :  { %2748 = vmatpush3.bf16.msra.mxu0 %v2995_v54 }
  0x94   :  { %2749 = vmatprep.subr.bf16.mxu0 %v2998_v55 }
  0x95   :  { %2770 = vmatpush3.bf16.msra.mxu1 %v2997_v56 }
  0x96   :  { %2771 = vmatprep.subr.bf16.mxu1 %v3000_v57 }
  0x97   :  { %2750 = vmatpush3.bf16.msra.mxu0 %v2999_v58 }
  0x98   :  { %2751 = vmatprep.subr.bf16.mxu0 %v3002_v59 }
  0x99   :  { %2772 = vmatpush3.bf16.msra.mxu1 %v3001_v61 }
  0x9a   :  { %2773 = vmatprep.subr.bf16.mxu1 %v3004_v0 }
  0x9b   :  { %2752 = vmatpush3.bf16.msra.mxu0 %v3003_v1 }
  0x9c   :  { %2753 = vmatprep.subr.bf16.mxu0 %v3006_v4 }
  0x9d   :  { %2774 = vmatpush3.bf16.msra.mxu1 %v3005_v5 }
  0x9e   :  { %2775 = vmatprep.subr.bf16.mxu1 %v3008_v8 }
  0x9f   :  { %2754 = vmatpush3.bf16.msra.mxu0 %v3007_v9 }
  0xa0   :  { %2783 = vmatprep.subr.bf16.mxu0 %v3010_v12 }
  0xa1   :  { %2776 = vmatpush3.bf16.msra.mxu1 %v3009_v13 }
  0xa2   :  { %2147 = vmatmul.mubr.bf16.vlgmr.msra.gmra.mrb[16].mxu0 %v550_v11  ;;  %2805 = vmatprep.subr.bf16.mxu1 %v3012_v15 }
  0xa3   :  { %2784 = vmatpush3.bf16.msra.mxu0 %v3011_v16  ;;  %2226 = vmatprep.mubr.bf16.mxu0 %v571_v14 }
  0xa4   :  { %2187 = vmatmul.mubr.bf16.vlgmr.msra.gmra.mrb[16].mxu1 %v572_v17  ;;  %2785 = vmatprep.subr.bf16.mxu0 %v3014_v18 }
  0xa5   :  { %2806 = vmatpush3.bf16.msra.mxu1 %v3013_v19  ;;  %2266 = vmatprep.mubr.bf16.mxu1 %v575_v20 }
  0xa6   :  { %2807 = vmatprep.subr.bf16.mxu1 %v3016_v21 }
  0xa7   :  { %2786 = vmatpush3.bf16.msra.mxu0 %v3015_v22 }
  0xa8   :  { %2787 = vmatprep.subr.bf16.mxu0 %v3018_v23 }
  0xa9   :  { %2808 = vmatpush3.bf16.msra.mxu1 %v3017_v24 }
  0xaa   :  { %2809 = vmatprep.subr.bf16.mxu1 %v3020_v25 }
  0xab   :  { %2788 = vmatpush3.bf16.msra.mxu0 %v3019_v26 }
  0xac   :  { %2789 = vmatprep.subr.bf16.mxu0 %v3022_v27 }
  0xad   :  { %2810 = vmatpush3.bf16.msra.mxu1 %v3021_v28 }
  0xae   :  { %2811 = vmatprep.subr.bf16.mxu1 %v3024_v29 }
  0xaf   :  { %2790 = vmatpush3.bf16.msra.mxu0 %v3023_v30 }
  0xb0   :  { %2791 = vmatprep.subr.bf16.mxu0 %v3026_v31 }
  0xb1   :  { %2812 = vmatpush3.bf16.msra.mxu1 %v3025_v32 }
  0xb2   :  { %2813 = vmatprep.subr.bf16.mxu1 %v3028_v33 }
  0xb3   :  { %2792 = vmatpush3.bf16.msra.mxu0 %v3027_v34 }
  0xb4   :  { %2793 = vmatprep.subr.bf16.mxu0 %v3030_v35 }
  0xb5   :  { %2814 = vmatpush3.bf16.msra.mxu1 %v3029_v36 }
  0xb6   :  { %2815 = vmatprep.subr.bf16.mxu1 %v3032_v37 }
  0xb7   :  { %2794 = vmatpush3.bf16.msra.mxu0 %v3031_v38 }
  0xb8   :  { %2795 = vmatprep.subr.bf16.mxu0 %v3034_v39 }
  0xb9   :  { %2816 = vmatpush3.bf16.msra.mxu1 %v3033_v40 }
  0xba   :  { %2817 = vmatprep.subr.bf16.mxu1 %v3036_v42 }
  0xbb   :  { %2796 = vmatpush3.bf16.msra.mxu0 %v3035_v43 }
  0xbc   :  { %10 = vsyncpa [#allocation3], 0  ;;  %2797 = vmatprep.subr.bf16.mxu0 %v3038_v44  ;;  %v557_v48 = vrot.slane %v3607_v3, %v3212_v41  ;;  %v3042_v49 = vld [vmem:[%s3765_s1 + $0x5b8] sm:$0xff]   ;;  %v3043_v50 = vld [vmem:[%s3765_s1 + $0x600] sm:$0xff]   ;;  %v3074_v51 = vmov 0.0   ;;  %vm3075_vm0 = vmmov 0  }
  0xbd   :  { %2818 = vmatpush3.bf16.msra.mxu1 %v3037_v45  ;;  %v3044_v53 = vld [vmem:[%s3765_s1 + $0x608] sm:$0xff]   ;;  %v3045_v54 = vld [vmem:[%s3765_s1 + $0x610] sm:$0xff]   ;;  %v3046_v55 = vld [vmem:[%s3765_s1 + $0x618] sm:$0xff]   ;;  %vm1790_vm1 = vcmask 523264   ;;  %vm2314_vm2 = vcmask 1041408   ;;  %s3076_s21 = smov [#allocation2]  }
  0xbe   :  { %2819 = vmatprep.subr.bf16.mxu1 %v3040_v46  ;;  %v573_v52 = vcombine.high %v557_v48, %v557_v48  ;;  %v2363_v56 = vld.sshfl [vmem:[%s3764_s0 + $0x18] sm:$0x1 pattern:$0x75316420]  ;;  %v2362_v59 = vld [vmem:[%s3766_s2] ss:$0 sm:$0xff] }
  0xbf   :  { %2798 = vmatpush3.bf16.msra.mxu0 %v3039_v47  ;;  %v589_v57 = vrot.slane %v2363_v56, %v3212_v41  ;;  %s2354_s22 = sshll.u32 %s3076_s21, 4  ;;  %s2355_s22 = int_to_ptr.vmem [resolvable:$true] %s2354_s22 }
  0xc0   :  { %2832 = vmatprep.subr.bf16.mxu0 %v3074_v51  ;;  %s3049_s23 = scalar_lea.vmem %s2355_s22, 32  ;;  %p3054_p1 = scmp.lt.s32.totalorder %s2355_s22, %s2355_s22 }
  0xc1   :  { %2820 = vmatpush3.bf16.msra.mxu1 %v3042_v49  ;;  %p3050_p0 = scmp.ne.s32.totalorder %s2355_s22, %s3049_s23  ;;  %p3055_p2 = scmp.lt.s32.totalorder %s3049_s23, %s3049_s23 }
  0xc2   :  { %2227 = vmatmul.mubr.bf16.vlgmr.msra.gmra.mrb[20].mxu0 %v557_v48 }
  0xc3   :  { %2833 = vmatpush3.bf16.msra.mxu0 %v3043_v50  ;;  %2840 = vmatprep.mubr.msk.bf16.mxu0 %vm3075_vm0, %v3074_v51  ;;  %p3056_p3 = por %p3055_p2, %p3054_p1 }
  0xc4   :  { %2267 = vmatmul.mubr.bf16.vlgmr.msra.gmra.mrb[20].mxu1 %v573_v52  ;;  %2834 = vmatprep.subr.bf16.mxu0 %v3074_v51 }
  0xc5   :  { %p3057_p4 = pnand %p3056_p3, %p3050_p0 }
  0xc7   :  { %2835 = vmatpush3.bf16.msra.mxu0 %v3044_v53 }
  0xc8   :  { %2836 = vmatprep.subr.bf16.mxu0 %v3074_v51 }
  0xcb   :  { %2837 = vmatpush3.bf16.msra.mxu0 %v3045_v54 }
  0xcc   :  { %2838 = vmatprep.subr.bf16.mxu0 %v3074_v51 }
  0xcf   :  { %2839 = vmatpush3.bf16.msra.mxu0 %v3046_v55 }
  0xd2   :  { %2841 = vmatmul.mubr.msk.bf16.vlgmr.msra.gmra.mrb[24].mxu0 %vm1790_vm1, %v589_v57 }
  0xf5   :  { %v2579_v58 = vpop.f32.mrb[0].mxu0 }
  0xf6   :  { %v2580_v60 = vpop.f32.mrb[1].mxu0 }
  0xf7   :  { %v2581_v61 = vadd.f32 %v2580_v60, %v2579_v58  ;;  %v2582_v62 = vpop.f32.mrb[2].mxu0  ;;  %v2601_v63 = vpop.f32.mrb[0].mxu1 }
  0xf8   :  { %v2583_v0 = vpop.f32.mrb[3].mxu0  ;;  %v2602_v1 = vpop.f32.mrb[1].mxu1 }
  0xf9   :  { %v1829_v2 = vadd.f32 %v2581_v61, %v2362_v59  ;;  %v2603_v3 = vadd.f32 %v2602_v1, %v2601_v63  ;;  %v2604_v4 = vpop.f32.mrb[2].mxu1 }
  0xfa   :  { %v2605_v5 = vpop.f32.mrb[3].mxu1 }
  0xfb   :  { %v1869_v6 = vadd.f32 %v2603_v3, %v1829_v2 }
 0x115   :  { %v2623_v41 = vpop.f32.mrb[4].mxu0 }
 0x116   :  { %v2624_v7 = vpop.f32.mrb[5].mxu0 }
 0x117   :  { %v2625_v8 = vadd.f32 %v2624_v7, %v2623_v41  ;;  %v2626_v9 = vpop.f32.mrb[6].mxu0  ;;  %v2645_v10 = vpop.f32.mrb[4].mxu1 }
 0x118   :  { %v2627_v11 = vpop.f32.mrb[7].mxu0  ;;  %v2646_v12 = vpop.f32.mrb[5].mxu1 }
 0x119   :  { %v1909_v13 = vadd.f32 %v2625_v8, %v1869_v6  ;;  %v2647_v14 = vadd.f32 %v2646_v12, %v2645_v10  ;;  %v2648_v15 = vpop.f32.mrb[6].mxu1 }
 0x11a   :  { %v2649_v16 = vpop.f32.mrb[7].mxu1 }
 0x11b   :  { %v1949_v17 = vadd.f32 %v2647_v14, %v1909_v13 }
 0x135   :  { %v2667_v18 = vpop.f32.mrb[8].mxu0 }
 0x136   :  { %v2668_v19 = vpop.f32.mrb[9].mxu0 }
 0x137   :  { %v2669_v20 = vadd.f32 %v2668_v19, %v2667_v18  ;;  %v2670_v21 = vpop.f32.mrb[10].mxu0  ;;  %v2689_v22 = vpop.f32.mrb[8].mxu1  ;;  %v2561_v19 = vld [vmem:[%s3767_s3] ss:$0 sm:$0xff] }
 0x138   :  { %v2671_v23 = vpop.f32.mrb[11].mxu0  ;;  %v2690_v24 = vpop.f32.mrb[9].mxu1  ;;  %v2562_v21 = vld [vmem:[%s3768_s4] ss:$0 sm:$0xff] }
 0x139   :  { %v1989_v25 = vadd.f32 %v2669_v20, %v1949_v17  ;;  %v2691_v26 = vadd.f32 %v2690_v24, %v2689_v22  ;;  %v2692_v27 = vpop.f32.mrb[10].mxu1 }
 0x13a   :  { %v2693_v28 = vpop.f32.mrb[11].mxu1 }
 0x13b   :  { %v2029_v29 = vadd.f32 %v2691_v26, %v1989_v25 }
 0x155   :  { %v2711_v30 = vpop.f32.mrb[12].mxu0 }
 0x156   :  { %v2712_v31 = vpop.f32.mrb[13].mxu0 }
 0x157   :  { %v2713_v32 = vadd.f32 %v2712_v31, %v2711_v30  ;;  %v2714_v33 = vpop.f32.mrb[14].mxu0  ;;  %v2733_v34 = vpop.f32.mrb[12].mxu1 }
 0x158   :  { %v2715_v35 = vpop.f32.mrb[15].mxu0  ;;  %v2734_v36 = vpop.f32.mrb[13].mxu1 }
 0x159   :  { %v2069_v37 = vadd.f32 %v2713_v32, %v2029_v29  ;;  %v2735_v38 = vadd.f32 %v2734_v36, %v2733_v34  ;;  %v2736_v39 = vpop.f32.mrb[14].mxu1 }
 0x15a   :  { %v2737_v40 = vpop.f32.mrb[15].mxu1 }
 0x15b   :  { %v2109_v42 = vadd.f32 %v2735_v38, %v2069_v37 }
 0x175   :  { %v2755_v43 = vpop.f32.mrb[16].mxu0 }
 0x176   :  { %v2756_v44 = vpop.f32.mrb[17].mxu0 }
 0x177   :  { %v2757_v45 = vadd.f32 %v2756_v44, %v2755_v43  ;;  %v2758_v46 = vpop.f32.mrb[18].mxu0  ;;  %v2777_v47 = vpop.f32.mrb[16].mxu1 }
 0x178   :  { %v2759_v48 = vpop.f32.mrb[19].mxu0  ;;  %v2778_v49 = vpop.f32.mrb[17].mxu1 }
 0x179   :  { %v2149_v50 = vadd.f32 %v2757_v45, %v2109_v42  ;;  %v2779_v51 = vadd.f32 %v2778_v49, %v2777_v47  ;;  %v2780_v52 = vpop.f32.mrb[18].mxu1 }
 0x17a   :  { %v2781_v53 = vpop.f32.mrb[19].mxu1 }
 0x17b   :  { %v2189_v54 = vadd.f32 %v2779_v51, %v2149_v50 }
 0x195   :  { %v2799_v55 = vpop.f32.mrb[20].mxu0 }
 0x196   :  { %v2800_v56 = vpop.f32.mrb[21].mxu0 }
 0x197   :  { %v2801_v57 = vadd.f32 %v2800_v56, %v2799_v55  ;;  %v2802_v58 = vpop.f32.mrb[22].mxu0  ;;  %v2821_v59 = vpop.f32.mrb[20].mxu1 }
 0x198   :  { %v2803_v60 = vpop.f32.mrb[23].mxu0  ;;  %v2822_v61 = vpop.f32.mrb[21].mxu1 }
 0x199   :  { %v2229_v62 = vadd.f32 %v2801_v57, %v2189_v54  ;;  %v2823_v63 = vadd.f32 %v2822_v61, %v2821_v59  ;;  %v2824_v0 = vpop.f32.mrb[22].mxu1 }
 0x19a   :  { %v2825_v1 = vpop.f32.mrb[23].mxu1 }
 0x19b   :  { %v2269_v2 = vadd.f32 %v2823_v63, %v2229_v62 }
 0x1a5   :  { %v2308_v3 = vpop.f32.mrb[24].mxu0 }
 0x1a6   :  { %v2309_v4 = vadd.f32 %v2308_v3, %v2269_v2  ;;  %v2842_v5 = vpop.f32.mrb[25].mxu0 }
 0x1a7   :  { %v2311_v6 = vpop.f32.mrb[26].mxu0 }
 0x1a8   :  { %v2843_v41 = vpop.f32.mrb[27].mxu0  ;;  %v2315_v7 = vsel %vm2314_vm2, %v2309_v4, 0.0  ;;  %v2320_v8 = vmul.f32 %v2309_v4, %v2309_v4 }
 0x1a9   :  { %2316 = vadd.xlane.f32.xlu0 %v2315_v7 }
 0x1aa   :  { %v2321_v9 = vsel %vm2314_vm2, %v2320_v8, 0.0 }
 0x1ad   :  { %2322 = vadd.xlane.f32.xlu0 %v2321_v9 }
 0x236   :  { %v2317_v10 = vpop.xlane.xlu0 %2316 }
 0x237   :  { %v2319_v11 = vmul.f32 0.0078125, %v2317_v10 }
 0x239   :  { %v2325_v13 = vmul.f32 %v2319_v11, %v2319_v11  ;;  %v2327_v17 = vsub.f32 %v2309_v4, %v2319_v11 }
 0x23a   :  { %v2323_v12 = vpop.xlane.xlu0 %2322 }
 0x23b   :  { %v2324_v14 = vmul.f32 0.0078125, %v2323_v12 }
 0x23d   :  { %v2326_v15 = vsub.f32 %v2324_v14, %v2325_v13 }
 0x23f   :  { %v2328_v16 = vadd.f32 1e-05, %v2326_v15 }
 0x241   :  { %3047 = vrsqrt.f32 %v2328_v16 }
 0x24b   :  { %v3048_v18 = vpop.eup %3047 }
 0x24c   :  { %v2330_v20 = vmul.f32 %v3048_v18, %v2327_v17 }
 0x24e   :  { %v2338_v22 = vmul.f32 %v2561_v19, %v2330_v20 }
 0x250   :  { %v2346_v23 = vadd.f32 %v2562_v21, %v2338_v22 }
 0x252   :  { %2347 = vst [vmem:[#allocation2] sm:$0x3] %v2346_v23 }
 0x253   :  { %3060 = shalt.err (!%p3057_p4)
}
 0x254   :  { %s3061_s25 = scalar_lea.hbm %s3769_s5, 32 }
 0x255   :  { %p3062_p5 = scmp.ne.s32.totalorder %s3769_s5, %s3061_s25  ;;  %p3065_p6 = scmp.lt.u32.totalorder %s3061_s25, %s3769_s5 }
 0x257   :  { %p3067_p7 = pnand %p3065_p6, %p3062_p5 }
 0x259   :  { %3070 = shalt.err (!%p3067_p7)
}
 0x25a   :  { %2357 = dma.vmem_to_hbm [thread:$0]  %s2355_s22, 32, %s3769_s5, [#allocation3]  }
 0x25b   :  { %3071 = dma.done.wait [#allocation3], 32  }
 0x25c   :  { %3072 = vsyncadd [#allocation3], 4294967264 }
 0x25d   :  { %2361 = vsyncpa [#allocation3], 1 }

// kernel: joint_embedding_forward.7
= control target key start
LH: loop header
LB: loop body
LE: loop exit
PB: predicated region body
PF: predicated region fallthrough
CT: control target
= control target key end

     0   :  { %vm33_vm0 = vcmask 1041408   ;;  %v206_v2 = vmov 0   ;;  %v207_v3 = vmov 0.0|0.0   ;;  %s267_s0 = inlined_call_operand.vmem [shape: s32[2,1], index: 0, kind: input, shape index: {}]   ;;  %s268_s1 = inlined_call_operand.vmem [shape: f32[10,128], index: 1, kind: input, shape index: {}]   ;;  %s269_s2 = inlined_call_operand.vmem [shape: f32[1,128], index: 2, kind: input, shape index: {}]   ;;  %s270_s3 = inlined_call_operand.vmem [shape: f32[1,128], index: 3, kind: input, shape index: {}]   ;;  %s271_s4 = inlined_call_operand.hbm [shape: f32[2,128], index: 4, kind: output, shape index: {}]  }
   0x1   :  { %v20_v0 = vld [vmem:[%s267_s0] sm:$0x3]  ;;  %179 = vset.pattern.permute.xlu0 %v206_v2  ;;  %169 = vmatprep.subr.bf16.mxu0 %v207_v3  ;;  %v28_v4 = vld [vmem:[%s268_s1 + $0x8] sm:$0x3] }
   0x2   :  { %v27_v1 = vld [vmem:[%s268_s1] sm:$0xff] }
   0x3   :  { %9 = vsyncpa [#allocation3], 0  ;;  %22 = vperm.xlu0 %179, %v20_v0   ;;  %v170_v5 = vpack.c.bf16 %v28_v4, %v27_v1  ;;  %vm208_vm1 = vmmov 1   ;;  %vm209_vm3 = vmmov 0   ;;  %v210_v6 = vmov 0.0   ;;  %s211_s23 = smov [#allocation2]  }
   0x4   :  { %vm171_vm2 = vmpackc.low %vm33_vm0, %vm208_vm1  ;;  %166 = vmatprep.mubr.msk.f32.mxu0 %vm209_vm3, %v210_v6  ;;  %v18_v7 = vlaneseq  ;;  %vm29_vm4 = vcmask 80896   ;;  %v157_v25 = vld [vmem:[%s269_s2] ss:$0 sm:$0xff]  ;;  %s146_s24 = sshll.u32 %s211_s23, 4  ;;  %s147_s24 = int_to_ptr.vmem [resolvable:$true] %s146_s24 }
   0x5   :  { %172 = vmatpush3.bf16.msk.msra.mxu0 %vm171_vm2, %v170_v5  ;;  %v158_v27 = vld [vmem:[%s270_s3] ss:$0 sm:$0xff]  ;;  %s182_s25 = scalar_lea.vmem %s147_s24, 32  ;;  %p187_p1 = scmp.lt.s32.totalorder %s147_s24, %s147_s24 }
   0x6   :  { %v19_v8 = vand.u32 127, %v18_v7  ;;  %p183_p0 = scmp.ne.s32.totalorder %s147_s24, %s182_s25  ;;  %p188_p2 = scmp.lt.s32.totalorder %s182_s25, %s182_s25 }
   0x8   :  { %p189_p3 = por %p188_p2, %p187_p1 }
   0xa   :  { %p190_p4 = pnand %p189_p3, %p183_p0 }
  0x82   :  { %v23_v9 = vpop.permute.xlu0 %22 }
  0x83   :  { %vm24_vm5 = vcmp.eq.s32.totalorder %v19_v8, %v23_v9 }
  0x84   :  { %v154_v10 = vsel %vm24_vm5, 1.0, %v210_v6 }
  0x85   :  { %167 = vmatmul.mubr.msk.f32.vlgmr.msra.gmra.mrb[0].mxu0 %vm29_vm4, %v154_v10 }
 0x158   :  { %v103_v11 = vpop.f32.mrb[0].mxu0 }
 0x159   :  { %v168_v12 = vpop.f32.mrb[1].mxu0  ;;  %v107_v13 = vsel %vm33_vm0, %v103_v11, 0.0  ;;  %v112_v14 = vmul.f32 %v103_v11, %v103_v11 }
 0x15a   :  { %108 = vadd.xlane.f32.xlu0 %v107_v13 }
 0x15b   :  { %v113_v15 = vsel %vm33_vm0, %v112_v14, 0.0 }
 0x15c   :  { %114 = vadd.xlane.f32.xlu1 %v113_v15 }
 0x1e7   :  { %v109_v16 = vpop.xlane.xlu0 %108 }
 0x1e8   :  { %v111_v17 = vmul.f32 0.0078125, %v109_v16 }
 0x1e9   :  { %v115_v18 = vpop.xlane.xlu1 %114 }
 0x1ea   :  { %v117_v19 = vmul.f32 %v111_v17, %v111_v17  ;;  %v116_v20 = vmul.f32 0.0078125, %v115_v18  ;;  %v119_v23 = vsub.f32 %v103_v11, %v111_v17 }
 0x1ec   :  { %v118_v21 = vsub.f32 %v116_v20, %v117_v19 }
 0x1ee   :  { %v120_v22 = vadd.f32 1e-05, %v118_v21 }
 0x1f0   :  { %180 = vrsqrt.f32 %v120_v22 }
 0x1fa   :  { %v181_v24 = vpop.eup %180 }
 0x1fb   :  { %v122_v26 = vmul.f32 %v181_v24, %v119_v23 }
 0x1fd   :  { %v130_v28 = vmul.f32 %v157_v25, %v122_v26 }
 0x1ff   :  { %v138_v29 = vadd.f32 %v158_v27, %v130_v28 }
 0x201   :  { %139 = vst [vmem:[#allocation2] sm:$0x3] %v138_v29 }
 0x202   :  { %193 = shalt.err (!%p190_p4)
}
 0x203   :  { %s194_s27 = scalar_lea.hbm %s271_s4, 32 }
 0x204   :  { %p195_p5 = scmp.ne.s32.totalorder %s271_s4, %s194_s27  ;;  %p198_p6 = scmp.lt.u32.totalorder %s194_s27, %s271_s4 }
 0x206   :  { %p200_p7 = pnand %p198_p6, %p195_p5 }
 0x208   :  { %203 = shalt.err (!%p200_p7)
}
 0x209   :  { %149 = dma.vmem_to_hbm [thread:$0]  %s147_s24, 32, %s271_s4, [#allocation3]  }
 0x20a   :  { %204 = dma.done.wait [#allocation3], 32  }
 0x20b   :  { %205 = vsyncadd [#allocation3], 4294967264 }
 0x20c   :  { %153 = vsyncpa [#allocation3], 1 }

</bundles_post_ra>
